<compile_context>
chip_gen: v7x
topology: tpu7x:2x2x1
jax: 0.10.0
libtpu: 0.0.40
codegen_flags: <defaults>
</compile_context>

<pallas_src>
import jax
import jax.numpy as jnp
from jax import lax
from jax.experimental import pallas as pl
from jax.experimental.pallas import tpu as pltpu


# ---- model hyperparameters (small, consistent with the module) ----
Z_DIM = 32
CHANNELS = 4
IMG_SIZE = 16
IMG_FLAT = CHANNELS * IMG_SIZE * IMG_SIZE   # 1024 — matches Linear(1024, prod(img_shape))
BATCH = 8
BN_EPS = 0.8            # nn.BatchNorm1d(out_feat, 0.8) -> eps=0.8
LRELU_SLOPE = 0.2

# Packed per-feature vector layout (all offsets are multiples of 128 -> cheap
# lane-aligned static slices inside the kernel).
#   b1[128] | g2[256] | be2[256] | g3[512] | be3[512] | g4[1024] | be4[1024] | b5[1024]
_VEC_SPLITS = {
    "b1":  (0, 128),
    "g2":  (128, 384),
    "be2": (384, 640),
    "g3":  (640, 1152),
    "be3": (1152, 1664),
    "g4":  (1664, 2688),
    "be4": (2688, 3712),
    "b5":  (3712, 4736),
}
_VEC_LEN = 4736


def _leaky_relu(x):
    return jnp.where(x > 0, x, LRELU_SLOPE * x)


def _dot_bf16(x_f32, w_bf16):
    """MXU matmul: bf16 inputs, f32 accumulation."""
    return jnp.dot(x_f32.astype(jnp.bfloat16), w_bf16,
                   preferred_element_type=jnp.float32)


def _bn_block(h, w_bf16, gamma, beta):
    """Linear (bias-free; bias cancels under BN) -> BatchNorm1d(train) -> LeakyReLU."""
    y = _dot_bf16(h, w_bf16)
    mu = jnp.mean(y, axis=0, keepdims=True)
    d = y - mu
    var = jnp.mean(d * d, axis=0, keepdims=True)          # biased batch variance
    scale = gamma * lax.rsqrt(var + BN_EPS)               # fused gamma * 1/std
    return _leaky_relu(d * scale + beta)


def generator_kernel(
    z_ref, w1_ref, w2_ref, w3_ref, w4_hbm, w5_hbm, vec_ref,   # inputs
    out_ref,                                                   # output
    w4_buf, w5_buf, dma_sem,                                   # scratch
):
    # Kick off the big-weight DMAs first so they overlap with layers 1-3 compute.
    w4_cp = pltpu.make_async_copy(w4_hbm, w4_buf, dma_sem.at[0])
    w5_cp = pltpu.make_async_copy(w5_hbm, w5_buf, dma_sem.at[1])
    w4_cp.start()
    w5_cp.start()

    # Static, 128-aligned slices of the packed per-feature vector.
    def vec(name):
        lo, hi = _VEC_SPLITS[name]
        return vec_ref[:, lo:hi]                # shape (1, dout), f32

    x = z_ref[...].astype(jnp.float32)

    # block(z_dim, 128, normalize=False)
    h = _leaky_relu(_dot_bf16(x, w1_ref[...]) + vec("b1"))

    # block(128, 256) / block(256, 512)
    h = _bn_block(h, w2_ref[...], vec("g2"), vec("be2"))
    h = _bn_block(h, w3_ref[...], vec("g3"), vec("be3"))

    # block(512, 1024) — wait only when the weight is actually needed.
    w4_cp.wait()
    h = _bn_block(h, w4_buf[...], vec("g4"), vec("be4"))

    # Linear(1024, C*H*W) -> Tanh
    w5_cp.wait()
    h = _dot_bf16(h, w5_buf[...]) + vec("b5")
    out_ref[...] = jnp.tanh(h)


def init_params(key):
    """Deterministic PyTorch-style init. Weights stored as bf16 (streamed dtype)."""
    dims = [(Z_DIM, 128), (128, 256), (256, 512), (512, 1024), (1024, IMG_FLAT)]
    keys = jax.random.split(key, 2 * len(dims))
    params = {}
    for i, (din, dout) in enumerate(dims, start=1):
        bound = 1.0 / float(din) ** 0.5
        w = jax.random.uniform(keys[2 * i - 2], (din, dout), jnp.float32, -bound, bound)
        b = jax.random.uniform(keys[2 * i - 1], (1, dout), jnp.float32, -bound, bound)
        params[f"w{i}"] = w.astype(jnp.bfloat16)
        params[f"b{i}"] = b                                # f32 (b2-b4 unused by kernel)
    # BatchNorm affine params for layers 2..4 (fresh init: gamma=1, beta=0)
    for i, dout in zip((2, 3, 4), (256, 512, 1024)):
        params[f"g{i}"] = jnp.ones((1, dout), jnp.float32)
        params[f"be{i}"] = jnp.zeros((1, dout), jnp.float32)
    # One packed f32 vector for all small per-feature params the kernel needs.
    params["vec"] = jnp.concatenate(
        [params["b1"], params["g2"], params["be2"], params["g3"], params["be3"],
         params["g4"], params["be4"], params["b5"]], axis=1)
    assert params["vec"].shape == (1, _VEC_LEN)
    return params


def generator_forward(z, params):
    vmem = pltpu.MemorySpace.VMEM
    flat = pl.pallas_call(
        generator_kernel,
        out_shape=jax.ShapeDtypeStruct((z.shape[0], IMG_FLAT), jnp.float32),
        in_specs=[
            pl.BlockSpec(memory_space=vmem),      # z
            pl.BlockSpec(memory_space=vmem),      # w1 (8 KiB)
            pl.BlockSpec(memory_space=vmem),      # w2 (64 KiB)
            pl.BlockSpec(memory_space=vmem),      # w3 (256 KiB)
            pl.BlockSpec(memory_space=pl.ANY),    # w4 (1 MiB) — manual DMA
            pl.BlockSpec(memory_space=pl.ANY),    # w5 (2 MiB) — manual DMA
            pl.BlockSpec(memory_space=vmem),      # packed per-feature vector
        ],
        out_specs=pl.BlockSpec(memory_space=vmem),
        scratch_shapes=[
            pltpu.VMEM((512, 1024), jnp.bfloat16),       # w4 landing buffer
            pltpu.VMEM((1024, IMG_FLAT), jnp.bfloat16),  # w5 landing buffer
            pltpu.SemaphoreType.DMA((2,)),
        ],
        compiler_params=pltpu.CompilerParams(vmem_limit_bytes=16 << 20),
    )(z, params["w1"], params["w2"], params["w3"], params["w4"], params["w5"],
      params["vec"])
    # img.view(B, *img_shape) -> NCHW
    return flat.reshape(z.shape[0], CHANNELS, IMG_SIZE, IMG_SIZE)


def _reference_forward(z, params):
    """Pure-JAX reference (same bf16-weight / f32-accumulate arithmetic).

    Includes the b2/b3/b4 bias adds to verify they are mathematically dead
    under training-mode BatchNorm (the kernel elides them).
    """
    def dot(h, w):
        return jnp.dot(h.astype(jnp.bfloat16), w, preferred_element_type=jnp.float32)

    h = dot(z, params["w1"]) + params["b1"]
    h = jnp.where(h > 0, h, LRELU_SLOPE * h)
    for i in (2, 3, 4):
        h = dot(h, params[f"w{i}"]) + params[f"b{i}"]
        mu = jnp.mean(h, axis=0, keepdims=True)
        var = jnp.mean((h - mu) ** 2, axis=0, keepdims=True)
        h = (h - mu) / jnp.sqrt(var + BN_EPS) * params[f"g{i}"] + params[f"be{i}"]
        h = jnp.where(h > 0, h, LRELU_SLOPE * h)
    h = jnp.tanh(dot(h, params["w5"]) + params["b5"])
    return h.reshape(z.shape[0], CHANNELS, IMG_SIZE, IMG_SIZE)


if __name__ == "__main__":
    key = jax.random.PRNGKey(0)
    k_z, k_p = jax.random.split(key)
    z = jax.random.normal(k_z, (BATCH, Z_DIM), jnp.float32)
    params = init_params(k_p)

    img = generator_forward(z, params)
    img = jax.block_until_ready(img)

    ref = _reference_forward(z, params)
    assert img.shape == (BATCH, CHANNELS, IMG_SIZE, IMG_SIZE)
    # bf16 matmul inputs + BN normalization -> slightly looser tolerance than pure f32.
    assert jnp.allclose(img, ref, atol=1e-2, rtol=1e-2), float(jnp.max(jnp.abs(img - ref)))

    print("KERNEL_OK")
</pallas_src>

<mosaic_0001>
module attributes {stable_mosaic.version = 11 : i64} {
  func.func @generator_kernel(%arg0: memref<8x32xf32, #tpu.memory_space<vmem>>, %arg1: memref<32x128xbf16, #tpu.memory_space<vmem>>, %arg2: memref<128x256xbf16, #tpu.memory_space<vmem>>, %arg3: memref<256x512xbf16, #tpu.memory_space<vmem>>, %arg4: memref<512x1024xbf16, #tpu.memory_space<any>>, %arg5: memref<1024x1024xbf16, #tpu.memory_space<any>>, %arg6: memref<1x4736xf32, #tpu.memory_space<vmem>>, %arg7: memref<8x1024xf32, #tpu.memory_space<vmem>>, %arg8: memref<512x1024xbf16, #tpu.memory_space<vmem>>, %arg9: memref<1024x1024xbf16, #tpu.memory_space<vmem>>, %arg10: memref<2x!tpu.dma_semaphore, #tpu.memory_space<semaphore_mem>>) attributes {dimension_semantics = [], scalar_prefetch = 0 : i64, scratch_operands = 3 : i64, tpu.core_type = #tpu.core_type<tc>} {
    %c0_i32 = arith.constant 0 : i32
    %0 = tpu.memref_slice %arg10[%c0_i32] : memref<2x!tpu.dma_semaphore, #tpu.memory_space<semaphore_mem>> -> memref<1x!tpu.dma_semaphore, #tpu.memory_space<semaphore_mem>>
    %1 = tpu.memref_squeeze %0 : memref<1x!tpu.dma_semaphore, #tpu.memory_space<semaphore_mem>> -> memref<!tpu.dma_semaphore, #tpu.memory_space<semaphore_mem>>
    tpu.enqueue_dma source(%arg4 : memref<512x1024xbf16, #tpu.memory_space<any>>) target(%arg8 : memref<512x1024xbf16, #tpu.memory_space<vmem>>) target_semaphore(%1 : memref<!tpu.dma_semaphore, #tpu.memory_space<semaphore_mem>>)
    %c1_i32 = arith.constant 1 : i32
    %2 = tpu.memref_slice %arg10[%c1_i32] : memref<2x!tpu.dma_semaphore, #tpu.memory_space<semaphore_mem>> -> memref<1x!tpu.dma_semaphore, #tpu.memory_space<semaphore_mem>>
    %3 = tpu.memref_squeeze %2 : memref<1x!tpu.dma_semaphore, #tpu.memory_space<semaphore_mem>> -> memref<!tpu.dma_semaphore, #tpu.memory_space<semaphore_mem>>
    tpu.enqueue_dma source(%arg5 : memref<1024x1024xbf16, #tpu.memory_space<any>>) target(%arg9 : memref<1024x1024xbf16, #tpu.memory_space<vmem>>) target_semaphore(%3 : memref<!tpu.dma_semaphore, #tpu.memory_space<semaphore_mem>>)
    %c0 = arith.constant 0 : index
    %c0_0 = arith.constant 0 : index
    %4 = vector.load %arg0[%c0, %c0_0] : memref<8x32xf32, #tpu.memory_space<vmem>>, vector<8x32xf32>
    %c0_1 = arith.constant 0 : index
    %c0_2 = arith.constant 0 : index
    %5 = vector.load %arg1[%c0_1, %c0_2] : memref<32x128xbf16, #tpu.memory_space<vmem>>, vector<32x128xbf16>
    %6 = arith.truncf %4 : vector<8x32xf32> to vector<8x32xbf16>
    %cst = arith.constant dense<0.000000e+00> : vector<8x128xf32>
    %7 = tpu.matmul %6, %5, %cst {dimension_numbers = #tpu.dot_dimension_numbers<[1], [0], [0], [1], [0, 0, 1, 1], [], []>} : vector<8x32xbf16>, vector<32x128xbf16>, vector<8x128xf32> -> vector<8x128xf32>
    %c0_3 = arith.constant 0 : index
    %c0_4 = arith.constant 0 : index
    %8 = vector.load %arg6[%c0_3, %c0_4] : memref<1x4736xf32, #tpu.memory_space<vmem>>, vector<1x128xf32>
    %9 = vector.broadcast %8 : vector<1x128xf32> to vector<8x128xf32>
    %10 = arith.addf %7, %9 : vector<8x128xf32>
    %cst_5 = arith.constant 0.000000e+00 : f32
    %11 = vector.broadcast %cst_5 : f32 to vector<8x128xf32>
    %12 = arith.cmpf ogt, %10, %11 : vector<8x128xf32>
    %cst_6 = arith.constant 2.000000e-01 : f32
    %13 = vector.broadcast %cst_6 : f32 to vector<8x128xf32>
    %14 = arith.mulf %13, %10 : vector<8x128xf32>
    %15 = arith.select %12, %10, %14 : vector<8x128xi1>, vector<8x128xf32>
    %c0_7 = arith.constant 0 : index
    %c0_8 = arith.constant 0 : index
    %16 = vector.load %arg2[%c0_7, %c0_8] : memref<128x256xbf16, #tpu.memory_space<vmem>>, vector<128x256xbf16>
    %c0_9 = arith.constant 0 : index
    %c128 = arith.constant 128 : index
    %17 = vector.load %arg6[%c0_9, %c128] : memref<1x4736xf32, #tpu.memory_space<vmem>>, vector<1x256xf32>
    %c0_10 = arith.constant 0 : index
    %c384 = arith.constant 384 : index
    %18 = vector.load %arg6[%c0_10, %c384] : memref<1x4736xf32, #tpu.memory_space<vmem>>, vector<1x256xf32>
    %19 = arith.truncf %15 : vector<8x128xf32> to vector<8x128xbf16>
    %cst_11 = arith.constant dense<0.000000e+00> : vector<8x256xf32>
    %20 = tpu.matmul %19, %16, %cst_11 {dimension_numbers = #tpu.dot_dimension_numbers<[1], [0], [0], [1], [0, 0, 1, 1], [], []>} : vector<8x128xbf16>, vector<128x256xbf16>, vector<8x256xf32> -> vector<8x256xf32>
    %cst_12 = arith.constant dense<0.000000e+00> : vector<256xf32>
    %21 = vector.multi_reduction <add>, %20, %cst_12 [0] : vector<8x256xf32> to vector<256xf32>
    %22 = vector.shape_cast %21 : vector<256xf32> to vector<1x256xf32>
    %cst_13 = arith.constant 8.000000e+00 : f32
    %23 = vector.broadcast %cst_13 : f32 to vector<1x256xf32>
    %24 = arith.divf %22, %23 : vector<1x256xf32>
    %25 = vector.broadcast %24 : vector<1x256xf32> to vector<8x256xf32>
    %26 = arith.subf %20, %25 : vector<8x256xf32>
    %27 = arith.mulf %26, %26 : vector<8x256xf32>
    %cst_14 = arith.constant dense<0.000000e+00> : vector<256xf32>
    %28 = vector.multi_reduction <add>, %27, %cst_14 [0] : vector<8x256xf32> to vector<256xf32>
    %29 = vector.shape_cast %28 : vector<256xf32> to vector<1x256xf32>
    %cst_15 = arith.constant 8.000000e+00 : f32
    %30 = vector.broadcast %cst_15 : f32 to vector<1x256xf32>
    %31 = arith.divf %29, %30 : vector<1x256xf32>
    %cst_16 = arith.constant 8.000000e-01 : f32
    %32 = vector.broadcast %cst_16 : f32 to vector<1x256xf32>
    %33 = arith.addf %31, %32 : vector<1x256xf32>
    %34 = math.rsqrt %33 : vector<1x256xf32>
    %35 = arith.mulf %17, %34 : vector<1x256xf32>
    %36 = vector.broadcast %35 : vector<1x256xf32> to vector<8x256xf32>
    %37 = arith.mulf %26, %36 : vector<8x256xf32>
    %38 = vector.broadcast %18 : vector<1x256xf32> to vector<8x256xf32>
    %39 = arith.addf %37, %38 : vector<8x256xf32>
    %cst_17 = arith.constant 0.000000e+00 : f32
    %40 = vector.broadcast %cst_17 : f32 to vector<8x256xf32>
    %41 = arith.cmpf ogt, %39, %40 : vector<8x256xf32>
    %cst_18 = arith.constant 2.000000e-01 : f32
    %42 = vector.broadcast %cst_18 : f32 to vector<8x256xf32>
    %43 = arith.mulf %42, %39 : vector<8x256xf32>
    %44 = arith.select %41, %39, %43 : vector<8x256xi1>, vector<8x256xf32>
    %c0_19 = arith.constant 0 : index
    %c0_20 = arith.constant 0 : index
    %45 = vector.load %arg3[%c0_19, %c0_20] : memref<256x512xbf16, #tpu.memory_space<vmem>>, vector<256x512xbf16>
    %c0_21 = arith.constant 0 : index
    %c640 = arith.constant 640 : index
    %46 = vector.load %arg6[%c0_21, %c640] : memref<1x4736xf32, #tpu.memory_space<vmem>>, vector<1x512xf32>
    %c0_22 = arith.constant 0 : index
    %c1152 = arith.constant 1152 : index
    %47 = vector.load %arg6[%c0_22, %c1152] : memref<1x4736xf32, #tpu.memory_space<vmem>>, vector<1x512xf32>
    %48 = arith.truncf %44 : vector<8x256xf32> to vector<8x256xbf16>
    %cst_23 = arith.constant dense<0.000000e+00> : vector<8x512xf32>
    %49 = tpu.matmul %48, %45, %cst_23 {dimension_numbers = #tpu.dot_dimension_numbers<[1], [0], [0], [1], [0, 0, 1, 1], [], []>} : vector<8x256xbf16>, vector<256x512xbf16>, vector<8x512xf32> -> vector<8x512xf32>
    %cst_24 = arith.constant dense<0.000000e+00> : vector<512xf32>
    %50 = vector.multi_reduction <add>, %49, %cst_24 [0] : vector<8x512xf32> to vector<512xf32>
    %51 = vector.shape_cast %50 : vector<512xf32> to vector<1x512xf32>
    %cst_25 = arith.constant 8.000000e+00 : f32
    %52 = vector.broadcast %cst_25 : f32 to vector<1x512xf32>
    %53 = arith.divf %51, %52 : vector<1x512xf32>
    %54 = vector.broadcast %53 : vector<1x512xf32> to vector<8x512xf32>
    %55 = arith.subf %49, %54 : vector<8x512xf32>
    %56 = arith.mulf %55, %55 : vector<8x512xf32>
    %cst_26 = arith.constant dense<0.000000e+00> : vector<512xf32>
    %57 = vector.multi_reduction <add>, %56, %cst_26 [0] : vector<8x512xf32> to vector<512xf32>
    %58 = vector.shape_cast %57 : vector<512xf32> to vector<1x512xf32>
    %cst_27 = arith.constant 8.000000e+00 : f32
    %59 = vector.broadcast %cst_27 : f32 to vector<1x512xf32>
    %60 = arith.divf %58, %59 : vector<1x512xf32>
    %cst_28 = arith.constant 8.000000e-01 : f32
    %61 = vector.broadcast %cst_28 : f32 to vector<1x512xf32>
    %62 = arith.addf %60, %61 : vector<1x512xf32>
    %63 = math.rsqrt %62 : vector<1x512xf32>
    %64 = arith.mulf %46, %63 : vector<1x512xf32>
    %65 = vector.broadcast %64 : vector<1x512xf32> to vector<8x512xf32>
    %66 = arith.mulf %55, %65 : vector<8x512xf32>
    %67 = vector.broadcast %47 : vector<1x512xf32> to vector<8x512xf32>
    %68 = arith.addf %66, %67 : vector<8x512xf32>
    %cst_29 = arith.constant 0.000000e+00 : f32
    %69 = vector.broadcast %cst_29 : f32 to vector<8x512xf32>
    %70 = arith.cmpf ogt, %68, %69 : vector<8x512xf32>
    %cst_30 = arith.constant 2.000000e-01 : f32
    %71 = vector.broadcast %cst_30 : f32 to vector<8x512xf32>
    %72 = arith.mulf %71, %68 : vector<8x512xf32>
    %73 = arith.select %70, %68, %72 : vector<8x512xi1>, vector<8x512xf32>
    %c0_i32_31 = arith.constant 0 : i32
    %74 = tpu.memref_slice %arg10[%c0_i32_31] : memref<2x!tpu.dma_semaphore, #tpu.memory_space<semaphore_mem>> -> memref<1x!tpu.dma_semaphore, #tpu.memory_space<semaphore_mem>>
    %75 = tpu.memref_squeeze %74 : memref<1x!tpu.dma_semaphore, #tpu.memory_space<semaphore_mem>> -> memref<!tpu.dma_semaphore, #tpu.memory_space<semaphore_mem>>
    tpu.wait_dma2 semaphore(%75 : memref<!tpu.dma_semaphore, #tpu.memory_space<semaphore_mem>>) src(%arg4 : memref<512x1024xbf16, #tpu.memory_space<any>>) dst(%arg8 : memref<512x1024xbf16, #tpu.memory_space<vmem>>)
    %c0_32 = arith.constant 0 : index
    %c0_33 = arith.constant 0 : index
    %76 = vector.load %arg8[%c0_32, %c0_33] : memref<512x1024xbf16, #tpu.memory_space<vmem>>, vector<512x1024xbf16>
    %c0_34 = arith.constant 0 : index
    %c1664 = arith.constant 1664 : index
    %77 = vector.load %arg6[%c0_34, %c1664] : memref<1x4736xf32, #tpu.memory_space<vmem>>, vector<1x1024xf32>
    %c0_35 = arith.constant 0 : index
    %c2688 = arith.constant 2688 : index
    %78 = vector.load %arg6[%c0_35, %c2688] : memref<1x4736xf32, #tpu.memory_space<vmem>>, vector<1x1024xf32>
    %79 = arith.truncf %73 : vector<8x512xf32> to vector<8x512xbf16>
    %cst_36 = arith.constant dense<0.000000e+00> : vector<8x1024xf32>
    %80 = tpu.matmul %79, %76, %cst_36 {dimension_numbers = #tpu.dot_dimension_numbers<[1], [0], [0], [1], [0, 0, 1, 1], [], []>} : vector<8x512xbf16>, vector<512x1024xbf16>, vector<8x1024xf32> -> vector<8x1024xf32>
    %cst_37 = arith.constant dense<0.000000e+00> : vector<1024xf32>
    %81 = vector.multi_reduction <add>, %80, %cst_37 [0] : vector<8x1024xf32> to vector<1024xf32>
    %82 = vector.shape_cast %81 : vector<1024xf32> to vector<1x1024xf32>
    %cst_38 = arith.constant 8.000000e+00 : f32
    %83 = vector.broadcast %cst_38 : f32 to vector<1x1024xf32>
    %84 = arith.divf %82, %83 : vector<1x1024xf32>
    %85 = vector.broadcast %84 : vector<1x1024xf32> to vector<8x1024xf32>
    %86 = arith.subf %80, %85 : vector<8x1024xf32>
    %87 = arith.mulf %86, %86 : vector<8x1024xf32>
    %cst_39 = arith.constant dense<0.000000e+00> : vector<1024xf32>
    %88 = vector.multi_reduction <add>, %87, %cst_39 [0] : vector<8x1024xf32> to vector<1024xf32>
    %89 = vector.shape_cast %88 : vector<1024xf32> to vector<1x1024xf32>
    %cst_40 = arith.constant 8.000000e+00 : f32
    %90 = vector.broadcast %cst_40 : f32 to vector<1x1024xf32>
    %91 = arith.divf %89, %90 : vector<1x1024xf32>
    %cst_41 = arith.constant 8.000000e-01 : f32
    %92 = vector.broadcast %cst_41 : f32 to vector<1x1024xf32>
    %93 = arith.addf %91, %92 : vector<1x1024xf32>
    %94 = math.rsqrt %93 : vector<1x1024xf32>
    %95 = arith.mulf %77, %94 : vector<1x1024xf32>
    %96 = vector.broadcast %95 : vector<1x1024xf32> to vector<8x1024xf32>
    %97 = arith.mulf %86, %96 : vector<8x1024xf32>
    %98 = vector.broadcast %78 : vector<1x1024xf32> to vector<8x1024xf32>
    %99 = arith.addf %97, %98 : vector<8x1024xf32>
    %cst_42 = arith.constant 0.000000e+00 : f32
    %100 = vector.broadcast %cst_42 : f32 to vector<8x1024xf32>
    %101 = arith.cmpf ogt, %99, %100 : vector<8x1024xf32>
    %cst_43 = arith.constant 2.000000e-01 : f32
    %102 = vector.broadcast %cst_43 : f32 to vector<8x1024xf32>
    %103 = arith.mulf %102, %99 : vector<8x1024xf32>
    %104 = arith.select %101, %99, %103 : vector<8x1024xi1>, vector<8x1024xf32>
    %c1_i32_44 = arith.constant 1 : i32
    %105 = tpu.memref_slice %arg10[%c1_i32_44] : memref<2x!tpu.dma_semaphore, #tpu.memory_space<semaphore_mem>> -> memref<1x!tpu.dma_semaphore, #tpu.memory_space<semaphore_mem>>
    %106 = tpu.memref_squeeze %105 : memref<1x!tpu.dma_semaphore, #tpu.memory_space<semaphore_mem>> -> memref<!tpu.dma_semaphore, #tpu.memory_space<semaphore_mem>>
    tpu.wait_dma2 semaphore(%106 : memref<!tpu.dma_semaphore, #tpu.memory_space<semaphore_mem>>) src(%arg5 : memref<1024x1024xbf16, #tpu.memory_space<any>>) dst(%arg9 : memref<1024x1024xbf16, #tpu.memory_space<vmem>>)
    %c0_45 = arith.constant 0 : index
    %c0_46 = arith.constant 0 : index
    %107 = vector.load %arg9[%c0_45, %c0_46] : memref<1024x1024xbf16, #tpu.memory_space<vmem>>, vector<1024x1024xbf16>
    %108 = arith.truncf %104 : vector<8x1024xf32> to vector<8x1024xbf16>
    %cst_47 = arith.constant dense<0.000000e+00> : vector<8x1024xf32>
    %109 = tpu.matmul %108, %107, %cst_47 {dimension_numbers = #tpu.dot_dimension_numbers<[1], [0], [0], [1], [0, 0, 1, 1], [], []>} : vector<8x1024xbf16>, vector<1024x1024xbf16>, vector<8x1024xf32> -> vector<8x1024xf32>
    %c0_48 = arith.constant 0 : index
    %c3712 = arith.constant 3712 : index
    %110 = vector.load %arg6[%c0_48, %c3712] : memref<1x4736xf32, #tpu.memory_space<vmem>>, vector<1x1024xf32>
    %111 = vector.broadcast %110 : vector<1x1024xf32> to vector<8x1024xf32>
    %112 = arith.addf %109, %111 : vector<8x1024xf32>
    %113 = math.tanh %112 : vector<8x1024xf32>
    %c0_49 = arith.constant 0 : index
    %c0_50 = arith.constant 0 : index
    %114 = vector.load %arg7[%c0_49, %c0_50] : memref<8x1024xf32, #tpu.memory_space<vmem>>, vector<8x1024xf32>
    tpu.vector_store %arg7[%c0_49, %c0_50], %113 {strides = array<i32>} : memref<8x1024xf32, #tpu.memory_space<vmem>>, vector<8x1024xf32>,
    return
  }
}

</mosaic_0001>

<bundles_post_ra>
// kernel: tpu_custom_call.1
= control target key start
LH: loop header
LB: loop body
LE: loop exit
PB: predicated region body
PF: predicated region fallthrough
CT: control target
= control target key end

     0   :  { %12 = vsyncpa [#allocation6], 0  ;;  %s4228_s0 = inlined_call_operand.hbm [shape: f32[8,32], index: 0, kind: input, shape index: {}]   ;;  %s4229_s1 = inlined_call_operand.hbm [shape: bf16[32,128], index: 1, kind: input, shape index: {}]   ;;  %s4230_s2 = inlined_call_operand.hbm [shape: bf16[128,256], index: 2, kind: input, shape index: {}]   ;;  %s4231_s3 = inlined_call_operand.hbm [shape: bf16[256,512], index: 3, kind: input, shape index: {}]   ;;  %s4232_s4 = inlined_call_operand.hbm [shape: bf16[512,1024], index: 4, kind: input, shape index: {}]   ;;  %s4233_s5 = inlined_call_operand.hbm [shape: bf16[1024,1024], index: 5, kind: input, shape index: {}]   ;;  %s4234_s6 = inlined_call_operand.hbm [shape: f32[1,4736], index: 6, kind: input, shape index: {}]   ;;  %s4235_s7 = inlined_call_operand.hbm [shape: f32[8,1024], index: 7, kind: output, shape index: {}]  }
   0x1   :  { %13 = vsyncpa [#allocation9], 0 }
   0x2   :  { %14 = vsyncpa [#allocation12], 0 }
   0x3   :  { %15 = vsyncpa [#allocation7], 0  ;;  %s3787_s24 = smov [#allocation8]   ;;  %s3643_s28 = scalar_lea.hbm %s4229_s1, 256 }
   0x4   :  { %s31_s25 = sshll.u32 %s3787_s24, 4  ;;  %p3644_p0 = scmp.ne.s32.totalorder %s4229_s1, %s3643_s28  ;;  %s32_s25 = int_to_ptr.vmem [resolvable:$true] %s31_s25 }
   0x5   :  { %p3647_p1 = scmp.lt.u32.totalorder %s3643_s28, %s4229_s1 }
   0x7   :  { %p3649_p2 = pnand %p3647_p1, %p3644_p0 }
   0x9   :  { %3652 = shalt.err (!%p3649_p2)
}
   0xa   :  { %s3653_s10 = scalar_lea.vmem %s32_s25, 256  ;;  %p3658_p4 = scmp.lt.s32.totalorder %s32_s25, %s32_s25 }
   0xb   :  { %p3654_p3 = scmp.ne.s32.totalorder %s32_s25, %s3653_s10  ;;  %p3659_p5 = scmp.lt.s32.totalorder %s3653_s10, %s3653_s10 }
   0xd   :  { %p3660_p6 = por %p3659_p5, %p3658_p4 }
   0xf   :  { %p3661_p7 = pnand %p3660_p6, %p3654_p3 }
  0x11   :  { %3664 = shalt.err (!%p3661_p7)
}
  0x12   :  { %s3788_s11 = smov 64   ;;  %s3789_s12 = smov 4  }
  0x13   :  { %37 = dma.hbm_to_vmem [thread:$0]  %s4229_s1, 256, %s32_s25, [#allocation9], %s3788_s11, %s3788_s11, %s3789_s12  }
  0x14   :  { %s3790_s15 = smov [#allocation11]   ;;  %s3665_s19 = scalar_lea.hbm %s4231_s3, 8192 }
  0x15   :  { %s55_s16 = sshll.u32 %s3790_s15, 4  ;;  %p3666_p8 = scmp.ne.s32.totalorder %s4231_s3, %s3665_s19  ;;  %s56_s16 = int_to_ptr.vmem [resolvable:$true] %s55_s16 }
  0x16   :  { %p3669_p9 = scmp.lt.u32.totalorder %s3665_s19, %s4231_s3 }
  0x18   :  { %p3671_p10 = pnand %p3669_p9, %p3666_p8 }
  0x1a   :  { %3674 = shalt.err (!%p3671_p10)
}
  0x1b   :  { %s3675_s24 = scalar_lea.vmem %s56_s16, 8192  ;;  %p3680_p12 = scmp.lt.s32.totalorder %s56_s16, %s56_s16 }
  0x1c   :  { %p3676_p11 = scmp.ne.s32.totalorder %s56_s16, %s3675_s24  ;;  %p3681_p13 = scmp.lt.s32.totalorder %s3675_s24, %s3675_s24 }
  0x1e   :  { %p3682_p0 = por %p3681_p13, %p3680_p12 }
  0x20   :  { %p3683_p1 = pnand %p3682_p0, %p3676_p11 }
  0x22   :  { %3686 = shalt.err (!%p3683_p1)
}
  0x23   :  { %s3791_s1 = smov 256   ;;  %s3792_s25 = smov 16  }
  0x24   :  { %61 = dma.hbm_to_vmem [thread:$0]  %s4231_s3, 8192, %s56_s16, [#allocation12], %s3791_s1, %s3791_s1, %s3792_s25  }
  0x25   :  { %s3793_s28 = smov [#allocation5]   ;;  %s3794_s30 = smov [#allocation10]  }
  0x26   :  { %s22_s29 = sshll.u32 %s3793_s28, 4  ;;  %s43_s8 = sshll.u32 %s3794_s30, 4  ;;  %s23_s29 = int_to_ptr.vmem [resolvable:$true] %s22_s29  ;;  %s3879_s8 = int_to_ptr.vmem [resolvable:$true] %s43_s8 }
  0x27   :  { %s3687_s13 = scalar_lea.hbm %s4228_s0, 128 }
  0x28   :  { %p3688_p2 = scmp.ne.s32.totalorder %s4228_s0, %s3687_s13  ;;  %p3691_p3 = scmp.lt.u32.totalorder %s3687_s13, %s4228_s0 }
  0x2a   :  { %p3693_p4 = pnand %p3691_p3, %p3688_p2 }
  0x2c   :  { %3696 = shalt.err (!%p3693_p4)
}
  0x2d   :  { %s3697_s3 = scalar_lea.vmem %s23_s29, 128  ;;  %p3702_p6 = scmp.lt.s32.totalorder %s23_s29, %s23_s29 }
  0x2e   :  { %p3698_p5 = scmp.ne.s32.totalorder %s23_s29, %s3697_s3  ;;  %p3703_p7 = scmp.lt.s32.totalorder %s3697_s3, %s3697_s3 }
  0x30   :  { %p3704_p8 = por %p3703_p7, %p3702_p6 }
  0x32   :  { %p3705_p9 = pnand %p3704_p8, %p3698_p5 }
  0x34   :  { %3708 = shalt.err (!%p3705_p9)
}
  0x35   :  { %25 = dma.hbm_to_vmem [thread:$0]  %s4228_s0, 128, %s23_s29, [#allocation6]  }
  0x36   :  { %s3709_s22 = scalar_lea.hbm %s4230_s2, 2048 }
  0x37   :  { %p3710_p10 = scmp.ne.s32.totalorder %s4230_s2, %s3709_s22  ;;  %p3713_p11 = scmp.lt.u32.totalorder %s3709_s22, %s4230_s2 }
  0x39   :  { %p3715_p12 = pnand %p3713_p11, %p3710_p10 }
  0x3b   :  { %3718 = shalt.err (!%p3715_p12)
}
  0x3c   :  { %s3719_s26 = scalar_lea.vmem %s3879_s8, 2048  ;;  %p3724_p0 = scmp.lt.s32.totalorder %s3879_s8, %s3879_s8 }
  0x3d   :  { %p3720_p13 = scmp.ne.s32.totalorder %s3879_s8, %s3719_s26  ;;  %p3725_p1 = scmp.lt.s32.totalorder %s3719_s26, %s3719_s26 }
  0x3f   :  { %p3726_p2 = por %p3725_p1, %p3724_p0 }
  0x41   :  { %p3727_p3 = pnand %p3726_p2, %p3720_p13 }
  0x43   :  { %3730 = shalt.err (!%p3727_p3)
}
  0x44   :  { %s3795_s0 = smov 128   ;;  %s3796_s27 = smov 8  }
  0x45   :  { %49 = dma.hbm_to_vmem [thread:$0]  %s4230_s2, 2048, %s3879_s8, [#allocation9], %s3795_s0, %s3795_s0, %s3796_s27  }
  0x46   :  { %s3797_s30 = smov [#allocation13]   ;;  %s3731_s14 = scalar_lea.hbm %s4234_s6, 592 }
  0x47   :  { %s68_s9 = sshll.u32 %s3797_s30, 4  ;;  %p3732_p4 = scmp.ne.s32.totalorder %s4234_s6, %s3731_s14  ;;  %s69_s9 = int_to_ptr.vmem [resolvable:$true] %s68_s9 }
  0x48   :  { %p3735_p5 = scmp.lt.u32.totalorder %s3731_s14, %s4234_s6 }
  0x4a   :  { %p3737_p6 = pnand %p3735_p5, %p3732_p4 }
  0x4c   :  { %3740 = shalt.err (!%p3737_p6)
}
  0x4d   :  { %s3741_s16 = scalar_lea.vmem %s69_s9, 592  ;;  %s3745_s2 = scalar_lea.vmem %s69_s9, 608 }
  0x4e   :  { %p3742_p7 = scmp.ne.s32.totalorder %s69_s9, %s3741_s16  ;;  %p3746_p8 = scmp.lt.s32.totalorder %s69_s9, %s69_s9 }
  0x4f   :  { %p3747_p9 = scmp.lt.s32.totalorder %s3745_s2, %s3741_s16 }
  0x51   :  { %p3748_p10 = por %p3747_p9, %p3746_p8 }
  0x53   :  { %p3749_p11 = pnand %p3748_p10, %p3742_p7 }
  0x55   :  { %3752 = shalt.err (!%p3749_p11)
}
  0x56   :  { %71 = dma.hbm_to_vmem [thread:$0]  %s4234_s6, 592, %s69_s9, [#allocation12]  }
  0x57   :  { %3775 = dma.done.wait [#allocation6], 128  }
  0x58   :  { %3776 = vsyncadd [#allocation6], 4294967168 }
  0x59   :  { %3777 = dma.done.wait [#allocation9], 2304  }
  0x5a   :  { %3778 = vsyncadd [#allocation9], 4294964992 }
  0x5b   :  { %3779 = dma.done.wait [#allocation12], 8784  }
  0x5c   :  { %3780 = vsyncadd [#allocation12], 4294958512  ;;  %s92_s20 = sld [smem:[#allocation0]]   ;;  %108 = sst [smem:[#allocation16 + $0x2]] %s3796_s27  ;;  %v3798_v0 = vmov 0.0   ;;  %vm3799_vm0 = vmmov 0  }
  0x5d   :  { %3372 = vmatprep.subr.bf16.mxu0 %v3798_v0  ;;  %3376 = vmatprep.mubr.msk.bf16.mxu0 %vm3799_vm0, %v3798_v0  ;;  %110 = sst [smem:[#allocation16 + $0x3]] %s3788_s11  ;;  %s3800_s21 = smov [#allocation2]   ;;  %vm183_vm1 = vcmask 261120   ;;  %v3809_v21 = vmov 0  }
  0x5e   :  { %s100_s22 = sshll.u32 %s3800_s21, 4  ;;  %112 = sst [smem:[#allocation16 + $0x4]] %s3795_s0  ;;  %361 = vmatprep.mubr.bf16.mxu1 %v3809_v21  ;;  %s101_s22 = int_to_ptr.vmem [resolvable:$true] %s100_s22 }
  0x5f   :  { %118 = sst [smem:[#allocation16 + $0x7]] %s3788_s11  ;;  %s3801_s6 = smov 1024  }
  0x60   :  { %120 = sst [smem:[#allocation16 + $0x8]] %s3789_s12  ;;  %s3802_s1 = smov 2  }
  0x61   :  { %104 = sst [smem:[#allocation16]] %s3801_s6  ;;  %s3803_s25 = smov 512  }
  0x62   :  { %s3279_s23 = sshll.u32 %s92_s20, 26  ;;  %106 = sst [smem:[#allocation16 + $0x1]] %s3801_s6 }
  0x63   :  { %s3280_s24 = sadd.s32 134217728, %s3279_s23  ;;  %114 = sst [smem:[#allocation16 + $0x5]] %s3802_s1 }
  0x64   :  { %116 = sst [smem:[#allocation16 + $0x6]] %s3803_s25  ;;  %s3804_s26 = smov [#allocation4]  }
  0x65   :  { %s3805_s28 = smov [#allocation15]   ;;  %s3806_s9 = smov [#allocation3]  }
  0x66   :  { %122 = dma.general %s4232_s4, 32768, %s101_s22, %s3804_s26, %s3805_s28, [#allocation16], %s3280_s24, 0  }
  0x67   :  { %139 = sst [smem:[#allocation18]] %s3801_s6  ;;  %s135_s10 = sshll.u32 %s3806_s9, 4  ;;  %s136_s10 = int_to_ptr.vmem [resolvable:$true] %s135_s10 }
  0x68   :  { %141 = sst [smem:[#allocation18 + $0x1]] %s3801_s6  ;;  %s3807_s13 = smov [#allocation4 + $0x1]  }
  0x69   :  { %143 = sst [smem:[#allocation18 + $0x2]] %s3796_s27  ;;  %s3808_s14 = smov [#allocation17]  }
  0x6a   :  { %145 = sst [smem:[#allocation18 + $0x3]] %s3788_s11 }
  0x6b   :  { %147 = sst [smem:[#allocation18 + $0x4]] %s3795_s0 }
  0x6c   :  { %149 = sst [smem:[#allocation18 + $0x5]] %s3802_s1 }
  0x6d   :  { %151 = sst [smem:[#allocation18 + $0x6]] %s3803_s25 }
  0x6e   :  { %153 = sst [smem:[#allocation18 + $0x7]] %s3788_s11 }
  0x6f   :  { %155 = sst [smem:[#allocation18 + $0x8]] %s3789_s12 }
  0x70   :  { %157 = dma.general %s4233_s5, 65536, %s136_s10, %s3807_s13, %s3808_s14, [#allocation18], %s3280_s24, 0  }
  0x71   :  { %v3477_v1 = vld [vmem:[#allocation8] sm:$0xff]   ;;  %v3478_v2 = vld [vmem:[#allocation8 + $0x8] sm:$0xff]   ;;  %v158_v3 = vld [vmem:[#allocation5] sm:$0xff] }
  0x72   :  { %3373 = vmatpush3.bf16.msra.mxu0 %v3477_v1  ;;  %v3479_v4 = vld [vmem:[#allocation10 + $0x4] ss:$8 sps:$4 sm:$0xff]   ;;  %v3481_v5 = vld [vmem:[#allocation10] ss:$8 sps:$4 sm:$0xff]   ;;  %v3482_v6 = vld [vmem:[#allocation10 + $0x14] ss:$8 sps:$4 sm:$0xff]   ;;  %v163_v7 = vpack.c.bf16 %v158_v3, %v158_v3 }
  0x73   :  { %3374 = vmatprep.subr.bf16.mxu0 %v3798_v0  ;;  %329 = vmatprep.subr.bf16.mxu1 %v3479_v4  ;;  %v3484_v8 = vld [vmem:[#allocation10 + $0x10] ss:$8 sps:$4 sm:$0xff]   ;;  %v3485_v9 = vld [vmem:[#allocation10 + $0x24] ss:$8 sps:$4 sm:$0xff]   ;;  %v3487_v10 = vld [vmem:[#allocation10 + $0x20] ss:$8 sps:$4 sm:$0xff]  }
  0x74   :  { %330 = vmatpush1.bf16.msra.mxu1 %v3481_v5  ;;  %v3488_v11 = vld [vmem:[#allocation10 + $0x34] ss:$8 sps:$4 sm:$0xff]   ;;  %v3490_v12 = vld [vmem:[#allocation10 + $0x30] ss:$8 sps:$4 sm:$0xff]   ;;  %v3491_v13 = vld [vmem:[#allocation10 + $0x44] ss:$8 sps:$4 sm:$0xff]  }
  0x75   :  { %331 = vmatprep.subr.bf16.mxu1 %v3482_v6  ;;  %v3493_v14 = vld [vmem:[#allocation10 + $0x40] ss:$8 sps:$4 sm:$0xff]   ;;  %v3494_v15 = vld [vmem:[#allocation10 + $0x54] ss:$8 sps:$4 sm:$0xff]   ;;  %v3496_v16 = vld [vmem:[#allocation10 + $0x50] ss:$8 sps:$4 sm:$0xff]  }
  0x76   :  { %3375 = vmatpush3.bf16.msra.mxu0 %v3478_v2  ;;  %v3497_v17 = vld [vmem:[#allocation10 + $0x64] ss:$8 sps:$4 sm:$0xff]   ;;  %v3499_v18 = vld [vmem:[#allocation10 + $0x60] ss:$8 sps:$4 sm:$0xff]   ;;  %v3500_v19 = vld [vmem:[#allocation10 + $0x74] ss:$8 sps:$4 sm:$0xff]  }
  0x77   :  { %v3502_v20 = vld [vmem:[#allocation10 + $0x70] ss:$8 sps:$4 sm:$0xff]   ;;  %v3283_v22 = vld [vmem:[#allocation13] ss:$0 sm:$0xff]  ;;  %v3505_v31 = vld [vmem:[#allocation11 + $0x4] ss:$16 sps:$4 sm:$0xff]  }
  0x78   :  { %332 = vmatpush1.bf16.msra.mxu1 %v3484_v8  ;;  %v3508_v32 = vld [vmem:[#allocation11 + $0xc] ss:$16 sps:$4 sm:$0xff]   ;;  %v3503_v33 = vld [vmem:[#allocation11] ss:$16 sps:$4 sm:$0xff]   ;;  %v3506_v34 = vld [vmem:[#allocation11 + $0x8] ss:$16 sps:$4 sm:$0xff]   ;;  %846 = vmatprep.subr.bf16.mxu0 %v3505_v31 }
  0x79   :  { %3377 = vmatmul.mubr.msk.bf16.vlgmr.msra.gmra.mrb[0].mxu0 %vm183_vm1, %v163_v7  ;;  %333 = vmatprep.subr.bf16.mxu1 %v3485_v9  ;;  %v3511_v35 = vld [vmem:[#allocation11 + $0x24] ss:$16 sps:$4 sm:$0xff]   ;;  %v3514_v36 = vld [vmem:[#allocation11 + $0x2c] ss:$16 sps:$4 sm:$0xff]   ;;  %v3509_v37 = vld [vmem:[#allocation11 + $0x20] ss:$16 sps:$4 sm:$0xff]  }
  0x7a   :  { %847 = vmatpush1.bf16.msra.mxu0 %v3503_v33  ;;  %v3512_v38 = vld [vmem:[#allocation11 + $0x28] ss:$16 sps:$4 sm:$0xff]   ;;  %v3517_v39 = vld [vmem:[#allocation11 + $0x44] ss:$16 sps:$4 sm:$0xff]   ;;  %v3520_v40 = vld [vmem:[#allocation11 + $0x4c] ss:$16 sps:$4 sm:$0xff]  }
  0x7b   :  { %848 = vmatprep.subr.bf16.mxu0 %v3511_v35  ;;  %v3515_v41 = vld [vmem:[#allocation11 + $0x40] ss:$16 sps:$4 sm:$0xff]   ;;  %v3518_v42 = vld [vmem:[#allocation11 + $0x48] ss:$16 sps:$4 sm:$0xff]   ;;  %v3523_v43 = vld [vmem:[#allocation11 + $0x64] ss:$16 sps:$4 sm:$0xff]  }
  0x7c   :  { %334 = vmatpush1.bf16.msra.mxu1 %v3487_v10  ;;  %v3526_v44 = vld [vmem:[#allocation11 + $0x6c] ss:$16 sps:$4 sm:$0xff]   ;;  %v3521_v45 = vld [vmem:[#allocation11 + $0x60] ss:$16 sps:$4 sm:$0xff]   ;;  %v3524_v46 = vld [vmem:[#allocation11 + $0x68] ss:$16 sps:$4 sm:$0xff]  }
  0x7d   :  { %335 = vmatprep.subr.bf16.mxu1 %v3488_v11  ;;  %v3529_v47 = vld [vmem:[#allocation11 + $0x84] ss:$16 sps:$4 sm:$0xff]   ;;  %v3532_v48 = vld [vmem:[#allocation11 + $0x8c] ss:$16 sps:$4 sm:$0xff]   ;;  %v3527_v49 = vld [vmem:[#allocation11 + $0x80] ss:$16 sps:$4 sm:$0xff]  }
  0x7e   :  { %849 = vmatpush1.bf16.msra.mxu0 %v3509_v37  ;;  %v3530_v50 = vld [vmem:[#allocation11 + $0x88] ss:$16 sps:$4 sm:$0xff]   ;;  %v3535_v51 = vld [vmem:[#allocation11 + $0xa4] ss:$16 sps:$4 sm:$0xff]   ;;  %v3538_v52 = vld [vmem:[#allocation11 + $0xac] ss:$16 sps:$4 sm:$0xff]  }
  0x7f   :  { %850 = vmatprep.subr.bf16.mxu0 %v3517_v39  ;;  %v3533_v53 = vld [vmem:[#allocation11 + $0xa0] ss:$16 sps:$4 sm:$0xff]   ;;  %v3536_v54 = vld [vmem:[#allocation11 + $0xa8] ss:$16 sps:$4 sm:$0xff]   ;;  %v3541_v55 = vld [vmem:[#allocation11 + $0xc4] ss:$16 sps:$4 sm:$0xff]  }
  0x80   :  { %336 = vmatpush1.bf16.msra.mxu1 %v3490_v12  ;;  %v3544_v56 = vld [vmem:[#allocation11 + $0xcc] ss:$16 sps:$4 sm:$0xff]   ;;  %v3539_v57 = vld [vmem:[#allocation11 + $0xc0] ss:$16 sps:$4 sm:$0xff]   ;;  %v3542_v58 = vld [vmem:[#allocation11 + $0xc8] ss:$16 sps:$4 sm:$0xff]  }
  0x81   :  { %337 = vmatprep.subr.bf16.mxu1 %v3491_v13  ;;  %v3547_v59 = vld [vmem:[#allocation11 + $0xe4] ss:$16 sps:$4 sm:$0xff]   ;;  %v3550_v60 = vld [vmem:[#allocation11 + $0xec] ss:$16 sps:$4 sm:$0xff]   ;;  %v3545_v61 = vld [vmem:[#allocation11 + $0xe0] ss:$16 sps:$4 sm:$0xff]  }
  0x82   :  { %851 = vmatpush1.bf16.msra.mxu0 %v3515_v41  ;;  %v3548_v62 = vld [vmem:[#allocation11 + $0xe8] ss:$16 sps:$4 sm:$0xff]   ;;  %v3553_v63 = vld [vmem:[#allocation11 + $0x104] ss:$16 sps:$4 sm:$0xff]   ;;  %v3556_v0 = vld [vmem:[#allocation11 + $0x10c] ss:$16 sps:$4 sm:$0xff]  }
  0x83   :  { %852 = vmatprep.subr.bf16.mxu0 %v3523_v43  ;;  %v3551_v1 = vld [vmem:[#allocation11 + $0x100] ss:$16 sps:$4 sm:$0xff]   ;;  %v3554_v2 = vld [vmem:[#allocation11 + $0x108] ss:$16 sps:$4 sm:$0xff]   ;;  %v3559_v3 = vld [vmem:[#allocation11 + $0x124] ss:$16 sps:$4 sm:$0xff]  }
  0x84   :  { %338 = vmatpush1.bf16.msra.mxu1 %v3493_v14  ;;  %v3562_v4 = vld [vmem:[#allocation11 + $0x12c] ss:$16 sps:$4 sm:$0xff]   ;;  %v3557_v5 = vld [vmem:[#allocation11 + $0x120] ss:$16 sps:$4 sm:$0xff]   ;;  %v3560_v6 = vld [vmem:[#allocation11 + $0x128] ss:$16 sps:$4 sm:$0xff]  }
  0x85   :  { %339 = vmatprep.subr.bf16.mxu1 %v3494_v15  ;;  %v3565_v7 = vld [vmem:[#allocation11 + $0x144] ss:$16 sps:$4 sm:$0xff]   ;;  %v3568_v8 = vld [vmem:[#allocation11 + $0x14c] ss:$16 sps:$4 sm:$0xff]   ;;  %v3563_v9 = vld [vmem:[#allocation11 + $0x140] ss:$16 sps:$4 sm:$0xff]  }
  0x86   :  { %853 = vmatpush1.bf16.msra.mxu0 %v3521_v45  ;;  %v3566_v10 = vld [vmem:[#allocation11 + $0x148] ss:$16 sps:$4 sm:$0xff]   ;;  %v3571_v11 = vld [vmem:[#allocation11 + $0x164] ss:$16 sps:$4 sm:$0xff]   ;;  %v3574_v12 = vld [vmem:[#allocation11 + $0x16c] ss:$16 sps:$4 sm:$0xff]  }
  0x87   :  { %854 = vmatprep.subr.bf16.mxu0 %v3529_v47  ;;  %v3569_v13 = vld [vmem:[#allocation11 + $0x160] ss:$16 sps:$4 sm:$0xff]   ;;  %v3572_v14 = vld [vmem:[#allocation11 + $0x168] ss:$16 sps:$4 sm:$0xff]   ;;  %v3577_v15 = vld [vmem:[#allocation11 + $0x184] ss:$16 sps:$4 sm:$0xff]  }
  0x88   :  { %340 = vmatpush1.bf16.msra.mxu1 %v3496_v16  ;;  %v3580_v16 = vld [vmem:[#allocation11 + $0x18c] ss:$16 sps:$4 sm:$0xff]   ;;  %v3581_v21 = vld [vmem:[#allocation11 + $0x1a0] ss:$16 sps:$4 sm:$0xff]  }
  0x89   :  { %341 = vmatprep.subr.bf16.mxu1 %v3497_v17  ;;  %v3575_v17 = vld [vmem:[#allocation11 + $0x180] ss:$16 sps:$4 sm:$0xff]  }
  0x8a   :  { %855 = vmatpush1.bf16.msra.mxu0 %v3527_v49 }
  0x8b   :  { %856 = vmatprep.subr.bf16.mxu0 %v3535_v51 }
  0x8c   :  { %342 = vmatpush1.bf16.msra.mxu1 %v3499_v18  ;;  %v3578_v18 = vld [vmem:[#allocation11 + $0x188] ss:$16 sps:$4 sm:$0xff]  }
  0x8d   :  { %343 = vmatprep.subr.bf16.mxu1 %v3500_v19  ;;  %v3583_v19 = vld [vmem:[#allocation11 + $0x1a4] ss:$16 sps:$4 sm:$0xff]  }
  0x8e   :  { %857 = vmatpush1.bf16.msra.mxu0 %v3533_v53 }
  0x8f   :  { %858 = vmatprep.subr.bf16.mxu0 %v3541_v55 }
  0x90   :  { %344 = vmatpush1.bf16.msra.mxu1 %v3502_v20  ;;  %v3586_v20 = vld [vmem:[#allocation11 + $0x1ac] ss:$16 sps:$4 sm:$0xff]  }
  0x91   :  { %887 = vmatprep.subr.bf16.mxu1 %v3508_v32 }
  0x92   :  { %859 = vmatpush1.bf16.msra.mxu0 %v3539_v57 }
  0x93   :  { %860 = vmatprep.subr.bf16.mxu0 %v3547_v59 }
  0x96   :  { %861 = vmatpush1.bf16.msra.mxu0 %v3545_v61 }
  0x97   :  { %862 = vmatprep.subr.bf16.mxu0 %v3553_v63 }
  0x9a   :  { %863 = vmatpush1.bf16.msra.mxu0 %v3551_v1 }
  0x9b   :  { %864 = vmatprep.subr.bf16.mxu0 %v3559_v3 }
  0x9e   :  { %865 = vmatpush1.bf16.msra.mxu0 %v3557_v5  ;;  %v3810_v5 = vmov 1966171168  }
  0x9f   :  { %866 = vmatprep.subr.bf16.mxu0 %v3565_v7  ;;  %v413_v7 = vlaneseq }
  0xa2   :  { %867 = vmatpush1.bf16.msra.mxu0 %v3563_v9  ;;  %v3941_v9 = vshrl.u32 %v413_v7, 7 }
  0xa3   :  { %868 = vmatprep.subr.bf16.mxu0 %v3571_v11 }
  0xa6   :  { %869 = vmatpush1.bf16.msra.mxu0 %v3569_v13 }
  0xa7   :  { %870 = vmatprep.subr.bf16.mxu0 %v3577_v15  ;;  %v246_v15 = vld [vmem:[#allocation13 + $0x1] sm:$0x3] }
  0xaa   :  { %871 = vmatpush1.bf16.msra.mxu0 %v3575_v17  ;;  %v3949_v17 = vsub.s32 0, %v3941_v9 }
  0xab   :  { %872 = vmatprep.subr.bf16.mxu0 %v3583_v19  ;;  %v247_v19 = vld [vmem:[#allocation13 + $0x3] sm:$0x3] }
  0xae   :  { %873 = vmatpush1.bf16.msra.mxu0 %v3581_v21 }
 0x14c   :  { %v221_v23 = vpop.f32.mrb[0].mxu0 }
 0x14d   :  { %v222_v24 = vadd.f32 %v3283_v22, %v221_v23  ;;  %v3378_v25 = vpop.f32.mrb[1].mxu0  ;;  %v3584_v22 = vld [vmem:[#allocation11 + $0x1a8] ss:$16 sps:$4 sm:$0xff]   ;;  %v3589_v23 = vld [vmem:[#allocation11 + $0x1c4] ss:$16 sps:$4 sm:$0xff]  }
 0x14e   :  { %v224_v26 = vpop.f32.mrb[2].mxu0  ;;  %v3587_v25 = vld [vmem:[#allocation11 + $0x1c0] ss:$16 sps:$4 sm:$0xff]   ;;  %874 = vmatprep.subr.bf16.mxu0 %v3589_v23  ;;  %v443_v23 = vrot.slane %v247_v19, %v3949_v17 }
 0x14f   :  { %vm227_vm2 = vcmp.gt.f32.partialorder %v222_v24, 0.0  ;;  %v228_v27 = vmul.f32 0.2, %v222_v24  ;;  %v3379_v28 = vpop.f32.mrb[3].mxu0  ;;  %v3590_v26 = vld [vmem:[#allocation11 + $0x1c8] ss:$16 sps:$4 sm:$0xff]   ;;  %875 = vmatpush1.bf16.msra.mxu0 %v3587_v25 }
 0x150   :  { %v3593_v28 = vld [vmem:[#allocation11 + $0x1e0] ss:$16 sps:$4 sm:$0xff]  }
 0x151   :  { %v229_v29 = vsel %vm227_vm2, %v222_v24, %v228_v27  ;;  %v3592_v24 = vld [vmem:[#allocation11 + $0x1cc] ss:$16 sps:$4 sm:$0xff]   ;;  %v3595_v27 = vld [vmem:[#allocation11 + $0x1e4] ss:$16 sps:$4 sm:$0xff]  }
 0x152   :  { %v248_v30 = vpack.c.bf16 %v229_v29, %v229_v29  ;;  %v3596_v29 = vld [vmem:[#allocation11 + $0x1e8] ss:$16 sps:$4 sm:$0xff]   ;;  %876 = vmatprep.subr.bf16.mxu0 %v3595_v27 }
 0x153   :  { %877 = vmatpush1.bf16.msra.mxu0 %v3593_v28 }
 0x154   :  { %362 = vmatmul.mubr.bf16.vlgmr.msra.gmra.mrb[0].mxu1 %v248_v30  ;;  %v3598_v30 = vld [vmem:[#allocation11 + $0x1ec] ss:$16 sps:$4 sm:$0xff]  }
 0x155   :  { %888 = vmatpush1.bf16.msra.mxu1 %v3506_v34 }
 0x156   :  { %889 = vmatprep.subr.bf16.mxu1 %v3514_v36 }
 0x159   :  { %890 = vmatpush1.bf16.msra.mxu1 %v3512_v38 }
 0x15a   :  { %891 = vmatprep.subr.bf16.mxu1 %v3520_v40 }
 0x15d   :  { %892 = vmatpush1.bf16.msra.mxu1 %v3518_v42 }
 0x15e   :  { %893 = vmatprep.subr.bf16.mxu1 %v3526_v44 }
 0x161   :  { %894 = vmatpush1.bf16.msra.mxu1 %v3524_v46 }
 0x162   :  { %895 = vmatprep.subr.bf16.mxu1 %v3532_v48 }
 0x165   :  { %896 = vmatpush1.bf16.msra.mxu1 %v3530_v50 }
 0x166   :  { %897 = vmatprep.subr.bf16.mxu1 %v3538_v52 }
 0x169   :  { %898 = vmatpush1.bf16.msra.mxu1 %v3536_v54 }
 0x16a   :  { %899 = vmatprep.subr.bf16.mxu1 %v3544_v56 }
 0x16d   :  { %900 = vmatpush1.bf16.msra.mxu1 %v3542_v58 }
 0x16e   :  { %901 = vmatprep.subr.bf16.mxu1 %v3550_v60 }
 0x171   :  { %902 = vmatpush1.bf16.msra.mxu1 %v3548_v62 }
 0x172   :  { %903 = vmatprep.subr.bf16.mxu1 %v3556_v0 }
 0x175   :  { %904 = vmatpush1.bf16.msra.mxu1 %v3554_v2 }
 0x176   :  { %905 = vmatprep.subr.bf16.mxu1 %v3562_v4 }
 0x179   :  { %906 = vmatpush1.bf16.msra.mxu1 %v3560_v6  ;;  %v411_v6 = vunpack.c.l.s4 %v3810_v5 }
 0x17a   :  { %907 = vmatprep.subr.bf16.mxu1 %v3568_v8 }
 0x17b   :  { %v412_v8 = vunpack.c.0.s8 %v411_v6 }
 0x17d   :  { %908 = vmatpush1.bf16.msra.mxu1 %v3566_v10  ;;  %v3944_v11 = vsub.s32 %v412_v8, %v3941_v9 }
 0x17e   :  { %909 = vmatprep.subr.bf16.mxu1 %v3574_v12 }
 0x181   :  { %910 = vmatpush1.bf16.msra.mxu1 %v3572_v14 }
 0x182   :  { %911 = vmatprep.subr.bf16.mxu1 %v3580_v16 }
 0x185   :  { %912 = vmatpush1.bf16.msra.mxu1 %v3578_v18  ;;  %v3952_v18 = vsub.s32 1, %v3941_v9 }
 0x186   :  { %913 = vmatprep.subr.bf16.mxu1 %v3586_v20 }
 0x189   :  { %914 = vmatpush1.bf16.msra.mxu1 %v3584_v22 }
 0x18a   :  { %915 = vmatprep.subr.bf16.mxu1 %v3592_v24  ;;  %v447_v24 = vrot.slane %v247_v19, %v3952_v18 }
 0x18d   :  { %916 = vmatpush1.bf16.msra.mxu1 %v3590_v26 }
 0x18e   :  { %917 = vmatprep.subr.bf16.mxu1 %v3598_v30 }
 0x191   :  { %918 = vmatpush1.bf16.msra.mxu1 %v3596_v29 }
 0x227   :  { %v363_v31 = vpop.f32.mrb[0].mxu1 }
 0x228   :  { %v370_v32 = vrot.slane %v363_v31, 4  ;;  %v365_v33 = vpop.f32.mrb[1].mxu1 }
 0x229   :  { %v376_v34 = vrot.slane %v365_v33, 4  ;;  %v367_v35 = vpop.f32.mrb[2].mxu1 }
 0x22a   :  { %v371_v36 = vadd.f32 %v370_v32, %v363_v31  ;;  %v368_v37 = vpop.f32.mrb[3].mxu1 }
 0x22b   :  { %v377_v38 = vadd.f32 %v376_v34, %v365_v33 }
 0x22c   :  { %v372_v39 = vrot.slane %v371_v36, 2 }
 0x22d   :  { %v378_v40 = vrot.slane %v377_v38, 2 }
 0x22e   :  { %v373_v41 = vadd.f32 %v372_v39, %v371_v36 }
 0x22f   :  { %v379_v42 = vadd.f32 %v378_v40, %v377_v38 }
 0x230   :  { %v374_v43 = vrot.slane %v373_v41, 1 }
 0x231   :  { %v380_v44 = vrot.slane %v379_v42, 1 }
 0x232   :  { %v375_v45 = vadd.f32 %v374_v43, %v373_v41 }
 0x233   :  { %v381_v46 = vadd.f32 %v380_v44, %v379_v42 }
 0x234   :  { %v383_v47 = vmul.f32 0.125, %v375_v45 }
 0x235   :  { %v384_v48 = vmul.f32 0.125, %v381_v46 }
 0x236   :  { %v385_v49 = vsub.f32 %v363_v31, %v383_v47 }
 0x237   :  { %v386_v50 = vsub.f32 %v365_v33, %v384_v48 }
 0x238   :  { %v387_v51 = vmul.f32 %v385_v49, %v385_v49 }
 0x239   :  { %v388_v52 = vmul.f32 %v386_v50, %v386_v50 }
 0x23a   :  { %v389_v53 = vrot.slane %v387_v51, 4 }
 0x23b   :  { %v395_v54 = vrot.slane %v388_v52, 4 }
 0x23c   :  { %v390_v55 = vadd.f32 %v389_v53, %v387_v51 }
 0x23d   :  { %v396_v56 = vadd.f32 %v395_v54, %v388_v52 }
 0x23e   :  { %v391_v57 = vrot.slane %v390_v55, 2 }
 0x23f   :  { %v397_v58 = vrot.slane %v396_v56, 2 }
 0x240   :  { %v392_v59 = vadd.f32 %v391_v57, %v390_v55 }
 0x241   :  { %v398_v60 = vadd.f32 %v397_v58, %v396_v56 }
 0x242   :  { %v393_v61 = vrot.slane %v392_v59, 1 }
 0x243   :  { %v399_v62 = vrot.slane %v398_v60, 1 }
 0x244   :  { %v394_v63 = vadd.f32 %v393_v61, %v392_v59 }
 0x245   :  { %v400_v0 = vadd.f32 %v399_v62, %v398_v60 }
 0x246   :  { %v401_v1 = vmul.f32 0.125, %v394_v63 }
 0x247   :  { %v402_v2 = vmul.f32 0.125, %v400_v0 }
 0x248   :  { %v403_v3 = vadd.f32 0.8, %v401_v1 }
 0x249   :  { %v404_v4 = vadd.f32 0.8, %v402_v2 }
 0x24a   :  { %3599 = vrsqrt.f32 %v403_v3 }
 0x24b   :  { %3601 = vrsqrt.f32 %v404_v4 }
 0x254   :  { %v3600_v10 = vpop.eup %3599 }
 0x255   :  { %v3602_v12 = vpop.eup %3601 }
 0x256   :  { %v409_v13 = vcombine.low %v3600_v10, %v3602_v12 }
 0x258   :  { %v416_v14 = vrot.slane %v409_v13, %v3944_v11 }
 0x25a   :  { %v423_v16 = vrot.slane %v416_v14, %v3944_v11 }
 0x25c   :  { %v425_v20 = vmul.f32 %v423_v16, %v246_v15 }
 0x25e   :  { %v430_v21 = vrot.slane %v425_v20, %v3949_v17  ;;  %v434_v22 = vrot.slane %v425_v20, %v3952_v18 }
 0x260   :  { %v437_v25 = vmul.f32 %v430_v21, %v385_v49  ;;  %v438_v26 = vmul.f32 %v434_v22, %v386_v50 }
 0x262   :  { %v451_v27 = vadd.f32 %v447_v24, %v438_v26  ;;  %v450_v28 = vadd.f32 %v443_v23, %v437_v25 }
 0x264   :  { %vm453_vm3 = vcmp.gt.f32.partialorder %v451_v27, 0.0  ;;  %v455_v29 = vmul.f32 0.2, %v451_v27  ;;  %vm452_vm4 = vcmp.gt.f32.partialorder %v450_v28, 0.0  ;;  %v454_v30 = vmul.f32 0.2, %v450_v28 }
 0x266   :  { %v457_v31 = vsel %vm453_vm3, %v451_v27, %v455_v29  ;;  %v456_v32 = vsel %vm452_vm4, %v450_v28, %v454_v30 }
 0x267   :  { %v525_v33 = vpack.c.bf16 %v457_v31, %v457_v31  ;;  %v524_v34 = vpack.c.bf16 %v456_v32, %v456_v32 }
 0x269   :  { %878 = vmatprep.mubr.bf16.mxu0 %v525_v33  ;;  %919 = vmatprep.mubr.bf16.mxu1 %v525_v33 }
 0x26a   :  { %879 = vmatmul.mubr.bf16.vlgmr.msra.gmra.mrb[4].mxu0 %v524_v34  ;;  %920 = vmatmul.mubr.bf16.vlgmr.msra.gmra.mrb[4].mxu1 %v524_v34 }
 0x33d   :  { %v880_v35 = vpop.f32.mrb[4].mxu0  ;;  %v921_v36 = vpop.f32.mrb[4].mxu1 }
 0x33e   :  { %v928_v37 = vrot.slane %v880_v35, 4  ;;  %v940_v38 = vrot.slane %v921_v36, 4  ;;  %v882_v39 = vpop.f32.mrb[5].mxu0  ;;  %v923_v40 = vpop.f32.mrb[5].mxu1 }
 0x33f   :  { %v934_v41 = vrot.slane %v882_v39, 4  ;;  %v946_v42 = vrot.slane %v923_v40, 4  ;;  %v884_v43 = vpop.f32.mrb[6].mxu0  ;;  %v925_v44 = vpop.f32.mrb[6].mxu1 }
 0x340   :  { %v929_v45 = vadd.f32 %v928_v37, %v880_v35  ;;  %v941_v46 = vadd.f32 %v940_v38, %v921_v36  ;;  %v885_v47 = vpop.f32.mrb[7].mxu0  ;;  %v926_v48 = vpop.f32.mrb[7].mxu1 }
 0x341   :  { %v935_v49 = vadd.f32 %v934_v41, %v882_v39  ;;  %v947_v50 = vadd.f32 %v946_v42, %v923_v40 }
 0x342   :  { %v930_v51 = vrot.slane %v929_v45, 2  ;;  %v942_v52 = vrot.slane %v941_v46, 2 }
 0x343   :  { %v936_v53 = vrot.slane %v935_v49, 2  ;;  %v948_v54 = vrot.slane %v947_v50, 2 }
 0x344   :  { %v931_v55 = vadd.f32 %v930_v51, %v929_v45  ;;  %v943_v56 = vadd.f32 %v942_v52, %v941_v46 }
 0x345   :  { %v937_v57 = vadd.f32 %v936_v53, %v935_v49  ;;  %v949_v58 = vadd.f32 %v948_v54, %v947_v50 }
 0x346   :  { %v932_v59 = vrot.slane %v931_v55, 1  ;;  %v944_v60 = vrot.slane %v943_v56, 1 }
 0x347   :  { %v938_v61 = vrot.slane %v937_v57, 1  ;;  %v950_v62 = vrot.slane %v949_v58, 1 }
 0x348   :  { %v933_v63 = vadd.f32 %v932_v59, %v931_v55  ;;  %v945_v0 = vadd.f32 %v944_v60, %v943_v56  ;;  %v522_v60 = vld [vmem:[#allocation13 + $0x5] sm:$0xf] }
 0x349   :  { %v939_v1 = vadd.f32 %v938_v61, %v937_v57  ;;  %v951_v2 = vadd.f32 %v950_v62, %v949_v58  ;;  %v523_v61 = vld [vmem:[#allocation13 + $0x9] sm:$0xf] }
 0x34a   :  { %v952_v3 = vmul.f32 0.125, %v933_v63  ;;  %v954_v4 = vmul.f32 0.125, %v945_v0  ;;  %v3978_v63 = vsub.s32 2, %v3941_v9  ;;  %v3981_v0 = vsub.s32 3, %v3941_v9 }
 0x34b   :  { %v953_v5 = vmul.f32 0.125, %v939_v1  ;;  %v955_v6 = vmul.f32 0.125, %v951_v2  ;;  %v1059_v2 = vrot.slane %v523_v61, %v3949_v17 }
 0x34c   :  { %v3958_v7 = vsub.f32 %v880_v35, %v952_v3  ;;  %v3960_v8 = vsub.f32 %v921_v36, %v954_v4  ;;  %v1063_v3 = vrot.slane %v523_v61, %v3952_v18  ;;  %v1067_v4 = vrot.slane %v523_v61, %v3978_v63 }
 0x34d   :  { %v3962_v10 = vsub.f32 %v882_v39, %v953_v5  ;;  %v3964_v12 = vsub.f32 %v923_v40, %v955_v6  ;;  %v1071_v5 = vrot.slane %v523_v61, %v3981_v0 }
 0x34e   :  { %v960_v13 = vmul.f32 %v3958_v7, %v3958_v7  ;;  %v962_v14 = vmul.f32 %v3960_v8, %v3960_v8 }
 0x34f   :  { %v961_v15 = vmul.f32 %v3962_v10, %v3962_v10  ;;  %v963_v16 = vmul.f32 %v3964_v12, %v3964_v12 }
 0x350   :  { %v964_v19 = vrot.slane %v960_v13, 4  ;;  %v976_v20 = vrot.slane %v962_v14, 4 }
 0x351   :  { %v970_v21 = vrot.slane %v961_v15, 4  ;;  %v982_v22 = vrot.slane %v963_v16, 4 }
 0x352   :  { %v965_v23 = vadd.f32 %v964_v19, %v960_v13  ;;  %v977_v24 = vadd.f32 %v976_v20, %v962_v14 }
 0x353   :  { %v971_v25 = vadd.f32 %v970_v21, %v961_v15  ;;  %v983_v26 = vadd.f32 %v982_v22, %v963_v16 }
 0x354   :  { %v966_v27 = vrot.slane %v965_v23, 2  ;;  %v978_v28 = vrot.slane %v977_v24, 2 }
 0x355   :  { %v972_v29 = vrot.slane %v971_v25, 2  ;;  %v984_v30 = vrot.slane %v983_v26, 2 }
 0x356   :  { %v967_v31 = vadd.f32 %v966_v27, %v965_v23  ;;  %v979_v32 = vadd.f32 %v978_v28, %v977_v24 }
 0x357   :  { %v973_v33 = vadd.f32 %v972_v29, %v971_v25  ;;  %v985_v34 = vadd.f32 %v984_v30, %v983_v26 }
 0x358   :  { %v968_v35 = vrot.slane %v967_v31, 1  ;;  %v980_v36 = vrot.slane %v979_v32, 1 }
 0x359   :  { %v974_v37 = vrot.slane %v973_v33, 1  ;;  %v986_v38 = vrot.slane %v985_v34, 1 }
 0x35a   :  { %v969_v39 = vadd.f32 %v968_v35, %v967_v31  ;;  %v981_v40 = vadd.f32 %v980_v36, %v979_v32 }
 0x35b   :  { %v975_v41 = vadd.f32 %v974_v37, %v973_v33  ;;  %v987_v42 = vadd.f32 %v986_v38, %v985_v34 }
 0x35c   :  { %v988_v43 = vmul.f32 0.125, %v969_v39  ;;  %v990_v44 = vmul.f32 0.125, %v981_v40 }
 0x35d   :  { %v989_v45 = vmul.f32 0.125, %v975_v41  ;;  %v991_v46 = vmul.f32 0.125, %v987_v42 }
 0x35e   :  { %v992_v47 = vadd.f32 0.8, %v988_v43  ;;  %v994_v48 = vadd.f32 0.8, %v990_v44 }
 0x35f   :  { %v993_v49 = vadd.f32 0.8, %v989_v45  ;;  %v995_v50 = vadd.f32 0.8, %v991_v46 }
 0x360   :  { %3603 = vrsqrt.f32 %v992_v47 }
 0x361   :  { %3605 = vrsqrt.f32 %v994_v48 }
 0x362   :  { %3607 = vrsqrt.f32 %v993_v49 }
 0x363   :  { %3609 = vrsqrt.f32 %v995_v50 }
 0x36a   :  { %v3604_v51 = vpop.eup %3603 }
 0x36b   :  { %v3606_v52 = vpop.eup %3605 }
 0x36c   :  { %v3608_v53 = vpop.eup %3607 }
 0x36d   :  { %v3610_v54 = vpop.eup %3609  ;;  %v1004_v55 = vcombine.low %v3604_v51, %v3608_v53 }
 0x36e   :  { %v1005_v56 = vcombine.low %v3606_v52, %v3610_v54 }
 0x36f   :  { %v1012_v57 = vrot.slane %v1004_v55, %v3944_v11 }
 0x370   :  { %v1019_v58 = vrot.slane %v1005_v56, %v3944_v11 }
 0x372   :  { %v1020_v59 = vcombine.low %v1012_v57, %v1019_v58 }
 0x374   :  { %v1027_v62 = vrot.slane %v1020_v59, %v3944_v11 }
 0x376   :  { %v1029_v1 = vmul.f32 %v1027_v62, %v522_v60 }
 0x378   :  { %v1034_v6 = vrot.slane %v1029_v1, %v3949_v17  ;;  %v1038_v13 = vrot.slane %v1029_v1, %v3952_v18  ;;  %v1042_v14 = vrot.slane %v1029_v1, %v3978_v63  ;;  %v1046_v15 = vrot.slane %v1029_v1, %v3981_v0 }
 0x37a   :  { %v1051_v16 = vmul.f32 %v1034_v6, %v3958_v7  ;;  %v1052_v19 = vmul.f32 %v1038_v13, %v3962_v10  ;;  %v1053_v20 = vmul.f32 %v1042_v14, %v3960_v8  ;;  %v1054_v21 = vmul.f32 %v1046_v15, %v3964_v12 }
 0x37c   :  { %v1076_v22 = vadd.f32 %v1059_v2, %v1051_v16  ;;  %v1077_v23 = vadd.f32 %v1063_v3, %v1052_v19  ;;  %v1078_v24 = vadd.f32 %v1067_v4, %v1053_v20  ;;  %v1079_v25 = vadd.f32 %v1071_v5, %v1054_v21 }
 0x37e   :  { %vm1080_vm5 = vcmp.gt.f32.partialorder %v1076_v22, 0.0  ;;  %vm1081_vm6 = vcmp.gt.f32.partialorder %v1077_v23, 0.0  ;;  %vm1082_vm7 = vcmp.gt.f32.partialorder %v1078_v24, 0.0  ;;  %vm1083_vm8 = vcmp.gt.f32.partialorder %v1079_v25, 0.0 }
 0x37f   :  { %v1084_v26 = vmul.f32 0.2, %v1076_v22  ;;  %v1085_v27 = vmul.f32 0.2, %v1077_v23  ;;  %v1086_v28 = vmul.f32 0.2, %v1078_v24 }
 0x380   :  { %v1087_v29 = vmul.f32 0.2, %v1079_v25 }
 0x381   :  { %v3995_v30 = vsel %vm1080_vm5, %v1076_v22, %v1084_v26  ;;  %v1089_v7 = vsel %vm1081_vm6, %v1077_v23, %v1085_v27  ;;  %v3997_v10 = vsel %vm1082_vm7, %v1078_v24, %v1086_v28 }
 0x382   :  { %v3999_v8 = vsel %vm1083_vm8, %v1079_v25, %v1087_v29 }
 0x383   :  { %3781 = dma.done.wait [#allocation4], 32768 }
 0x384   :  { %3782 = vsyncadd [#allocation4], 4294934528  ;;  %v4001_v12 = vpack.c.bf16 %v1089_v7, %v1089_v7  ;;  %v1097_v31 = vld [vmem:[#allocation2 + $0x8] sm:$0xff]  ;;  %v1099_v32 = vld [vmem:[#allocation2 + $0x18] sm:$0xff] }
 0x385   :  { %v1096_v33 = vld [vmem:[#allocation2] sm:$0xff]  ;;  %1358 = vmatprep.subr.bf16.mxu0 %v1097_v31  ;;  %1440 = vmatprep.subr.bf16.mxu1 %v1099_v32  ;;  %v1098_v34 = vld [vmem:[#allocation2 + $0x10] sm:$0xff]  ;;  %v1105_v35 = vld [vmem:[#allocation2 + $0x48] sm:$0xff] }
 0x386   :  { %1390 = vmatprep.mubr.bf16.mxu0 %v4001_v12  ;;  %1472 = vmatprep.mubr.bf16.mxu1 %v4001_v12  ;;  %v1107_v36 = vld [vmem:[#allocation2 + $0x58] sm:$0xff]  ;;  %v1104_v37 = vld [vmem:[#allocation2 + $0x40] sm:$0xff]  ;;  %v1106_v38 = vld [vmem:[#allocation2 + $0x50] sm:$0xff] }
 0x387   :  { %1359 = vmatpush1.bf16.msra.mxu0 %v1096_v33  ;;  %1441 = vmatpush1.bf16.msra.mxu1 %v1098_v34  ;;  %v1113_v39 = vld [vmem:[#allocation2 + $0x88] sm:$0xff]  ;;  %v1115_v40 = vld [vmem:[#allocation2 + $0x98] sm:$0xff]  ;;  %v1112_v41 = vld [vmem:[#allocation2 + $0x80] sm:$0xff] }
 0x388   :  { %1360 = vmatprep.subr.bf16.mxu0 %v1105_v35  ;;  %1442 = vmatprep.subr.bf16.mxu1 %v1107_v36  ;;  %v1114_v42 = vld [vmem:[#allocation2 + $0x90] sm:$0xff]  ;;  %v1121_v43 = vld [vmem:[#allocation2 + $0xc8] sm:$0xff]  ;;  %v1123_v44 = vld [vmem:[#allocation2 + $0xd8] sm:$0xff] }
 0x389   :  { %v1120_v45 = vld [vmem:[#allocation2 + $0xc0] sm:$0xff]  ;;  %v1122_v46 = vld [vmem:[#allocation2 + $0xd0] sm:$0xff]  ;;  %v1129_v47 = vld [vmem:[#allocation2 + $0x108] sm:$0xff] }
 0x38a   :  { %v1131_v48 = vld [vmem:[#allocation2 + $0x118] sm:$0xff]  ;;  %v1128_v49 = vld [vmem:[#allocation2 + $0x100] sm:$0xff]  ;;  %v1130_v50 = vld [vmem:[#allocation2 + $0x110] sm:$0xff] }
 0x38b   :  { %1361 = vmatpush1.bf16.msra.mxu0 %v1104_v37  ;;  %1443 = vmatpush1.bf16.msra.mxu1 %v1106_v38  ;;  %v1137_v51 = vld [vmem:[#allocation2 + $0x148] sm:$0xff]  ;;  %v1139_v52 = vld [vmem:[#allocation2 + $0x158] sm:$0xff]  ;;  %v1136_v53 = vld [vmem:[#allocation2 + $0x140] sm:$0xff] }
 0x38c   :  { %1362 = vmatprep.subr.bf16.mxu0 %v1113_v39  ;;  %1444 = vmatprep.subr.bf16.mxu1 %v1115_v40  ;;  %v1138_v54 = vld [vmem:[#allocation2 + $0x150] sm:$0xff]  ;;  %v1145_v55 = vld [vmem:[#allocation2 + $0x188] sm:$0xff]  ;;  %v1147_v56 = vld [vmem:[#allocation2 + $0x198] sm:$0xff] }
 0x38d   :  { %v1144_v57 = vld [vmem:[#allocation2 + $0x180] sm:$0xff]  ;;  %v1146_v58 = vld [vmem:[#allocation2 + $0x190] sm:$0xff]  ;;  %v1153_v59 = vld [vmem:[#allocation2 + $0x1c8] sm:$0xff] }
 0x38e   :  { %v1155_v60 = vld [vmem:[#allocation2 + $0x1d8] sm:$0xff]  ;;  %v1152_v61 = vld [vmem:[#allocation2 + $0x1c0] sm:$0xff]  ;;  %v1154_v62 = vld [vmem:[#allocation2 + $0x1d0] sm:$0xff] }
 0x38f   :  { %1363 = vmatpush1.bf16.msra.mxu0 %v1112_v41  ;;  %1445 = vmatpush1.bf16.msra.mxu1 %v1114_v42  ;;  %v1161_v1 = vld [vmem:[#allocation2 + $0x208] sm:$0xff]  ;;  %v1163_v2 = vld [vmem:[#allocation2 + $0x218] sm:$0xff]  ;;  %v1160_v3 = vld [vmem:[#allocation2 + $0x200] sm:$0xff] }
 0x390   :  { %1364 = vmatprep.subr.bf16.mxu0 %v1121_v43  ;;  %1446 = vmatprep.subr.bf16.mxu1 %v1123_v44  ;;  %v1162_v4 = vld [vmem:[#allocation2 + $0x210] sm:$0xff]  ;;  %v1169_v5 = vld [vmem:[#allocation2 + $0x248] sm:$0xff]  ;;  %v1171_v6 = vld [vmem:[#allocation2 + $0x258] sm:$0xff]  ;;  %v4007_v43 = vpack.c.bf16 %v3995_v30, %v3995_v30 }
 0x391   :  { %v1168_v13 = vld [vmem:[#allocation2 + $0x240] sm:$0xff]  ;;  %v1170_v14 = vld [vmem:[#allocation2 + $0x250] sm:$0xff]  ;;  %v1177_v15 = vld [vmem:[#allocation2 + $0x288] sm:$0xff] }
 0x392   :  { %v1179_v16 = vld [vmem:[#allocation2 + $0x298] sm:$0xff]  ;;  %v1176_v19 = vld [vmem:[#allocation2 + $0x280] sm:$0xff]  ;;  %v1178_v20 = vld [vmem:[#allocation2 + $0x290] sm:$0xff] }
 0x393   :  { %1365 = vmatpush1.bf16.msra.mxu0 %v1120_v45  ;;  %1447 = vmatpush1.bf16.msra.mxu1 %v1122_v46  ;;  %v1185_v21 = vld [vmem:[#allocation2 + $0x2c8] sm:$0xff]  ;;  %v1187_v22 = vld [vmem:[#allocation2 + $0x2d8] sm:$0xff]  ;;  %v1184_v23 = vld [vmem:[#allocation2 + $0x2c0] sm:$0xff] }
 0x394   :  { %1366 = vmatprep.subr.bf16.mxu0 %v1129_v47  ;;  %1448 = vmatprep.subr.bf16.mxu1 %v1131_v48  ;;  %v1186_v24 = vld [vmem:[#allocation2 + $0x2d0] sm:$0xff]  ;;  %v1193_v25 = vld [vmem:[#allocation2 + $0x308] sm:$0xff]  ;;  %v1195_v26 = vld [vmem:[#allocation2 + $0x318] sm:$0xff]  ;;  %v4011_v48 = vpack.c.bf16 %v3999_v8, %v3999_v8 }
 0x395   :  { %v1192_v27 = vld [vmem:[#allocation2 + $0x300] sm:$0xff]  ;;  %v1194_v28 = vld [vmem:[#allocation2 + $0x310] sm:$0xff]  ;;  %v1201_v29 = vld [vmem:[#allocation2 + $0x348] sm:$0xff] }
 0x396   :  { %v1203_v7 = vld [vmem:[#allocation2 + $0x358] sm:$0xff]  ;;  %v1200_v31 = vld [vmem:[#allocation2 + $0x340] sm:$0xff]  ;;  %v1202_v32 = vld [vmem:[#allocation2 + $0x350] sm:$0xff] }
 0x397   :  { %1367 = vmatpush1.bf16.msra.mxu0 %v1128_v49  ;;  %1449 = vmatpush1.bf16.msra.mxu1 %v1130_v50  ;;  %v1209_v33 = vld [vmem:[#allocation2 + $0x388] sm:$0xff]  ;;  %v1211_v34 = vld [vmem:[#allocation2 + $0x398] sm:$0xff]  ;;  %v1208_v35 = vld [vmem:[#allocation2 + $0x380] sm:$0xff] }
 0x398   :  { %1368 = vmatprep.subr.bf16.mxu0 %v1137_v51  ;;  %1450 = vmatprep.subr.bf16.mxu1 %v1139_v52  ;;  %v1210_v36 = vld [vmem:[#allocation2 + $0x390] sm:$0xff]  ;;  %v1217_v37 = vld [vmem:[#allocation2 + $0x3c8] sm:$0xff]  ;;  %v1219_v38 = vld [vmem:[#allocation2 + $0x3d8] sm:$0xff] }
 0x399   :  { %v1216_v39 = vld [vmem:[#allocation2 + $0x3c0] sm:$0xff]  ;;  %v1218_v40 = vld [vmem:[#allocation2 + $0x3d0] sm:$0xff]  ;;  %v1225_v41 = vld [vmem:[#allocation2 + $0x408] sm:$0xff] }
 0x39a   :  { %v1227_v42 = vld [vmem:[#allocation2 + $0x418] sm:$0xff]  ;;  %v1224_v44 = vld [vmem:[#allocation2 + $0x400] sm:$0xff]  ;;  %v1226_v45 = vld [vmem:[#allocation2 + $0x410] sm:$0xff] }
 0x39b   :  { %1369 = vmatpush1.bf16.msra.mxu0 %v1136_v53  ;;  %1451 = vmatpush1.bf16.msra.mxu1 %v1138_v54  ;;  %v1233_v46 = vld [vmem:[#allocation2 + $0x448] sm:$0xff]  ;;  %v1235_v47 = vld [vmem:[#allocation2 + $0x458] sm:$0xff]  ;;  %v1232_v30 = vld [vmem:[#allocation2 + $0x440] sm:$0xff] }
 0x39c   :  { %1370 = vmatprep.subr.bf16.mxu0 %v1145_v55  ;;  %1452 = vmatprep.subr.bf16.mxu1 %v1147_v56  ;;  %v1234_v49 = vld [vmem:[#allocation2 + $0x450] sm:$0xff]  ;;  %v1241_v50 = vld [vmem:[#allocation2 + $0x488] sm:$0xff]  ;;  %v1243_v51 = vld [vmem:[#allocation2 + $0x498] sm:$0xff] }
 0x39d   :  { %v1240_v8 = vld [vmem:[#allocation2 + $0x480] sm:$0xff]  ;;  %v1242_v52 = vld [vmem:[#allocation2 + $0x490] sm:$0xff]  ;;  %v1249_v53 = vld [vmem:[#allocation2 + $0x4c8] sm:$0xff] }
 0x39e   :  { %v1251_v54 = vld [vmem:[#allocation2 + $0x4d8] sm:$0xff]  ;;  %v1248_v55 = vld [vmem:[#allocation2 + $0x4c0] sm:$0xff]  ;;  %v1250_v56 = vld [vmem:[#allocation2 + $0x4d0] sm:$0xff] }
 0x39f   :  { %1371 = vmatpush1.bf16.msra.mxu0 %v1144_v57  ;;  %1453 = vmatpush1.bf16.msra.mxu1 %v1146_v58  ;;  %v1257_v57 = vld [vmem:[#allocation2 + $0x508] sm:$0xff]  ;;  %v1259_v58 = vld [vmem:[#allocation2 + $0x518] sm:$0xff] }
 0x3a0   :  { %1372 = vmatprep.subr.bf16.mxu0 %v1153_v59  ;;  %1454 = vmatprep.subr.bf16.mxu1 %v1155_v60  ;;  %v1256_v59 = vld [vmem:[#allocation2 + $0x500] sm:$0xff]  ;;  %v1258_v60 = vld [vmem:[#allocation2 + $0x510] sm:$0xff] }
 0x3a3   :  { %1373 = vmatpush1.bf16.msra.mxu0 %v1152_v61  ;;  %1455 = vmatpush1.bf16.msra.mxu1 %v1154_v62  ;;  %v1265_v61 = vld [vmem:[#allocation2 + $0x548] sm:$0xff]  ;;  %v1267_v62 = vld [vmem:[#allocation2 + $0x558] sm:$0xff] }
 0x3a4   :  { %1374 = vmatprep.subr.bf16.mxu0 %v1161_v1  ;;  %1456 = vmatprep.subr.bf16.mxu1 %v1163_v2  ;;  %v1264_v1 = vld [vmem:[#allocation2 + $0x540] sm:$0xff]  ;;  %v1266_v2 = vld [vmem:[#allocation2 + $0x550] sm:$0xff] }
 0x3a7   :  { %1375 = vmatpush1.bf16.msra.mxu0 %v1160_v3  ;;  %1457 = vmatpush1.bf16.msra.mxu1 %v1162_v4  ;;  %v1273_v3 = vld [vmem:[#allocation2 + $0x588] sm:$0xff]  ;;  %v1275_v4 = vld [vmem:[#allocation2 + $0x598] sm:$0xff] }
 0x3a8   :  { %1376 = vmatprep.subr.bf16.mxu0 %v1169_v5  ;;  %1458 = vmatprep.subr.bf16.mxu1 %v1171_v6  ;;  %v1272_v5 = vld [vmem:[#allocation2 + $0x580] sm:$0xff]  ;;  %v1274_v6 = vld [vmem:[#allocation2 + $0x590] sm:$0xff] }
 0x3ab   :  { %1377 = vmatpush1.bf16.msra.mxu0 %v1168_v13  ;;  %1459 = vmatpush1.bf16.msra.mxu1 %v1170_v14  ;;  %v1281_v13 = vld [vmem:[#allocation2 + $0x5c8] sm:$0xff]  ;;  %v1283_v14 = vld [vmem:[#allocation2 + $0x5d8] sm:$0xff] }
 0x3ac   :  { %1378 = vmatprep.subr.bf16.mxu0 %v1177_v15  ;;  %1460 = vmatprep.subr.bf16.mxu1 %v1179_v16  ;;  %v1280_v15 = vld [vmem:[#allocation2 + $0x5c0] sm:$0xff]  ;;  %v1282_v16 = vld [vmem:[#allocation2 + $0x5d0] sm:$0xff] }
 0x3af   :  { %1379 = vmatpush1.bf16.msra.mxu0 %v1176_v19  ;;  %1461 = vmatpush1.bf16.msra.mxu1 %v1178_v20  ;;  %v1289_v19 = vld [vmem:[#allocation2 + $0x608] sm:$0xff]  ;;  %v1291_v20 = vld [vmem:[#allocation2 + $0x618] sm:$0xff] }
 0x3b0   :  { %1380 = vmatprep.subr.bf16.mxu0 %v1185_v21  ;;  %1462 = vmatprep.subr.bf16.mxu1 %v1187_v22  ;;  %v1288_v21 = vld [vmem:[#allocation2 + $0x600] sm:$0xff]  ;;  %v1290_v22 = vld [vmem:[#allocation2 + $0x610] sm:$0xff] }
 0x3b3   :  { %1381 = vmatpush1.bf16.msra.mxu0 %v1184_v23  ;;  %1463 = vmatpush1.bf16.msra.mxu1 %v1186_v24  ;;  %v1297_v23 = vld [vmem:[#allocation2 + $0x648] sm:$0xff]  ;;  %v1299_v24 = vld [vmem:[#allocation2 + $0x658] sm:$0xff] }
 0x3b4   :  { %1382 = vmatprep.subr.bf16.mxu0 %v1193_v25  ;;  %1464 = vmatprep.subr.bf16.mxu1 %v1195_v26  ;;  %v1296_v25 = vld [vmem:[#allocation2 + $0x640] sm:$0xff]  ;;  %v1298_v26 = vld [vmem:[#allocation2 + $0x650] sm:$0xff] }
 0x3b7   :  { %1383 = vmatpush1.bf16.msra.mxu0 %v1192_v27  ;;  %1465 = vmatpush1.bf16.msra.mxu1 %v1194_v28  ;;  %v1305_v27 = vld [vmem:[#allocation2 + $0x688] sm:$0xff]  ;;  %v1307_v28 = vld [vmem:[#allocation2 + $0x698] sm:$0xff] }
 0x3b8   :  { %1384 = vmatprep.subr.bf16.mxu0 %v1201_v29  ;;  %1466 = vmatprep.subr.bf16.mxu1 %v1203_v7  ;;  %v1304_v29 = vld [vmem:[#allocation2 + $0x680] sm:$0xff]  ;;  %v1306_v7 = vld [vmem:[#allocation2 + $0x690] sm:$0xff] }
 0x3bb   :  { %1385 = vmatpush1.bf16.msra.mxu0 %v1200_v31  ;;  %1467 = vmatpush1.bf16.msra.mxu1 %v1202_v32  ;;  %v1313_v31 = vld [vmem:[#allocation2 + $0x6c8] sm:$0xff]  ;;  %v1315_v32 = vld [vmem:[#allocation2 + $0x6d8] sm:$0xff] }
 0x3bc   :  { %1386 = vmatprep.subr.bf16.mxu0 %v1209_v33  ;;  %1468 = vmatprep.subr.bf16.mxu1 %v1211_v34  ;;  %v1312_v33 = vld [vmem:[#allocation2 + $0x6c0] sm:$0xff]  ;;  %v1314_v34 = vld [vmem:[#allocation2 + $0x6d0] sm:$0xff] }
 0x3bf   :  { %1387 = vmatpush1.bf16.msra.mxu0 %v1208_v35  ;;  %1469 = vmatpush1.bf16.msra.mxu1 %v1210_v36  ;;  %v1321_v35 = vld [vmem:[#allocation2 + $0x708] sm:$0xff]  ;;  %v1323_v36 = vld [vmem:[#allocation2 + $0x718] sm:$0xff] }
 0x3c0   :  { %1388 = vmatprep.subr.bf16.mxu0 %v1217_v37  ;;  %1470 = vmatprep.subr.bf16.mxu1 %v1219_v38  ;;  %v1320_v37 = vld [vmem:[#allocation2 + $0x700] sm:$0xff]  ;;  %v1322_v38 = vld [vmem:[#allocation2 + $0x710] sm:$0xff] }
 0x3c3   :  { %1389 = vmatpush1.bf16.msra.mxu0 %v1216_v39  ;;  %1471 = vmatpush1.bf16.msra.mxu1 %v1218_v40  ;;  %v1329_v39 = vld [vmem:[#allocation2 + $0x748] sm:$0xff]  ;;  %v1331_v40 = vld [vmem:[#allocation2 + $0x758] sm:$0xff] }
 0x3c4   :  { %1399 = vmatprep.subr.bf16.mxu0 %v1225_v41  ;;  %1481 = vmatprep.subr.bf16.mxu1 %v1227_v42  ;;  %v1328_v41 = vld [vmem:[#allocation2 + $0x740] sm:$0xff]  ;;  %v1330_v42 = vld [vmem:[#allocation2 + $0x750] sm:$0xff] }
 0x3c6   :  { %1391 = vmatmul.mubr.bf16.vlgmr.msra.gmra.mrb[8].mxu0 %v4007_v43  ;;  %1473 = vmatmul.mubr.bf16.vlgmr.msra.gmra.mrb[8].mxu1 %v4007_v43 }
 0x3c7   :  { %1400 = vmatpush1.bf16.msra.mxu0 %v1224_v44  ;;  %1482 = vmatpush1.bf16.msra.mxu1 %v1226_v45  ;;  %v1337_v44 = vld [vmem:[#allocation2 + $0x788] sm:$0xff]  ;;  %v1339_v45 = vld [vmem:[#allocation2 + $0x798] sm:$0xff] }
 0x3c8   :  { %1401 = vmatprep.subr.bf16.mxu0 %v1233_v46  ;;  %1483 = vmatprep.subr.bf16.mxu1 %v1235_v47  ;;  %v1336_v46 = vld [vmem:[#allocation2 + $0x780] sm:$0xff]  ;;  %v1338_v47 = vld [vmem:[#allocation2 + $0x790] sm:$0xff] }
 0x3c9   :  { %1431 = vmatprep.mubr.bf16.mxu0 %v4011_v48  ;;  %1513 = vmatprep.mubr.bf16.mxu1 %v4011_v48 }
 0x3cb   :  { %1402 = vmatpush1.bf16.msra.mxu0 %v1232_v30  ;;  %1484 = vmatpush1.bf16.msra.mxu1 %v1234_v49  ;;  %v1345_v30 = vld [vmem:[#allocation2 + $0x7c8] sm:$0xff]  ;;  %v1347_v49 = vld [vmem:[#allocation2 + $0x7d8] sm:$0xff] }
 0x3cc   :  { %1403 = vmatprep.subr.bf16.mxu0 %v1241_v50  ;;  %1485 = vmatprep.subr.bf16.mxu1 %v1243_v51  ;;  %v1344_v50 = vld [vmem:[#allocation2 + $0x7c0] sm:$0xff]  ;;  %v1346_v51 = vld [vmem:[#allocation2 + $0x7d0] sm:$0xff] }
 0x3cf   :  { %1404 = vmatpush1.bf16.msra.mxu0 %v1240_v8  ;;  %1486 = vmatpush1.bf16.msra.mxu1 %v1242_v52  ;;  %v1101_v8 = vld [vmem:[#allocation2 + $0x28] sm:$0xff]  ;;  %v1103_v52 = vld [vmem:[#allocation2 + $0x38] sm:$0xff] }
 0x3d0   :  { %1405 = vmatprep.subr.bf16.mxu0 %v1249_v53  ;;  %1487 = vmatprep.subr.bf16.mxu1 %v1251_v54  ;;  %v4019_v53 = vpack.c.bf16 %v3997_v10, %v3997_v10  ;;  %v1100_v54 = vld [vmem:[#allocation2 + $0x20] sm:$0xff]  ;;  %v1117_v10 = vld [vmem:[#allocation2 + $0xa8] sm:$0xff] }
 0x3d3   :  { %1406 = vmatpush1.bf16.msra.mxu0 %v1248_v55  ;;  %1488 = vmatpush1.bf16.msra.mxu1 %v1250_v56  ;;  %v1102_v55 = vld [vmem:[#allocation2 + $0x30] sm:$0xff]  ;;  %v1109_v56 = vld [vmem:[#allocation2 + $0x68] sm:$0xff] }
 0x3d4   :  { %1407 = vmatprep.subr.bf16.mxu0 %v1257_v57  ;;  %1489 = vmatprep.subr.bf16.mxu1 %v1259_v58  ;;  %v1111_v57 = vld [vmem:[#allocation2 + $0x78] sm:$0xff]  ;;  %v1108_v58 = vld [vmem:[#allocation2 + $0x60] sm:$0xff] }
 0x3d7   :  { %1408 = vmatpush1.bf16.msra.mxu0 %v1256_v59  ;;  %1490 = vmatpush1.bf16.msra.mxu1 %v1258_v60  ;;  %v1110_v59 = vld [vmem:[#allocation2 + $0x70] sm:$0xff]  ;;  %v1119_v60 = vld [vmem:[#allocation2 + $0xb8] sm:$0xff] }
 0x3d8   :  { %1409 = vmatprep.subr.bf16.mxu0 %v1265_v61  ;;  %1491 = vmatprep.subr.bf16.mxu1 %v1267_v62  ;;  %v1116_v61 = vld [vmem:[#allocation2 + $0xa0] sm:$0xff]  ;;  %v1118_v62 = vld [vmem:[#allocation2 + $0xb0] sm:$0xff] }
 0x3db   :  { %1410 = vmatpush1.bf16.msra.mxu0 %v1264_v1  ;;  %1492 = vmatpush1.bf16.msra.mxu1 %v1266_v2  ;;  %v1125_v1 = vld [vmem:[#allocation2 + $0xe8] sm:$0xff]  ;;  %v1127_v2 = vld [vmem:[#allocation2 + $0xf8] sm:$0xff] }
 0x3dc   :  { %1411 = vmatprep.subr.bf16.mxu0 %v1273_v3  ;;  %1493 = vmatprep.subr.bf16.mxu1 %v1275_v4  ;;  %v1124_v3 = vld [vmem:[#allocation2 + $0xe0] sm:$0xff]  ;;  %v1126_v4 = vld [vmem:[#allocation2 + $0xf0] sm:$0xff] }
 0x3df   :  { %1412 = vmatpush1.bf16.msra.mxu0 %v1272_v5  ;;  %1494 = vmatpush1.bf16.msra.mxu1 %v1274_v6  ;;  %v1133_v5 = vld [vmem:[#allocation2 + $0x128] sm:$0xff]  ;;  %v1135_v6 = vld [vmem:[#allocation2 + $0x138] sm:$0xff] }
 0x3e0   :  { %1413 = vmatprep.subr.bf16.mxu0 %v1281_v13  ;;  %1495 = vmatprep.subr.bf16.mxu1 %v1283_v14  ;;  %v1134_v13 = vld [vmem:[#allocation2 + $0x130] sm:$0xff]  ;;  %v1141_v14 = vld [vmem:[#allocation2 + $0x168] sm:$0xff] }
 0x3e3   :  { %1414 = vmatpush1.bf16.msra.mxu0 %v1280_v15  ;;  %1496 = vmatpush1.bf16.msra.mxu1 %v1282_v16  ;;  %v1143_v15 = vld [vmem:[#allocation2 + $0x178] sm:$0xff]  ;;  %v1140_v16 = vld [vmem:[#allocation2 + $0x160] sm:$0xff] }
 0x3e4   :  { %1415 = vmatprep.subr.bf16.mxu0 %v1289_v19  ;;  %1497 = vmatprep.subr.bf16.mxu1 %v1291_v20  ;;  %v1142_v19 = vld [vmem:[#allocation2 + $0x170] sm:$0xff]  ;;  %v1149_v20 = vld [vmem:[#allocation2 + $0x1a8] sm:$0xff] }
 0x3e7   :  { %1416 = vmatpush1.bf16.msra.mxu0 %v1288_v21  ;;  %1498 = vmatpush1.bf16.msra.mxu1 %v1290_v22  ;;  %v1151_v21 = vld [vmem:[#allocation2 + $0x1b8] sm:$0xff]  ;;  %v1148_v22 = vld [vmem:[#allocation2 + $0x1a0] sm:$0xff] }
 0x3e8   :  { %1417 = vmatprep.subr.bf16.mxu0 %v1297_v23  ;;  %1499 = vmatprep.subr.bf16.mxu1 %v1299_v24  ;;  %v1150_v23 = vld [vmem:[#allocation2 + $0x1b0] sm:$0xff]  ;;  %v1157_v24 = vld [vmem:[#allocation2 + $0x1e8] sm:$0xff] }
 0x3eb   :  { %1418 = vmatpush1.bf16.msra.mxu0 %v1296_v25  ;;  %1500 = vmatpush1.bf16.msra.mxu1 %v1298_v26  ;;  %v1159_v25 = vld [vmem:[#allocation2 + $0x1f8] sm:$0xff]  ;;  %v1156_v26 = vld [vmem:[#allocation2 + $0x1e0] sm:$0xff] }
 0x3ec   :  { %1419 = vmatprep.subr.bf16.mxu0 %v1305_v27  ;;  %1501 = vmatprep.subr.bf16.mxu1 %v1307_v28  ;;  %v1158_v27 = vld [vmem:[#allocation2 + $0x1f0] sm:$0xff]  ;;  %v1165_v28 = vld [vmem:[#allocation2 + $0x228] sm:$0xff] }
 0x3ef   :  { %1420 = vmatpush1.bf16.msra.mxu0 %v1304_v29  ;;  %1502 = vmatpush1.bf16.msra.mxu1 %v1306_v7  ;;  %v1167_v29 = vld [vmem:[#allocation2 + $0x238] sm:$0xff]  ;;  %v1164_v7 = vld [vmem:[#allocation2 + $0x220] sm:$0xff] }
 0x3f0   :  { %1421 = vmatprep.subr.bf16.mxu0 %v1313_v31  ;;  %1503 = vmatprep.subr.bf16.mxu1 %v1315_v32  ;;  %v1166_v31 = vld [vmem:[#allocation2 + $0x230] sm:$0xff]  ;;  %v1173_v32 = vld [vmem:[#allocation2 + $0x268] sm:$0xff] }
 0x3f3   :  { %1422 = vmatpush1.bf16.msra.mxu0 %v1312_v33  ;;  %1504 = vmatpush1.bf16.msra.mxu1 %v1314_v34  ;;  %v1175_v33 = vld [vmem:[#allocation2 + $0x278] sm:$0xff]  ;;  %v1172_v34 = vld [vmem:[#allocation2 + $0x260] sm:$0xff] }
 0x3f4   :  { %1423 = vmatprep.subr.bf16.mxu0 %v1321_v35  ;;  %1505 = vmatprep.subr.bf16.mxu1 %v1323_v36  ;;  %v1174_v35 = vld [vmem:[#allocation2 + $0x270] sm:$0xff]  ;;  %v1181_v36 = vld [vmem:[#allocation2 + $0x2a8] sm:$0xff] }
 0x3f7   :  { %1424 = vmatpush1.bf16.msra.mxu0 %v1320_v37  ;;  %1506 = vmatpush1.bf16.msra.mxu1 %v1322_v38  ;;  %v1183_v37 = vld [vmem:[#allocation2 + $0x2b8] sm:$0xff]  ;;  %v1180_v38 = vld [vmem:[#allocation2 + $0x2a0] sm:$0xff] }
 0x3f8   :  { %1425 = vmatprep.subr.bf16.mxu0 %v1329_v39  ;;  %1507 = vmatprep.subr.bf16.mxu1 %v1331_v40  ;;  %v1182_v39 = vld [vmem:[#allocation2 + $0x2b0] sm:$0xff]  ;;  %v1189_v40 = vld [vmem:[#allocation2 + $0x2e8] sm:$0xff] }
 0x3fb   :  { %1426 = vmatpush1.bf16.msra.mxu0 %v1328_v41  ;;  %1508 = vmatpush1.bf16.msra.mxu1 %v1330_v42  ;;  %v1191_v41 = vld [vmem:[#allocation2 + $0x2f8] sm:$0xff]  ;;  %v1188_v42 = vld [vmem:[#allocation2 + $0x2e0] sm:$0xff] }
 0x3fc   :  { %1427 = vmatprep.subr.bf16.mxu0 %v1337_v44  ;;  %1509 = vmatprep.subr.bf16.mxu1 %v1339_v45  ;;  %v1190_v44 = vld [vmem:[#allocation2 + $0x2f0] sm:$0xff]  ;;  %v1197_v45 = vld [vmem:[#allocation2 + $0x328] sm:$0xff] }
 0x3ff   :  { %1428 = vmatpush1.bf16.msra.mxu0 %v1336_v46  ;;  %1510 = vmatpush1.bf16.msra.mxu1 %v1338_v47  ;;  %v1199_v46 = vld [vmem:[#allocation2 + $0x338] sm:$0xff]  ;;  %v1196_v47 = vld [vmem:[#allocation2 + $0x320] sm:$0xff] }
 0x400   :  { %1429 = vmatprep.subr.bf16.mxu0 %v1345_v30  ;;  %1511 = vmatprep.subr.bf16.mxu1 %v1347_v49  ;;  %v1198_v30 = vld [vmem:[#allocation2 + $0x330] sm:$0xff]  ;;  %v1205_v49 = vld [vmem:[#allocation2 + $0x368] sm:$0xff] }
 0x403   :  { %1430 = vmatpush1.bf16.msra.mxu0 %v1344_v50  ;;  %1512 = vmatpush1.bf16.msra.mxu1 %v1346_v51  ;;  %v1207_v50 = vld [vmem:[#allocation2 + $0x378] sm:$0xff]  ;;  %v1204_v51 = vld [vmem:[#allocation2 + $0x360] sm:$0xff] }
 0x404   :  { %1522 = vmatprep.subr.bf16.mxu0 %v1101_v8  ;;  %1604 = vmatprep.subr.bf16.mxu1 %v1103_v52  ;;  %v1206_v8 = vld [vmem:[#allocation2 + $0x370] sm:$0xff]  ;;  %v1213_v52 = vld [vmem:[#allocation2 + $0x3a8] sm:$0xff] }
 0x406   :  { %1432 = vmatmul.mubr.bf16.vlgmr.msra.gmra.mrb[8].mxu0 %v4019_v53  ;;  %1514 = vmatmul.mubr.bf16.vlgmr.msra.gmra.mrb[8].mxu1 %v4019_v53 }
 0x407   :  { %1523 = vmatpush1.bf16.msra.mxu0 %v1100_v54  ;;  %1605 = vmatpush1.bf16.msra.mxu1 %v1102_v55  ;;  %v1215_v54 = vld [vmem:[#allocation2 + $0x3b8] sm:$0xff]  ;;  %v1212_v55 = vld [vmem:[#allocation2 + $0x3a0] sm:$0xff] }
 0x408   :  { %1524 = vmatprep.subr.bf16.mxu0 %v1109_v56  ;;  %1606 = vmatprep.subr.bf16.mxu1 %v1111_v57  ;;  %v1214_v56 = vld [vmem:[#allocation2 + $0x3b0] sm:$0xff]  ;;  %v1221_v57 = vld [vmem:[#allocation2 + $0x3e8] sm:$0xff] }
 0x409   :  { %1554 = vmatprep.mubr.bf16.mxu0 %v4001_v12  ;;  %1636 = vmatprep.mubr.bf16.mxu1 %v4001_v12  ;;  %v1132_v12 = vld [vmem:[#allocation2 + $0x120] sm:$0xff] }
 0x40b   :  { %1525 = vmatpush1.bf16.msra.mxu0 %v1108_v58  ;;  %1607 = vmatpush1.bf16.msra.mxu1 %v1110_v59  ;;  %v1223_v58 = vld [vmem:[#allocation2 + $0x3f8] sm:$0xff]  ;;  %v1220_v59 = vld [vmem:[#allocation2 + $0x3e0] sm:$0xff] }
 0x40c   :  { %1526 = vmatprep.subr.bf16.mxu0 %v1117_v10  ;;  %1608 = vmatprep.subr.bf16.mxu1 %v1119_v60  ;;  %v1222_v10 = vld [vmem:[#allocation2 + $0x3f0] sm:$0xff]  ;;  %v1229_v60 = vld [vmem:[#allocation2 + $0x428] sm:$0xff] }
 0x40f   :  { %1527 = vmatpush1.bf16.msra.mxu0 %v1116_v61  ;;  %1609 = vmatpush1.bf16.msra.mxu1 %v1118_v62  ;;  %v1231_v61 = vld [vmem:[#allocation2 + $0x438] sm:$0xff]  ;;  %v1228_v62 = vld [vmem:[#allocation2 + $0x420] sm:$0xff] }
 0x410   :  { %1528 = vmatprep.subr.bf16.mxu0 %v1125_v1  ;;  %1610 = vmatprep.subr.bf16.mxu1 %v1127_v2  ;;  %v1230_v1 = vld [vmem:[#allocation2 + $0x430] sm:$0xff]  ;;  %v1237_v2 = vld [vmem:[#allocation2 + $0x468] sm:$0xff] }
 0x413   :  { %1529 = vmatpush1.bf16.msra.mxu0 %v1124_v3  ;;  %1611 = vmatpush1.bf16.msra.mxu1 %v1126_v4  ;;  %v1239_v3 = vld [vmem:[#allocation2 + $0x478] sm:$0xff]  ;;  %v1236_v4 = vld [vmem:[#allocation2 + $0x460] sm:$0xff] }
 0x414   :  { %1530 = vmatprep.subr.bf16.mxu0 %v1133_v5  ;;  %1612 = vmatprep.subr.bf16.mxu1 %v1135_v6  ;;  %v1238_v5 = vld [vmem:[#allocation2 + $0x470] sm:$0xff]  ;;  %v1245_v6 = vld [vmem:[#allocation2 + $0x4a8] sm:$0xff] }
 0x417   :  { %1531 = vmatpush1.bf16.msra.mxu0 %v1132_v12  ;;  %1613 = vmatpush1.bf16.msra.mxu1 %v1134_v13  ;;  %v1247_v12 = vld [vmem:[#allocation2 + $0x4b8] sm:$0xff]  ;;  %v1244_v13 = vld [vmem:[#allocation2 + $0x4a0] sm:$0xff] }
 0x418   :  { %1532 = vmatprep.subr.bf16.mxu0 %v1141_v14  ;;  %1614 = vmatprep.subr.bf16.mxu1 %v1143_v15  ;;  %v1246_v14 = vld [vmem:[#allocation2 + $0x4b0] sm:$0xff]  ;;  %v1253_v15 = vld [vmem:[#allocation2 + $0x4e8] sm:$0xff] }
 0x41b   :  { %1533 = vmatpush1.bf16.msra.mxu0 %v1140_v16  ;;  %1615 = vmatpush1.bf16.msra.mxu1 %v1142_v19  ;;  %v1252_v16 = vld [vmem:[#allocation2 + $0x4e0] sm:$0xff]  ;;  %v1254_v19 = vld [vmem:[#allocation2 + $0x4f0] sm:$0xff] }
 0x41c   :  { %1534 = vmatprep.subr.bf16.mxu0 %v1149_v20  ;;  %1616 = vmatprep.subr.bf16.mxu1 %v1151_v21  ;;  %v1261_v20 = vld [vmem:[#allocation2 + $0x528] sm:$0xff]  ;;  %v1263_v21 = vld [vmem:[#allocation2 + $0x538] sm:$0xff] }
 0x41f   :  { %1535 = vmatpush1.bf16.msra.mxu0 %v1148_v22  ;;  %1617 = vmatpush1.bf16.msra.mxu1 %v1150_v23  ;;  %v1262_v22 = vld [vmem:[#allocation2 + $0x530] sm:$0xff]  ;;  %v1269_v23 = vld [vmem:[#allocation2 + $0x568] sm:$0xff] }
 0x420   :  { %1536 = vmatprep.subr.bf16.mxu0 %v1157_v24  ;;  %1618 = vmatprep.subr.bf16.mxu1 %v1159_v25  ;;  %v1271_v24 = vld [vmem:[#allocation2 + $0x578] sm:$0xff]  ;;  %v1268_v25 = vld [vmem:[#allocation2 + $0x560] sm:$0xff] }
 0x423   :  { %1537 = vmatpush1.bf16.msra.mxu0 %v1156_v26  ;;  %1619 = vmatpush1.bf16.msra.mxu1 %v1158_v27  ;;  %v1270_v26 = vld [vmem:[#allocation2 + $0x570] sm:$0xff]  ;;  %v1277_v27 = vld [vmem:[#allocation2 + $0x5a8] sm:$0xff] }
 0x424   :  { %1538 = vmatprep.subr.bf16.mxu0 %v1165_v28  ;;  %1620 = vmatprep.subr.bf16.mxu1 %v1167_v29  ;;  %v1279_v28 = vld [vmem:[#allocation2 + $0x5b8] sm:$0xff]  ;;  %v1276_v29 = vld [vmem:[#allocation2 + $0x5a0] sm:$0xff] }
 0x427   :  { %1539 = vmatpush1.bf16.msra.mxu0 %v1164_v7  ;;  %1621 = vmatpush1.bf16.msra.mxu1 %v1166_v31  ;;  %v1278_v7 = vld [vmem:[#allocation2 + $0x5b0] sm:$0xff]  ;;  %v1285_v31 = vld [vmem:[#allocation2 + $0x5e8] sm:$0xff] }
 0x428   :  { %1540 = vmatprep.subr.bf16.mxu0 %v1173_v32  ;;  %1622 = vmatprep.subr.bf16.mxu1 %v1175_v33  ;;  %v1287_v32 = vld [vmem:[#allocation2 + $0x5f8] sm:$0xff]  ;;  %v1284_v33 = vld [vmem:[#allocation2 + $0x5e0] sm:$0xff] }
 0x42b   :  { %1541 = vmatpush1.bf16.msra.mxu0 %v1172_v34  ;;  %1623 = vmatpush1.bf16.msra.mxu1 %v1174_v35  ;;  %v1286_v34 = vld [vmem:[#allocation2 + $0x5f0] sm:$0xff]  ;;  %v1293_v35 = vld [vmem:[#allocation2 + $0x628] sm:$0xff] }
 0x42c   :  { %1542 = vmatprep.subr.bf16.mxu0 %v1181_v36  ;;  %1624 = vmatprep.subr.bf16.mxu1 %v1183_v37  ;;  %v1295_v36 = vld [vmem:[#allocation2 + $0x638] sm:$0xff]  ;;  %v1292_v37 = vld [vmem:[#allocation2 + $0x620] sm:$0xff] }
 0x42f   :  { %1543 = vmatpush1.bf16.msra.mxu0 %v1180_v38  ;;  %1625 = vmatpush1.bf16.msra.mxu1 %v1182_v39  ;;  %v1294_v38 = vld [vmem:[#allocation2 + $0x630] sm:$0xff]  ;;  %v1301_v39 = vld [vmem:[#allocation2 + $0x668] sm:$0xff] }
 0x430   :  { %1544 = vmatprep.subr.bf16.mxu0 %v1189_v40  ;;  %1626 = vmatprep.subr.bf16.mxu1 %v1191_v41  ;;  %v1303_v40 = vld [vmem:[#allocation2 + $0x678] sm:$0xff]  ;;  %v1300_v41 = vld [vmem:[#allocation2 + $0x660] sm:$0xff] }
 0x433   :  { %1545 = vmatpush1.bf16.msra.mxu0 %v1188_v42  ;;  %1627 = vmatpush1.bf16.msra.mxu1 %v1190_v44  ;;  %v1302_v42 = vld [vmem:[#allocation2 + $0x670] sm:$0xff]  ;;  %v1309_v44 = vld [vmem:[#allocation2 + $0x6a8] sm:$0xff] }
 0x434   :  { %1546 = vmatprep.subr.bf16.mxu0 %v1197_v45  ;;  %1628 = vmatprep.subr.bf16.mxu1 %v1199_v46  ;;  %v1311_v45 = vld [vmem:[#allocation2 + $0x6b8] sm:$0xff]  ;;  %v1308_v46 = vld [vmem:[#allocation2 + $0x6a0] sm:$0xff] }
 0x437   :  { %1547 = vmatpush1.bf16.msra.mxu0 %v1196_v47  ;;  %1629 = vmatpush1.bf16.msra.mxu1 %v1198_v30  ;;  %v1310_v47 = vld [vmem:[#allocation2 + $0x6b0] sm:$0xff]  ;;  %v1317_v30 = vld [vmem:[#allocation2 + $0x6e8] sm:$0xff] }
 0x438   :  { %1548 = vmatprep.subr.bf16.mxu0 %v1205_v49  ;;  %1630 = vmatprep.subr.bf16.mxu1 %v1207_v50  ;;  %v1319_v49 = vld [vmem:[#allocation2 + $0x6f8] sm:$0xff]  ;;  %v1316_v50 = vld [vmem:[#allocation2 + $0x6e0] sm:$0xff] }
 0x43b   :  { %1549 = vmatpush1.bf16.msra.mxu0 %v1204_v51  ;;  %1631 = vmatpush1.bf16.msra.mxu1 %v1206_v8  ;;  %v1318_v51 = vld [vmem:[#allocation2 + $0x6f0] sm:$0xff]  ;;  %v1325_v8 = vld [vmem:[#allocation2 + $0x728] sm:$0xff] }
 0x43c   :  { %1550 = vmatprep.subr.bf16.mxu0 %v1213_v52  ;;  %1632 = vmatprep.subr.bf16.mxu1 %v1215_v54  ;;  %v1327_v52 = vld [vmem:[#allocation2 + $0x738] sm:$0xff]  ;;  %v1324_v54 = vld [vmem:[#allocation2 + $0x720] sm:$0xff] }
 0x43f   :  { %1551 = vmatpush1.bf16.msra.mxu0 %v1212_v55  ;;  %1633 = vmatpush1.bf16.msra.mxu1 %v1214_v56  ;;  %v1326_v55 = vld [vmem:[#allocation2 + $0x730] sm:$0xff]  ;;  %v1333_v56 = vld [vmem:[#allocation2 + $0x768] sm:$0xff] }
 0x440   :  { %1552 = vmatprep.subr.bf16.mxu0 %v1221_v57  ;;  %1634 = vmatprep.subr.bf16.mxu1 %v1223_v58  ;;  %v1335_v57 = vld [vmem:[#allocation2 + $0x778] sm:$0xff]  ;;  %v1332_v58 = vld [vmem:[#allocation2 + $0x760] sm:$0xff] }
 0x443   :  { %1553 = vmatpush1.bf16.msra.mxu0 %v1220_v59  ;;  %1635 = vmatpush1.bf16.msra.mxu1 %v1222_v10  ;;  %v1334_v59 = vld [vmem:[#allocation2 + $0x770] sm:$0xff]  ;;  %v1341_v10 = vld [vmem:[#allocation2 + $0x7a8] sm:$0xff] }
 0x444   :  { %1563 = vmatprep.subr.bf16.mxu0 %v1229_v60  ;;  %1645 = vmatprep.subr.bf16.mxu1 %v1231_v61  ;;  %v1343_v60 = vld [vmem:[#allocation2 + $0x7b8] sm:$0xff]  ;;  %v1340_v61 = vld [vmem:[#allocation2 + $0x7a0] sm:$0xff] }
 0x446   :  { %1555 = vmatmul.mubr.bf16.vlgmr.msra.gmra.mrb[12].mxu0 %v4007_v43  ;;  %1637 = vmatmul.mubr.bf16.vlgmr.msra.gmra.mrb[12].mxu1 %v4007_v43  ;;  %v1255_v43 = vld [vmem:[#allocation2 + $0x4f8] sm:$0xff] }
 0x447   :  { %1564 = vmatpush1.bf16.msra.mxu0 %v1228_v62  ;;  %1646 = vmatpush1.bf16.msra.mxu1 %v1230_v1  ;;  %v1342_v62 = vld [vmem:[#allocation2 + $0x7b0] sm:$0xff]  ;;  %v1349_v1 = vld [vmem:[#allocation2 + $0x7e8] sm:$0xff] }
 0x448   :  { %1565 = vmatprep.subr.bf16.mxu0 %v1237_v2  ;;  %1647 = vmatprep.subr.bf16.mxu1 %v1239_v3  ;;  %v1351_v2 = vld [vmem:[#allocation2 + $0x7f8] sm:$0xff]  ;;  %v1348_v3 = vld [vmem:[#allocation2 + $0x7e0] sm:$0xff] }
 0x449   :  { %1595 = vmatprep.mubr.bf16.mxu0 %v4011_v48  ;;  %1677 = vmatprep.mubr.bf16.mxu1 %v4011_v48  ;;  %v1260_v48 = vld [vmem:[#allocation2 + $0x520] sm:$0xff] }
 0x44b   :  { %1566 = vmatpush1.bf16.msra.mxu0 %v1236_v4  ;;  %1648 = vmatpush1.bf16.msra.mxu1 %v1238_v5  ;;  %v1350_v4 = vld [vmem:[#allocation2 + $0x7f0] sm:$0xff] }
 0x44c   :  { %1567 = vmatprep.subr.bf16.mxu0 %v1245_v6  ;;  %1649 = vmatprep.subr.bf16.mxu1 %v1247_v12 }
 0x44f   :  { %1568 = vmatpush1.bf16.msra.mxu0 %v1244_v13  ;;  %1650 = vmatpush1.bf16.msra.mxu1 %v1246_v14 }
 0x450   :  { %1569 = vmatprep.subr.bf16.mxu0 %v1253_v15  ;;  %1651 = vmatprep.subr.bf16.mxu1 %v1255_v43 }
 0x453   :  { %1570 = vmatpush1.bf16.msra.mxu0 %v1252_v16  ;;  %1652 = vmatpush1.bf16.msra.mxu1 %v1254_v19 }
 0x454   :  { %1571 = vmatprep.subr.bf16.mxu0 %v1261_v20  ;;  %1653 = vmatprep.subr.bf16.mxu1 %v1263_v21 }
 0x457   :  { %1572 = vmatpush1.bf16.msra.mxu0 %v1260_v48  ;;  %1654 = vmatpush1.bf16.msra.mxu1 %v1262_v22 }
 0x458   :  { %1573 = vmatprep.subr.bf16.mxu0 %v1269_v23  ;;  %1655 = vmatprep.subr.bf16.mxu1 %v1271_v24 }
 0x45b   :  { %1574 = vmatpush1.bf16.msra.mxu0 %v1268_v25  ;;  %1656 = vmatpush1.bf16.msra.mxu1 %v1270_v26 }
 0x45c   :  { %1575 = vmatprep.subr.bf16.mxu0 %v1277_v27  ;;  %1657 = vmatprep.subr.bf16.mxu1 %v1279_v28 }
 0x45f   :  { %1576 = vmatpush1.bf16.msra.mxu0 %v1276_v29  ;;  %1658 = vmatpush1.bf16.msra.mxu1 %v1278_v7 }
 0x460   :  { %1577 = vmatprep.subr.bf16.mxu0 %v1285_v31  ;;  %1659 = vmatprep.subr.bf16.mxu1 %v1287_v32 }
 0x463   :  { %1578 = vmatpush1.bf16.msra.mxu0 %v1284_v33  ;;  %1660 = vmatpush1.bf16.msra.mxu1 %v1286_v34 }
 0x464   :  { %1579 = vmatprep.subr.bf16.mxu0 %v1293_v35  ;;  %1661 = vmatprep.subr.bf16.mxu1 %v1295_v36 }
 0x467   :  { %1580 = vmatpush1.bf16.msra.mxu0 %v1292_v37  ;;  %1662 = vmatpush1.bf16.msra.mxu1 %v1294_v38 }
 0x468   :  { %1581 = vmatprep.subr.bf16.mxu0 %v1301_v39  ;;  %1663 = vmatprep.subr.bf16.mxu1 %v1303_v40 }
 0x46b   :  { %1582 = vmatpush1.bf16.msra.mxu0 %v1300_v41  ;;  %1664 = vmatpush1.bf16.msra.mxu1 %v1302_v42 }
 0x46c   :  { %1583 = vmatprep.subr.bf16.mxu0 %v1309_v44  ;;  %1665 = vmatprep.subr.bf16.mxu1 %v1311_v45 }
 0x46f   :  { %1584 = vmatpush1.bf16.msra.mxu0 %v1308_v46  ;;  %1666 = vmatpush1.bf16.msra.mxu1 %v1310_v47 }
 0x470   :  { %1585 = vmatprep.subr.bf16.mxu0 %v1317_v30  ;;  %1667 = vmatprep.subr.bf16.mxu1 %v1319_v49 }
 0x473   :  { %1586 = vmatpush1.bf16.msra.mxu0 %v1316_v50  ;;  %1668 = vmatpush1.bf16.msra.mxu1 %v1318_v51 }
 0x474   :  { %1587 = vmatprep.subr.bf16.mxu0 %v1325_v8  ;;  %1669 = vmatprep.subr.bf16.mxu1 %v1327_v52 }
 0x477   :  { %1588 = vmatpush1.bf16.msra.mxu0 %v1324_v54  ;;  %1670 = vmatpush1.bf16.msra.mxu1 %v1326_v55 }
 0x478   :  { %1589 = vmatprep.subr.bf16.mxu0 %v1333_v56  ;;  %1671 = vmatprep.subr.bf16.mxu1 %v1335_v57 }
 0x47b   :  { %1590 = vmatpush1.bf16.msra.mxu0 %v1332_v58  ;;  %1672 = vmatpush1.bf16.msra.mxu1 %v1334_v59 }
 0x47c   :  { %1591 = vmatprep.subr.bf16.mxu0 %v1341_v10  ;;  %1673 = vmatprep.subr.bf16.mxu1 %v1343_v60 }
 0x47f   :  { %1592 = vmatpush1.bf16.msra.mxu0 %v1340_v61  ;;  %1674 = vmatpush1.bf16.msra.mxu1 %v1342_v62 }
 0x480   :  { %1593 = vmatprep.subr.bf16.mxu0 %v1349_v1  ;;  %1675 = vmatprep.subr.bf16.mxu1 %v1351_v2 }
 0x483   :  { %1594 = vmatpush1.bf16.msra.mxu0 %v1348_v3  ;;  %1676 = vmatpush1.bf16.msra.mxu1 %v1350_v4 }
 0x486   :  { %1596 = vmatmul.mubr.bf16.vlgmr.msra.gmra.mrb[12].mxu0 %v4019_v53  ;;  %1678 = vmatmul.mubr.bf16.vlgmr.msra.gmra.mrb[12].mxu1 %v4019_v53 }
 0x4d9   :  { %v1433_v5 = vpop.f32.mrb[8].mxu0  ;;  %v1515_v6 = vpop.f32.mrb[8].mxu1 }
 0x4da   :  { %v1686_v12 = vrot.slane %v1433_v5, 4  ;;  %v1698_v13 = vrot.slane %v1515_v6, 4  ;;  %v1435_v14 = vpop.f32.mrb[9].mxu0  ;;  %v1517_v15 = vpop.f32.mrb[9].mxu1 }
 0x4db   :  { %v1692_v43 = vrot.slane %v1435_v14, 4  ;;  %v1704_v16 = vrot.slane %v1517_v15, 4  ;;  %v1437_v19 = vpop.f32.mrb[10].mxu0  ;;  %v1519_v20 = vpop.f32.mrb[10].mxu1 }
 0x4dc   :  { %v1687_v21 = vadd.f32 %v1686_v12, %v1433_v5  ;;  %v1699_v48 = vadd.f32 %v1698_v13, %v1515_v6  ;;  %v1438_v22 = vpop.f32.mrb[11].mxu0  ;;  %v1520_v23 = vpop.f32.mrb[11].mxu1 }
 0x4dd   :  { %v1693_v24 = vadd.f32 %v1692_v43, %v1435_v14  ;;  %v1705_v25 = vadd.f32 %v1704_v16, %v1517_v15 }
 0x4de   :  { %v1688_v26 = vrot.slane %v1687_v21, 2  ;;  %v1700_v27 = vrot.slane %v1699_v48, 2 }
 0x4df   :  { %v1694_v28 = vrot.slane %v1693_v24, 2  ;;  %v1706_v53 = vrot.slane %v1705_v25, 2 }
 0x4e0   :  { %v1689_v29 = vadd.f32 %v1688_v26, %v1687_v21  ;;  %v1701_v7 = vadd.f32 %v1700_v27, %v1699_v48 }
 0x4e1   :  { %v1695_v31 = vadd.f32 %v1694_v28, %v1693_v24  ;;  %v1707_v32 = vadd.f32 %v1706_v53, %v1705_v25 }
 0x4e2   :  { %v1690_v33 = vrot.slane %v1689_v29, 1  ;;  %v1702_v34 = vrot.slane %v1701_v7, 1 }
 0x4e3   :  { %v1696_v35 = vrot.slane %v1695_v31, 1  ;;  %v1708_v36 = vrot.slane %v1707_v32, 1 }
 0x4e4   :  { %v1691_v37 = vadd.f32 %v1690_v33, %v1689_v29  ;;  %v1703_v38 = vadd.f32 %v1702_v34, %v1701_v7 }
 0x4e5   :  { %v1697_v39 = vadd.f32 %v1696_v35, %v1695_v31  ;;  %v1709_v40 = vadd.f32 %v1708_v36, %v1707_v32 }
 0x4e6   :  { %v1734_v41 = vmul.f32 0.125, %v1691_v37  ;;  %v1736_v42 = vmul.f32 0.125, %v1703_v38 }
 0x4e7   :  { %v1735_v44 = vmul.f32 0.125, %v1697_v39  ;;  %v1737_v45 = vmul.f32 0.125, %v1709_v40 }
 0x4e8   :  { %v4031_v46 = vsub.f32 %v1433_v5, %v1734_v41  ;;  %v4033_v47 = vsub.f32 %v1515_v6, %v1736_v42 }
 0x4e9   :  { %v4035_v30 = vsub.f32 %v1435_v14, %v1735_v44  ;;  %v4037_v49 = vsub.f32 %v1517_v15, %v1737_v45 }
 0x4ea   :  { %v1750_v50 = vmul.f32 %v4031_v46, %v4031_v46  ;;  %v1752_v51 = vmul.f32 %v4033_v47, %v4033_v47 }
 0x4eb   :  { %v1751_v8 = vmul.f32 %v4035_v30, %v4035_v30  ;;  %v1753_v52 = vmul.f32 %v4037_v49, %v4037_v49 }
 0x4ec   :  { %v1758_v54 = vrot.slane %v1750_v50, 4  ;;  %v1770_v55 = vrot.slane %v1752_v51, 4 }
 0x4ed   :  { %v1764_v56 = vrot.slane %v1751_v8, 4  ;;  %v1776_v57 = vrot.slane %v1753_v52, 4 }
 0x4ee   :  { %v1759_v58 = vadd.f32 %v1758_v54, %v1750_v50  ;;  %v1771_v59 = vadd.f32 %v1770_v55, %v1752_v51 }
 0x4ef   :  { %v1765_v10 = vadd.f32 %v1764_v56, %v1751_v8  ;;  %v1777_v60 = vadd.f32 %v1776_v57, %v1753_v52 }
 0x4f0   :  { %v1760_v61 = vrot.slane %v1759_v58, 2  ;;  %v1772_v62 = vrot.slane %v1771_v59, 2 }
 0x4f1   :  { %v1766_v1 = vrot.slane %v1765_v10, 2  ;;  %v1778_v2 = vrot.slane %v1777_v60, 2 }
 0x4f2   :  { %v1761_v3 = vadd.f32 %v1760_v61, %v1759_v58  ;;  %v1773_v4 = vadd.f32 %v1772_v62, %v1771_v59 }
 0x4f3   :  { %v1767_v5 = vadd.f32 %v1766_v1, %v1765_v10  ;;  %v1779_v6 = vadd.f32 %v1778_v2, %v1777_v60 }
 0x4f4   :  { %v1762_v12 = vrot.slane %v1761_v3, 1  ;;  %v1774_v13 = vrot.slane %v1773_v4, 1 }
 0x4f5   :  { %v1768_v14 = vrot.slane %v1767_v5, 1  ;;  %v1780_v15 = vrot.slane %v1779_v6, 1 }
 0x4f6   :  { %v1763_v43 = vadd.f32 %v1762_v12, %v1761_v3  ;;  %v1775_v16 = vadd.f32 %v1774_v13, %v1773_v4 }
 0x4f7   :  { %v1769_v19 = vadd.f32 %v1768_v14, %v1767_v5  ;;  %v1781_v20 = vadd.f32 %v1780_v15, %v1779_v6 }
 0x4f8   :  { %v1806_v21 = vmul.f32 0.125, %v1763_v43  ;;  %v1808_v48 = vmul.f32 0.125, %v1775_v16 }
 0x4f9   :  { %v1807_v22 = vmul.f32 0.125, %v1769_v19  ;;  %v1809_v23 = vmul.f32 0.125, %v1781_v20 }
 0x4fa   :  { %v1814_v24 = vadd.f32 0.8, %v1806_v21  ;;  %v1816_v25 = vadd.f32 0.8, %v1808_v48 }
 0x4fb   :  { %v1815_v26 = vadd.f32 0.8, %v1807_v22  ;;  %v1817_v27 = vadd.f32 0.8, %v1809_v23 }
 0x4fc   :  { %3611 = vrsqrt.f32 %v1814_v24 }
 0x4fd   :  { %3613 = vrsqrt.f32 %v1816_v25 }
 0x4fe   :  { %3615 = vrsqrt.f32 %v1815_v26 }
 0x4ff   :  { %3617 = vrsqrt.f32 %v1817_v27 }
 0x506   :  { %v3612_v28 = vpop.eup %3611 }
 0x507   :  { %v3614_v53 = vpop.eup %3613 }
 0x508   :  { %v3616_v29 = vpop.eup %3615 }
 0x509   :  { %v3618_v7 = vpop.eup %3617  ;;  %v1838_v31 = vcombine.low %v3612_v28, %v3616_v29 }
 0x50a   :  { %v1839_v32 = vcombine.low %v3614_v53, %v3618_v7 }
 0x50b   :  { %v4048_v33 = vrot.slane %v1838_v31, %v3944_v11 }
 0x50c   :  { %v4051_v34 = vrot.slane %v1839_v32, %v3944_v11 }
 0x50e   :  { %v1870_v35 = vcombine.low %v4048_v33, %v4051_v34 }
 0x559   :  { %v1597_v36 = vpop.f32.mrb[12].mxu0  ;;  %v1679_v37 = vpop.f32.mrb[12].mxu1 }
 0x55a   :  { %v1710_v38 = vrot.slane %v1597_v36, 4  ;;  %v1722_v39 = vrot.slane %v1679_v37, 4  ;;  %v1599_v40 = vpop.f32.mrb[13].mxu0  ;;  %v1681_v41 = vpop.f32.mrb[13].mxu1 }
 0x55b   :  { %v1716_v42 = vrot.slane %v1599_v40, 4  ;;  %v1728_v44 = vrot.slane %v1681_v41, 4  ;;  %v1601_v45 = vpop.f32.mrb[14].mxu0  ;;  %v1683_v50 = vpop.f32.mrb[14].mxu1 }
 0x55c   :  { %v1711_v51 = vadd.f32 %v1710_v38, %v1597_v36  ;;  %v1723_v8 = vadd.f32 %v1722_v39, %v1679_v37  ;;  %v1602_v52 = vpop.f32.mrb[15].mxu0  ;;  %v1684_v54 = vpop.f32.mrb[15].mxu1 }
 0x55d   :  { %v1717_v55 = vadd.f32 %v1716_v42, %v1599_v40  ;;  %v1729_v56 = vadd.f32 %v1728_v44, %v1681_v41 }
 0x55e   :  { %v1712_v57 = vrot.slane %v1711_v51, 2  ;;  %v1724_v58 = vrot.slane %v1723_v8, 2 }
 0x55f   :  { %v1718_v59 = vrot.slane %v1717_v55, 2  ;;  %v1730_v10 = vrot.slane %v1729_v56, 2 }
 0x560   :  { %v1713_v60 = vadd.f32 %v1712_v57, %v1711_v51  ;;  %v1725_v61 = vadd.f32 %v1724_v58, %v1723_v8 }
 0x561   :  { %v1719_v62 = vadd.f32 %v1718_v59, %v1717_v55  ;;  %v1731_v1 = vadd.f32 %v1730_v10, %v1729_v56 }
 0x562   :  { %v1714_v2 = vrot.slane %v1713_v60, 1  ;;  %v1726_v3 = vrot.slane %v1725_v61, 1 }
 0x563   :  { %v1720_v4 = vrot.slane %v1719_v62, 1  ;;  %v1732_v5 = vrot.slane %v1731_v1, 1 }
 0x564   :  { %v1715_v6 = vadd.f32 %v1714_v2, %v1713_v60  ;;  %v1727_v12 = vadd.f32 %v1726_v3, %v1725_v61 }
 0x565   :  { %v1721_v13 = vadd.f32 %v1720_v4, %v1719_v62  ;;  %v1733_v14 = vadd.f32 %v1732_v5, %v1731_v1 }
 0x566   :  { %v1738_v15 = vmul.f32 0.125, %v1715_v6  ;;  %v1740_v43 = vmul.f32 0.125, %v1727_v12 }
 0x567   :  { %v1739_v16 = vmul.f32 0.125, %v1721_v13  ;;  %v1741_v19 = vmul.f32 0.125, %v1733_v14 }
 0x568   :  { %v4055_v20 = vsub.f32 %v1597_v36, %v1738_v15  ;;  %v4057_v21 = vsub.f32 %v1679_v37, %v1740_v43 }
 0x569   :  { %v4059_v48 = vsub.f32 %v1599_v40, %v1739_v16  ;;  %v4061_v22 = vsub.f32 %v1681_v41, %v1741_v19  ;;  %v1878_v16 = vrot.slane %v1870_v35, %v3944_v11  ;;  %v1353_v19 = vld [vmem:[#allocation13 + $0x15] sm:$0xff] }
 0x56a   :  { %v1754_v23 = vmul.f32 %v4055_v20, %v4055_v20  ;;  %v1756_v24 = vmul.f32 %v4057_v21, %v4057_v21  ;;  %v1942_v33 = vrot.slane %v1353_v19, %v3949_v17  ;;  %v1946_v35 = vrot.slane %v1353_v19, %v3952_v18 }
 0x56b   :  { %v1755_v25 = vmul.f32 %v4059_v48, %v4059_v48  ;;  %v1757_v26 = vmul.f32 %v4061_v22, %v4061_v22 }
 0x56c   :  { %v1782_v27 = vrot.slane %v1754_v23, 4  ;;  %v1794_v28 = vrot.slane %v1756_v24, 4 }
 0x56d   :  { %v1788_v53 = vrot.slane %v1755_v25, 4  ;;  %v1800_v29 = vrot.slane %v1757_v26, 4 }
 0x56e   :  { %v1783_v7 = vadd.f32 %v1782_v27, %v1754_v23  ;;  %v1795_v31 = vadd.f32 %v1794_v28, %v1756_v24  ;;  %v1352_v24 = vld [vmem:[#allocation13 + $0xd] sm:$0xff]  ;;  %v4082_v27 = vsub.s32 5, %v3941_v9  ;;  %v4085_v28 = vsub.s32 6, %v3941_v9 }
 0x56f   :  { %v1789_v32 = vadd.f32 %v1788_v53, %v1755_v25  ;;  %v1801_v36 = vadd.f32 %v1800_v29, %v1757_v26  ;;  %v4079_v26 = vsub.s32 4, %v3941_v9  ;;  %v4088_v53 = vsub.s32 7, %v3941_v9 }
 0x570   :  { %v1784_v37 = vrot.slane %v1783_v7, 2  ;;  %v1796_v38 = vrot.slane %v1795_v31, 2  ;;  %v1954_v29 = vrot.slane %v1353_v19, %v3981_v0 }
 0x571   :  { %v1790_v39 = vrot.slane %v1789_v32, 2  ;;  %v1802_v40 = vrot.slane %v1801_v36, 2 }
 0x572   :  { %v1785_v41 = vadd.f32 %v1784_v37, %v1783_v7  ;;  %v1797_v42 = vadd.f32 %v1796_v38, %v1795_v31  ;;  %v1958_v7 = vrot.slane %v1353_v19, %v4079_v26  ;;  %v1962_v31 = vrot.slane %v1353_v19, %v4082_v27 }
 0x573   :  { %v1791_v44 = vadd.f32 %v1790_v39, %v1789_v32  ;;  %v1803_v45 = vadd.f32 %v1802_v40, %v1801_v36  ;;  %v1966_v32 = vrot.slane %v1353_v19, %v4085_v28  ;;  %v1970_v36 = vrot.slane %v1353_v19, %v4088_v53 }
 0x574   :  { %v1786_v50 = vrot.slane %v1785_v41, 1  ;;  %v1798_v51 = vrot.slane %v1797_v42, 1 }
 0x575   :  { %v1792_v8 = vrot.slane %v1791_v44, 1  ;;  %v1804_v52 = vrot.slane %v1803_v45, 1 }
 0x576   :  { %v1787_v54 = vadd.f32 %v1786_v50, %v1785_v41  ;;  %v1799_v55 = vadd.f32 %v1798_v51, %v1797_v42 }
 0x577   :  { %v1793_v56 = vadd.f32 %v1792_v8, %v1791_v44  ;;  %v1805_v57 = vadd.f32 %v1804_v52, %v1803_v45 }
 0x578   :  { %v1810_v58 = vmul.f32 0.125, %v1787_v54  ;;  %v1812_v59 = vmul.f32 0.125, %v1799_v55 }
 0x579   :  { %v1811_v10 = vmul.f32 0.125, %v1793_v56  ;;  %v1813_v60 = vmul.f32 0.125, %v1805_v57 }
 0x57a   :  { %v1818_v61 = vadd.f32 0.8, %v1810_v58  ;;  %v1820_v62 = vadd.f32 0.8, %v1812_v59 }
 0x57b   :  { %v1819_v1 = vadd.f32 0.8, %v1811_v10  ;;  %v1821_v2 = vadd.f32 0.8, %v1813_v60 }
 0x57c   :  { %3619 = vrsqrt.f32 %v1818_v61 }
 0x57d   :  { %3621 = vrsqrt.f32 %v1820_v62 }
 0x57e   :  { %3623 = vrsqrt.f32 %v1819_v1 }
 0x57f   :  { %3625 = vrsqrt.f32 %v1821_v2 }
 0x586   :  { %v3620_v3 = vpop.eup %3619 }
 0x587   :  { %v3622_v4 = vpop.eup %3621 }
 0x588   :  { %v3624_v5 = vpop.eup %3623 }
 0x589   :  { %v3626_v6 = vpop.eup %3625  ;;  %v1840_v12 = vcombine.low %v3620_v3, %v3624_v5 }
 0x58a   :  { %v1841_v13 = vcombine.low %v3622_v4, %v3626_v6 }
 0x58b   :  { %v1862_v14 = vrot.slane %v1840_v12, %v3944_v11 }
 0x58c   :  { %v1869_v15 = vrot.slane %v1841_v13, %v3944_v11 }
 0x58e   :  { %v1871_v43 = vcombine.low %v1862_v14, %v1869_v15 }
 0x590   :  { %v1885_v23 = vrot.slane %v1871_v43, %v3944_v11  ;;  %v1950_v11 = vrot.slane %v1353_v19, %v3978_v63 }
 0x592   :  { %v1886_v25 = vcombine.low %v1878_v16, %v1885_v23 }
 0x594   :  { %v1888_v34 = vmul.f32 %v1886_v25, %v1352_v24 }
 0x596   :  { %v1893_v9 = vrot.slane %v1888_v34, %v3949_v17  ;;  %v1897_v37 = vrot.slane %v1888_v34, %v3952_v18  ;;  %v1901_v38 = vrot.slane %v1888_v34, %v3978_v63  ;;  %v1905_v39 = vrot.slane %v1888_v34, %v3981_v0 }
 0x597   :  { %v1909_v40 = vrot.slane %v1888_v34, %v4079_v26  ;;  %v1913_v41 = vrot.slane %v1888_v34, %v4082_v27  ;;  %v1917_v42 = vrot.slane %v1888_v34, %v4085_v28  ;;  %v1921_v44 = vrot.slane %v1888_v34, %v4088_v53 }
 0x598   :  { %v1930_v45 = vmul.f32 %v1893_v9, %v4031_v46  ;;  %v1931_v50 = vmul.f32 %v1897_v37, %v4035_v30  ;;  %v1932_v51 = vmul.f32 %v1901_v38, %v4033_v47  ;;  %v1933_v8 = vmul.f32 %v1905_v39, %v4037_v49 }
 0x599   :  { %v1934_v52 = vmul.f32 %v1909_v40, %v4055_v20  ;;  %v1935_v54 = vmul.f32 %v1913_v41, %v4059_v48  ;;  %v1936_v55 = vmul.f32 %v1917_v42, %v4057_v21  ;;  %v1937_v56 = vmul.f32 %v1921_v44, %v4061_v22 }
 0x59a   :  { %v1979_v57 = vadd.f32 %v1942_v33, %v1930_v45  ;;  %v1980_v58 = vadd.f32 %v1946_v35, %v1931_v50  ;;  %v1981_v59 = vadd.f32 %v1950_v11, %v1932_v51  ;;  %v1982_v10 = vadd.f32 %v1954_v29, %v1933_v8 }
 0x59b   :  { %v1983_v60 = vadd.f32 %v1958_v7, %v1934_v52  ;;  %v1984_v46 = vadd.f32 %v1962_v31, %v1935_v54  ;;  %v1985_v61 = vadd.f32 %v1966_v32, %v1936_v55  ;;  %v1986_v30 = vadd.f32 %v1970_v36, %v1937_v56 }
 0x59c   :  { %vm1987_vm9 = vcmp.gt.f32.partialorder %v1979_v57, 0.0  ;;  %vm1988_vm10 = vcmp.gt.f32.partialorder %v1980_v58, 0.0  ;;  %vm1989_vm11 = vcmp.gt.f32.partialorder %v1981_v59, 0.0  ;;  %vm1990_vm12 = vcmp.gt.f32.partialorder %v1982_v10, 0.0 }
 0x59d   :  { %vm1991_vm13 = vcmp.gt.f32.partialorder %v1983_v60, 0.0  ;;  %vm1992_vm14 = vcmp.gt.f32.partialorder %v1984_v46, 0.0  ;;  %vm1993_vm15 = vcmp.gt.f32.partialorder %v1985_v61, 0.0  ;;  %vm1994_vm0 = vcmp.gt.f32.partialorder %v1986_v30, 0.0 }
 0x59e   :  { %v1995_v47 = vmul.f32 0.2, %v1979_v57  ;;  %v1996_v49 = vmul.f32 0.2, %v1980_v58  ;;  %v1997_v20 = vmul.f32 0.2, %v1981_v59 }
 0x59f   :  { %v1998_v21 = vmul.f32 0.2, %v1982_v10  ;;  %v1999_v48 = vmul.f32 0.2, %v1983_v60  ;;  %v2000_v22 = vmul.f32 0.2, %v1984_v46 }
 0x5a0   :  { %v2001_v62 = vmul.f32 0.2, %v1985_v61  ;;  %v2002_v1 = vmul.f32 0.2, %v1986_v30  ;;  %v4115_v2 = vsel %vm1987_vm9, %v1979_v57, %v1995_v47  ;;  %v2004_v3 = vsel %vm1988_vm10, %v1980_v58, %v1996_v49 }
 0x5a1   :  { %v4119_v4 = vsel %vm1989_vm11, %v1981_v59, %v1997_v20  ;;  %v4122_v5 = vsel %vm1990_vm12, %v1982_v10, %v1998_v21  ;;  %v4125_v6 = vsel %vm1991_vm13, %v1983_v60, %v1999_v48  ;;  %v4128_v12 = vsel %vm1992_vm14, %v1984_v46, %v2000_v22 }
 0x5a2   :  { %v4131_v13 = vsel %vm1993_vm15, %v1985_v61, %v2001_v62  ;;  %v4134_v14 = vsel %vm1994_vm0, %v1986_v30, %v2002_v1 }
 0x5a3   :  { %3783 = dma.done.wait [#allocation4 + $0x1], 65536 }
 0x5a4   :  { %3784 = vsyncadd [#allocation4 + $0x1], 4294901760  ;;  %v4136_v15 = vpack.c.bf16 %v2004_v3, %v2004_v3  ;;  %v2016_v43 = vld [vmem:[#allocation3 + $0x8] sm:$0xff]  ;;  %v2018_v16 = vld [vmem:[#allocation3 + $0x18] sm:$0xff]  ;;  %s3811_s5 = smov [#allocation14]  }
 0x5a5   :  { %v2015_v19 = vld [vmem:[#allocation3] sm:$0xff]  ;;  %2577 = vmatprep.subr.bf16.mxu0 %v2016_v43  ;;  %2741 = vmatprep.subr.bf16.mxu1 %v2018_v16  ;;  %v2017_v23 = vld [vmem:[#allocation3 + $0x10] sm:$0xff]  ;;  %v2024_v24 = vld [vmem:[#allocation3 + $0x48] sm:$0xff]  ;;  %s3255_s11 = sshll.u32 %s3811_s5, 4  ;;  %s3256_s11 = int_to_ptr.vmem [resolvable:$true] %s3255_s11 }
 0x5a6   :  { %2609 = vmatprep.mubr.bf16.mxu0 %v4136_v15  ;;  %2773 = vmatprep.mubr.bf16.mxu1 %v4136_v15  ;;  %v2026_v25 = vld [vmem:[#allocation3 + $0x58] sm:$0xff]  ;;  %v2023_v33 = vld [vmem:[#allocation3 + $0x40] sm:$0xff]  ;;  %v2025_v34 = vld [vmem:[#allocation3 + $0x50] sm:$0xff]  ;;  %s3753_s12 = scalar_lea.vmem %s3256_s11, 1024  ;;  %p3758_p13 = scmp.lt.s32.totalorder %s3256_s11, %s3256_s11 }
 0x5a7   :  { %2578 = vmatpush1.bf16.msra.mxu0 %v2015_v19  ;;  %2742 = vmatpush1.bf16.msra.mxu1 %v2017_v23  ;;  %v2032_v35 = vld [vmem:[#allocation3 + $0x88] sm:$0xff]  ;;  %v2034_v11 = vld [vmem:[#allocation3 + $0x98] sm:$0xff]  ;;  %v2031_v29 = vld [vmem:[#allocation3 + $0x80] sm:$0xff]  ;;  %p3754_p12 = scmp.ne.s32.totalorder %s3256_s11, %s3753_s12  ;;  %p3759_p0 = scmp.lt.s32.totalorder %s3753_s12, %s3753_s12 }
 0x5a8   :  { %2579 = vmatprep.subr.bf16.mxu0 %v2024_v24  ;;  %2743 = vmatprep.subr.bf16.mxu1 %v2026_v25  ;;  %v2033_v7 = vld [vmem:[#allocation3 + $0x90] sm:$0xff]  ;;  %v2040_v31 = vld [vmem:[#allocation3 + $0xc8] sm:$0xff]  ;;  %v2042_v32 = vld [vmem:[#allocation3 + $0xd8] sm:$0xff] }
 0x5a9   :  { %v2039_v36 = vld [vmem:[#allocation3 + $0xc0] sm:$0xff]  ;;  %v2041_v9 = vld [vmem:[#allocation3 + $0xd0] sm:$0xff]  ;;  %v2048_v37 = vld [vmem:[#allocation3 + $0x108] sm:$0xff]  ;;  %p3760_p1 = por %p3759_p0, %p3758_p13 }
 0x5aa   :  { %v2050_v38 = vld [vmem:[#allocation3 + $0x118] sm:$0xff]  ;;  %v2047_v39 = vld [vmem:[#allocation3 + $0x100] sm:$0xff]  ;;  %v2049_v40 = vld [vmem:[#allocation3 + $0x110] sm:$0xff] }
 0x5ab   :  { %2580 = vmatpush1.bf16.msra.mxu0 %v2023_v33  ;;  %2744 = vmatpush1.bf16.msra.mxu1 %v2025_v34  ;;  %v2056_v41 = vld [vmem:[#allocation3 + $0x148] sm:$0xff]  ;;  %v2058_v42 = vld [vmem:[#allocation3 + $0x158] sm:$0xff]  ;;  %v2055_v44 = vld [vmem:[#allocation3 + $0x140] sm:$0xff]  ;;  %p3761_p2 = pnand %p3760_p1, %p3754_p12 }
 0x5ac   :  { %2581 = vmatprep.subr.bf16.mxu0 %v2032_v35  ;;  %2745 = vmatprep.subr.bf16.mxu1 %v2034_v11  ;;  %v2057_v45 = vld [vmem:[#allocation3 + $0x150] sm:$0xff]  ;;  %v2064_v50 = vld [vmem:[#allocation3 + $0x188] sm:$0xff]  ;;  %v2066_v51 = vld [vmem:[#allocation3 + $0x198] sm:$0xff] }
 0x5ad   :  { %v2063_v8 = vld [vmem:[#allocation3 + $0x180] sm:$0xff]  ;;  %v2065_v52 = vld [vmem:[#allocation3 + $0x190] sm:$0xff]  ;;  %v2072_v54 = vld [vmem:[#allocation3 + $0x1c8] sm:$0xff] }
 0x5ae   :  { %v2074_v55 = vld [vmem:[#allocation3 + $0x1d8] sm:$0xff]  ;;  %v2071_v56 = vld [vmem:[#allocation3 + $0x1c0] sm:$0xff]  ;;  %v2073_v57 = vld [vmem:[#allocation3 + $0x1d0] sm:$0xff] }
 0x5af   :  { %2582 = vmatpush1.bf16.msra.mxu0 %v2031_v29  ;;  %2746 = vmatpush1.bf16.msra.mxu1 %v2033_v7  ;;  %v2080_v58 = vld [vmem:[#allocation3 + $0x208] sm:$0xff]  ;;  %v2082_v59 = vld [vmem:[#allocation3 + $0x218] sm:$0xff]  ;;  %v2079_v10 = vld [vmem:[#allocation3 + $0x200] sm:$0xff] }
 0x5b0   :  { %2583 = vmatprep.subr.bf16.mxu0 %v2040_v31  ;;  %2747 = vmatprep.subr.bf16.mxu1 %v2042_v32  ;;  %v2081_v60 = vld [vmem:[#allocation3 + $0x210] sm:$0xff]  ;;  %v2088_v46 = vld [vmem:[#allocation3 + $0x248] sm:$0xff]  ;;  %v2090_v61 = vld [vmem:[#allocation3 + $0x258] sm:$0xff] }
 0x5b1   :  { %v2087_v30 = vld [vmem:[#allocation3 + $0x240] sm:$0xff]  ;;  %v2089_v47 = vld [vmem:[#allocation3 + $0x250] sm:$0xff]  ;;  %v2096_v49 = vld [vmem:[#allocation3 + $0x288] sm:$0xff] }
 0x5b2   :  { %v2098_v20 = vld [vmem:[#allocation3 + $0x298] sm:$0xff]  ;;  %v2095_v21 = vld [vmem:[#allocation3 + $0x280] sm:$0xff]  ;;  %v2097_v48 = vld [vmem:[#allocation3 + $0x290] sm:$0xff] }
 0x5b3   :  { %2584 = vmatpush1.bf16.msra.mxu0 %v2039_v36  ;;  %2748 = vmatpush1.bf16.msra.mxu1 %v2041_v9  ;;  %v2104_v22 = vld [vmem:[#allocation3 + $0x2c8] sm:$0xff]  ;;  %v2106_v62 = vld [vmem:[#allocation3 + $0x2d8] sm:$0xff]  ;;  %v2103_v1 = vld [vmem:[#allocation3 + $0x2c0] sm:$0xff] }
 0x5b4   :  { %2585 = vmatprep.subr.bf16.mxu0 %v2048_v37  ;;  %2749 = vmatprep.subr.bf16.mxu1 %v2050_v38  ;;  %v2105_v3 = vld [vmem:[#allocation3 + $0x2d0] sm:$0xff]  ;;  %v2112_v43 = vld [vmem:[#allocation3 + $0x308] sm:$0xff]  ;;  %v2114_v16 = vld [vmem:[#allocation3 + $0x318] sm:$0xff] }
 0x5b5   :  { %v2111_v19 = vld [vmem:[#allocation3 + $0x300] sm:$0xff]  ;;  %v2113_v23 = vld [vmem:[#allocation3 + $0x310] sm:$0xff]  ;;  %v2120_v24 = vld [vmem:[#allocation3 + $0x348] sm:$0xff] }
 0x5b6   :  { %v2122_v25 = vld [vmem:[#allocation3 + $0x358] sm:$0xff]  ;;  %v2119_v33 = vld [vmem:[#allocation3 + $0x340] sm:$0xff]  ;;  %v2121_v34 = vld [vmem:[#allocation3 + $0x350] sm:$0xff] }
 0x5b7   :  { %2586 = vmatpush1.bf16.msra.mxu0 %v2047_v39  ;;  %2750 = vmatpush1.bf16.msra.mxu1 %v2049_v40  ;;  %v2128_v35 = vld [vmem:[#allocation3 + $0x388] sm:$0xff]  ;;  %v2130_v11 = vld [vmem:[#allocation3 + $0x398] sm:$0xff]  ;;  %v2127_v29 = vld [vmem:[#allocation3 + $0x380] sm:$0xff]  ;;  %v4142_v39 = vpack.c.bf16 %v4115_v2, %v4115_v2 }
 0x5b8   :  { %2587 = vmatprep.subr.bf16.mxu0 %v2056_v41  ;;  %2751 = vmatprep.subr.bf16.mxu1 %v2058_v42  ;;  %v2129_v7 = vld [vmem:[#allocation3 + $0x390] sm:$0xff]  ;;  %v2136_v31 = vld [vmem:[#allocation3 + $0x3c8] sm:$0xff]  ;;  %v2138_v32 = vld [vmem:[#allocation3 + $0x3d8] sm:$0xff] }
 0x5b9   :  { %v2135_v36 = vld [vmem:[#allocation3 + $0x3c0] sm:$0xff]  ;;  %v2137_v9 = vld [vmem:[#allocation3 + $0x3d0] sm:$0xff]  ;;  %v2144_v37 = vld [vmem:[#allocation3 + $0x408] sm:$0xff] }
 0x5ba   :  { %v2146_v38 = vld [vmem:[#allocation3 + $0x418] sm:$0xff]  ;;  %v2143_v40 = vld [vmem:[#allocation3 + $0x400] sm:$0xff]  ;;  %v2145_v41 = vld [vmem:[#allocation3 + $0x410] sm:$0xff] }
 0x5bb   :  { %2588 = vmatpush1.bf16.msra.mxu0 %v2055_v44  ;;  %2752 = vmatpush1.bf16.msra.mxu1 %v2057_v45  ;;  %v2152_v42 = vld [vmem:[#allocation3 + $0x448] sm:$0xff]  ;;  %v2154_v44 = vld [vmem:[#allocation3 + $0x458] sm:$0xff]  ;;  %v4146_v45 = vpack.c.bf16 %v4122_v5, %v4122_v5  ;;  %v2151_v2 = vld [vmem:[#allocation3 + $0x440] sm:$0xff] }
 0x5bc   :  { %2589 = vmatprep.subr.bf16.mxu0 %v2064_v50  ;;  %2753 = vmatprep.subr.bf16.mxu1 %v2066_v51  ;;  %v2153_v50 = vld [vmem:[#allocation3 + $0x450] sm:$0xff]  ;;  %v2160_v51 = vld [vmem:[#allocation3 + $0x488] sm:$0xff]  ;;  %v2159_v5 = vld [vmem:[#allocation3 + $0x480] sm:$0xff] }
 0x5bf   :  { %2590 = vmatpush1.bf16.msra.mxu0 %v2063_v8  ;;  %2754 = vmatpush1.bf16.msra.mxu1 %v2065_v52  ;;  %v2162_v8 = vld [vmem:[#allocation3 + $0x498] sm:$0xff]  ;;  %v2161_v52 = vld [vmem:[#allocation3 + $0x490] sm:$0xff] }
 0x5c0   :  { %2591 = vmatprep.subr.bf16.mxu0 %v2072_v54  ;;  %2755 = vmatprep.subr.bf16.mxu1 %v2074_v55  ;;  %v2168_v54 = vld [vmem:[#allocation3 + $0x4c8] sm:$0xff]  ;;  %v2170_v55 = vld [vmem:[#allocation3 + $0x4d8] sm:$0xff] }
 0x5c3   :  { %2592 = vmatpush1.bf16.msra.mxu0 %v2071_v56  ;;  %2756 = vmatpush1.bf16.msra.mxu1 %v2073_v57  ;;  %v2167_v56 = vld [vmem:[#allocation3 + $0x4c0] sm:$0xff]  ;;  %v2169_v57 = vld [vmem:[#allocation3 + $0x4d0] sm:$0xff] }
 0x5c4   :  { %2593 = vmatprep.subr.bf16.mxu0 %v2080_v58  ;;  %2757 = vmatprep.subr.bf16.mxu1 %v2082_v59  ;;  %v2176_v58 = vld [vmem:[#allocation3 + $0x508] sm:$0xff]  ;;  %v2178_v59 = vld [vmem:[#allocation3 + $0x518] sm:$0xff] }
 0x5c7   :  { %2594 = vmatpush1.bf16.msra.mxu0 %v2079_v10  ;;  %2758 = vmatpush1.bf16.msra.mxu1 %v2081_v60  ;;  %v2175_v10 = vld [vmem:[#allocation3 + $0x500] sm:$0xff]  ;;  %v2177_v60 = vld [vmem:[#allocation3 + $0x510] sm:$0xff] }
 0x5c8   :  { %2595 = vmatprep.subr.bf16.mxu0 %v2088_v46  ;;  %2759 = vmatprep.subr.bf16.mxu1 %v2090_v61  ;;  %v2184_v46 = vld [vmem:[#allocation3 + $0x548] sm:$0xff]  ;;  %v2186_v61 = vld [vmem:[#allocation3 + $0x558] sm:$0xff] }
 0x5cb   :  { %2596 = vmatpush1.bf16.msra.mxu0 %v2087_v30  ;;  %2760 = vmatpush1.bf16.msra.mxu1 %v2089_v47  ;;  %v2183_v30 = vld [vmem:[#allocation3 + $0x540] sm:$0xff]  ;;  %v2185_v47 = vld [vmem:[#allocation3 + $0x550] sm:$0xff] }
 0x5cc   :  { %2597 = vmatprep.subr.bf16.mxu0 %v2096_v49  ;;  %2761 = vmatprep.subr.bf16.mxu1 %v2098_v20  ;;  %v2192_v49 = vld [vmem:[#allocation3 + $0x588] sm:$0xff]  ;;  %v2194_v20 = vld [vmem:[#allocation3 + $0x598] sm:$0xff] }
 0x5cf   :  { %2598 = vmatpush1.bf16.msra.mxu0 %v2095_v21  ;;  %2762 = vmatpush1.bf16.msra.mxu1 %v2097_v48  ;;  %v2191_v21 = vld [vmem:[#allocation3 + $0x580] sm:$0xff]  ;;  %v2193_v48 = vld [vmem:[#allocation3 + $0x590] sm:$0xff] }
 0x5d0   :  { %2599 = vmatprep.subr.bf16.mxu0 %v2104_v22  ;;  %2763 = vmatprep.subr.bf16.mxu1 %v2106_v62  ;;  %v2200_v22 = vld [vmem:[#allocation3 + $0x5c8] sm:$0xff]  ;;  %v2202_v62 = vld [vmem:[#allocation3 + $0x5d8] sm:$0xff] }
 0x5d3   :  { %2600 = vmatpush1.bf16.msra.mxu0 %v2103_v1  ;;  %2764 = vmatpush1.bf16.msra.mxu1 %v2105_v3  ;;  %v2199_v1 = vld [vmem:[#allocation3 + $0x5c0] sm:$0xff]  ;;  %v2201_v3 = vld [vmem:[#allocation3 + $0x5d0] sm:$0xff] }
 0x5d4   :  { %2601 = vmatprep.subr.bf16.mxu0 %v2112_v43  ;;  %2765 = vmatprep.subr.bf16.mxu1 %v2114_v16  ;;  %v2208_v43 = vld [vmem:[#allocation3 + $0x608] sm:$0xff]  ;;  %v2210_v16 = vld [vmem:[#allocation3 + $0x618] sm:$0xff] }
 0x5d7   :  { %2602 = vmatpush1.bf16.msra.mxu0 %v2111_v19  ;;  %2766 = vmatpush1.bf16.msra.mxu1 %v2113_v23  ;;  %v2207_v19 = vld [vmem:[#allocation3 + $0x600] sm:$0xff]  ;;  %v2209_v23 = vld [vmem:[#allocation3 + $0x610] sm:$0xff] }
 0x5d8   :  { %2603 = vmatprep.subr.bf16.mxu0 %v2120_v24  ;;  %2767 = vmatprep.subr.bf16.mxu1 %v2122_v25  ;;  %v2216_v24 = vld [vmem:[#allocation3 + $0x648] sm:$0xff]  ;;  %v2218_v25 = vld [vmem:[#allocation3 + $0x658] sm:$0xff] }
 0x5db   :  { %2604 = vmatpush1.bf16.msra.mxu0 %v2119_v33  ;;  %2768 = vmatpush1.bf16.msra.mxu1 %v2121_v34  ;;  %v2215_v33 = vld [vmem:[#allocation3 + $0x640] sm:$0xff]  ;;  %v2217_v34 = vld [vmem:[#allocation3 + $0x650] sm:$0xff] }
 0x5dc   :  { %2605 = vmatprep.subr.bf16.mxu0 %v2128_v35  ;;  %2769 = vmatprep.subr.bf16.mxu1 %v2130_v11  ;;  %v2224_v35 = vld [vmem:[#allocation3 + $0x688] sm:$0xff]  ;;  %v2226_v11 = vld [vmem:[#allocation3 + $0x698] sm:$0xff] }
 0x5df   :  { %2606 = vmatpush1.bf16.msra.mxu0 %v2127_v29  ;;  %2770 = vmatpush1.bf16.msra.mxu1 %v2129_v7  ;;  %v2223_v29 = vld [vmem:[#allocation3 + $0x680] sm:$0xff]  ;;  %v2225_v7 = vld [vmem:[#allocation3 + $0x690] sm:$0xff] }
 0x5e0   :  { %2607 = vmatprep.subr.bf16.mxu0 %v2136_v31  ;;  %2771 = vmatprep.subr.bf16.mxu1 %v2138_v32  ;;  %v2232_v31 = vld [vmem:[#allocation3 + $0x6c8] sm:$0xff]  ;;  %v2234_v32 = vld [vmem:[#allocation3 + $0x6d8] sm:$0xff] }
 0x5e3   :  { %2608 = vmatpush1.bf16.msra.mxu0 %v2135_v36  ;;  %2772 = vmatpush1.bf16.msra.mxu1 %v2137_v9  ;;  %v2231_v36 = vld [vmem:[#allocation3 + $0x6c0] sm:$0xff]  ;;  %v2233_v9 = vld [vmem:[#allocation3 + $0x6d0] sm:$0xff] }
 0x5e4   :  { %2618 = vmatprep.subr.bf16.mxu0 %v2144_v37  ;;  %2782 = vmatprep.subr.bf16.mxu1 %v2146_v38  ;;  %v2240_v37 = vld [vmem:[#allocation3 + $0x708] sm:$0xff]  ;;  %v2242_v38 = vld [vmem:[#allocation3 + $0x718] sm:$0xff] }
 0x5e6   :  { %2610 = vmatmul.mubr.bf16.vlgmr.msra.gmra.mrb[16].mxu0 %v4142_v39  ;;  %2774 = vmatmul.mubr.bf16.vlgmr.msra.gmra.mrb[16].mxu1 %v4142_v39 }
 0x5e7   :  { %2619 = vmatpush1.bf16.msra.mxu0 %v2143_v40  ;;  %2783 = vmatpush1.bf16.msra.mxu1 %v2145_v41  ;;  %v2239_v40 = vld [vmem:[#allocation3 + $0x700] sm:$0xff]  ;;  %v2241_v41 = vld [vmem:[#allocation3 + $0x710] sm:$0xff] }
 0x5e8   :  { %2620 = vmatprep.subr.bf16.mxu0 %v2152_v42  ;;  %2784 = vmatprep.subr.bf16.mxu1 %v2154_v44  ;;  %v2248_v42 = vld [vmem:[#allocation3 + $0x748] sm:$0xff]  ;;  %v2250_v44 = vld [vmem:[#allocation3 + $0x758] sm:$0xff] }
 0x5e9   :  { %2650 = vmatprep.mubr.bf16.mxu0 %v4146_v45  ;;  %2814 = vmatprep.mubr.bf16.mxu1 %v4146_v45 }
 0x5eb   :  { %2621 = vmatpush1.bf16.msra.mxu0 %v2151_v2  ;;  %2785 = vmatpush1.bf16.msra.mxu1 %v2153_v50  ;;  %v2247_v2 = vld [vmem:[#allocation3 + $0x740] sm:$0xff]  ;;  %v2249_v50 = vld [vmem:[#allocation3 + $0x750] sm:$0xff] }
 0x5ec   :  { %2622 = vmatprep.subr.bf16.mxu0 %v2160_v51  ;;  %2786 = vmatprep.subr.bf16.mxu1 %v2162_v8  ;;  %v2256_v51 = vld [vmem:[#allocation3 + $0x788] sm:$0xff]  ;;  %v2258_v8 = vld [vmem:[#allocation3 + $0x798] sm:$0xff] }
 0x5ef   :  { %2623 = vmatpush1.bf16.msra.mxu0 %v2159_v5  ;;  %2787 = vmatpush1.bf16.msra.mxu1 %v2161_v52  ;;  %v2255_v5 = vld [vmem:[#allocation3 + $0x780] sm:$0xff]  ;;  %v2257_v52 = vld [vmem:[#allocation3 + $0x790] sm:$0xff] }
 0x5f0   :  { %2624 = vmatprep.subr.bf16.mxu0 %v2168_v54  ;;  %2788 = vmatprep.subr.bf16.mxu1 %v2170_v55  ;;  %v2264_v54 = vld [vmem:[#allocation3 + $0x7c8] sm:$0xff]  ;;  %v2266_v55 = vld [vmem:[#allocation3 + $0x7d8] sm:$0xff] }
 0x5f3   :  { %2625 = vmatpush1.bf16.msra.mxu0 %v2167_v56  ;;  %2789 = vmatpush1.bf16.msra.mxu1 %v2169_v57  ;;  %v2263_v56 = vld [vmem:[#allocation3 + $0x7c0] sm:$0xff]  ;;  %v2265_v57 = vld [vmem:[#allocation3 + $0x7d0] sm:$0xff] }
 0x5f4   :  { %2626 = vmatprep.subr.bf16.mxu0 %v2176_v58  ;;  %2790 = vmatprep.subr.bf16.mxu1 %v2178_v59  ;;  %v2272_v58 = vld [vmem:[#allocation3 + $0x808] sm:$0xff]  ;;  %v2274_v59 = vld [vmem:[#allocation3 + $0x818] sm:$0xff] }
 0x5f7   :  { %2627 = vmatpush1.bf16.msra.mxu0 %v2175_v10  ;;  %2791 = vmatpush1.bf16.msra.mxu1 %v2177_v60  ;;  %v4154_v10 = vpack.c.bf16 %v4119_v4, %v4119_v4  ;;  %v2271_v60 = vld [vmem:[#allocation3 + $0x800] sm:$0xff] }
 0x5f8   :  { %2628 = vmatprep.subr.bf16.mxu0 %v2184_v46  ;;  %2792 = vmatprep.subr.bf16.mxu1 %v2186_v61  ;;  %v2273_v46 = vld [vmem:[#allocation3 + $0x810] sm:$0xff]  ;;  %v2280_v61 = vld [vmem:[#allocation3 + $0x848] sm:$0xff]  ;;  %v2279_v4 = vld [vmem:[#allocation3 + $0x840] sm:$0xff] }
 0x5fb   :  { %2629 = vmatpush1.bf16.msra.mxu0 %v2183_v30  ;;  %2793 = vmatpush1.bf16.msra.mxu1 %v2185_v47  ;;  %v2282_v30 = vld [vmem:[#allocation3 + $0x858] sm:$0xff]  ;;  %v4158_v47 = vpack.c.bf16 %v4128_v12, %v4128_v12  ;;  %v2287_v12 = vld [vmem:[#allocation3 + $0x880] sm:$0xff] }
 0x5fc   :  { %2630 = vmatprep.subr.bf16.mxu0 %v2192_v49  ;;  %2794 = vmatprep.subr.bf16.mxu1 %v2194_v20  ;;  %v2281_v49 = vld [vmem:[#allocation3 + $0x850] sm:$0xff]  ;;  %v2288_v20 = vld [vmem:[#allocation3 + $0x888] sm:$0xff] }
 0x5ff   :  { %2631 = vmatpush1.bf16.msra.mxu0 %v2191_v21  ;;  %2795 = vmatpush1.bf16.msra.mxu1 %v2193_v48  ;;  %v2290_v21 = vld [vmem:[#allocation3 + $0x898] sm:$0xff]  ;;  %v2289_v48 = vld [vmem:[#allocation3 + $0x890] sm:$0xff] }
 0x600   :  { %2632 = vmatprep.subr.bf16.mxu0 %v2200_v22  ;;  %2796 = vmatprep.subr.bf16.mxu1 %v2202_v62  ;;  %v2296_v22 = vld [vmem:[#allocation3 + $0x8c8] sm:$0xff]  ;;  %v2298_v62 = vld [vmem:[#allocation3 + $0x8d8] sm:$0xff] }
 0x603   :  { %2633 = vmatpush1.bf16.msra.mxu0 %v2199_v1  ;;  %2797 = vmatpush1.bf16.msra.mxu1 %v2201_v3  ;;  %v2295_v1 = vld [vmem:[#allocation3 + $0x8c0] sm:$0xff]  ;;  %v2297_v3 = vld [vmem:[#allocation3 + $0x8d0] sm:$0xff] }
 0x604   :  { %2634 = vmatprep.subr.bf16.mxu0 %v2208_v43  ;;  %2798 = vmatprep.subr.bf16.mxu1 %v2210_v16  ;;  %v2304_v43 = vld [vmem:[#allocation3 + $0x908] sm:$0xff]  ;;  %v2306_v16 = vld [vmem:[#allocation3 + $0x918] sm:$0xff] }
 0x607   :  { %2635 = vmatpush1.bf16.msra.mxu0 %v2207_v19  ;;  %2799 = vmatpush1.bf16.msra.mxu1 %v2209_v23  ;;  %v2303_v19 = vld [vmem:[#allocation3 + $0x900] sm:$0xff]  ;;  %v2305_v23 = vld [vmem:[#allocation3 + $0x910] sm:$0xff] }
 0x608   :  { %2636 = vmatprep.subr.bf16.mxu0 %v2216_v24  ;;  %2800 = vmatprep.subr.bf16.mxu1 %v2218_v25  ;;  %v2312_v24 = vld [vmem:[#allocation3 + $0x948] sm:$0xff]  ;;  %v2314_v25 = vld [vmem:[#allocation3 + $0x958] sm:$0xff] }
 0x60b   :  { %2637 = vmatpush1.bf16.msra.mxu0 %v2215_v33  ;;  %2801 = vmatpush1.bf16.msra.mxu1 %v2217_v34  ;;  %v2311_v33 = vld [vmem:[#allocation3 + $0x940] sm:$0xff]  ;;  %v2313_v34 = vld [vmem:[#allocation3 + $0x950] sm:$0xff] }
 0x60c   :  { %2638 = vmatprep.subr.bf16.mxu0 %v2224_v35  ;;  %2802 = vmatprep.subr.bf16.mxu1 %v2226_v11  ;;  %v2320_v35 = vld [vmem:[#allocation3 + $0x988] sm:$0xff]  ;;  %v2322_v11 = vld [vmem:[#allocation3 + $0x998] sm:$0xff] }
 0x60f   :  { %2639 = vmatpush1.bf16.msra.mxu0 %v2223_v29  ;;  %2803 = vmatpush1.bf16.msra.mxu1 %v2225_v7  ;;  %v2319_v29 = vld [vmem:[#allocation3 + $0x980] sm:$0xff]  ;;  %v2321_v7 = vld [vmem:[#allocation3 + $0x990] sm:$0xff] }
 0x610   :  { %2640 = vmatprep.subr.bf16.mxu0 %v2232_v31  ;;  %2804 = vmatprep.subr.bf16.mxu1 %v2234_v32  ;;  %v2328_v31 = vld [vmem:[#allocation3 + $0x9c8] sm:$0xff]  ;;  %v2330_v32 = vld [vmem:[#allocation3 + $0x9d8] sm:$0xff] }
 0x613   :  { %2641 = vmatpush1.bf16.msra.mxu0 %v2231_v36  ;;  %2805 = vmatpush1.bf16.msra.mxu1 %v2233_v9  ;;  %v2327_v36 = vld [vmem:[#allocation3 + $0x9c0] sm:$0xff]  ;;  %v2329_v9 = vld [vmem:[#allocation3 + $0x9d0] sm:$0xff] }
 0x614   :  { %2642 = vmatprep.subr.bf16.mxu0 %v2240_v37  ;;  %2806 = vmatprep.subr.bf16.mxu1 %v2242_v38  ;;  %v2336_v37 = vld [vmem:[#allocation3 + $0xa08] sm:$0xff]  ;;  %v2338_v38 = vld [vmem:[#allocation3 + $0xa18] sm:$0xff] }
 0x617   :  { %2643 = vmatpush1.bf16.msra.mxu0 %v2239_v40  ;;  %2807 = vmatpush1.bf16.msra.mxu1 %v2241_v41  ;;  %v2335_v40 = vld [vmem:[#allocation3 + $0xa00] sm:$0xff]  ;;  %v2337_v41 = vld [vmem:[#allocation3 + $0xa10] sm:$0xff] }
 0x618   :  { %2644 = vmatprep.subr.bf16.mxu0 %v2248_v42  ;;  %2808 = vmatprep.subr.bf16.mxu1 %v2250_v44  ;;  %v2344_v42 = vld [vmem:[#allocation3 + $0xa48] sm:$0xff]  ;;  %v2346_v44 = vld [vmem:[#allocation3 + $0xa58] sm:$0xff] }
 0x61b   :  { %2645 = vmatpush1.bf16.msra.mxu0 %v2247_v2  ;;  %2809 = vmatpush1.bf16.msra.mxu1 %v2249_v50  ;;  %v2343_v2 = vld [vmem:[#allocation3 + $0xa40] sm:$0xff]  ;;  %v2345_v50 = vld [vmem:[#allocation3 + $0xa50] sm:$0xff] }
 0x61c   :  { %2646 = vmatprep.subr.bf16.mxu0 %v2256_v51  ;;  %2810 = vmatprep.subr.bf16.mxu1 %v2258_v8  ;;  %v2352_v51 = vld [vmem:[#allocation3 + $0xa88] sm:$0xff]  ;;  %v2354_v8 = vld [vmem:[#allocation3 + $0xa98] sm:$0xff] }
 0x61f   :  { %2647 = vmatpush1.bf16.msra.mxu0 %v2255_v5  ;;  %2811 = vmatpush1.bf16.msra.mxu1 %v2257_v52  ;;  %v2351_v5 = vld [vmem:[#allocation3 + $0xa80] sm:$0xff]  ;;  %v2353_v52 = vld [vmem:[#allocation3 + $0xa90] sm:$0xff] }
 0x620   :  { %2648 = vmatprep.subr.bf16.mxu0 %v2264_v54  ;;  %2812 = vmatprep.subr.bf16.mxu1 %v2266_v55  ;;  %v2360_v54 = vld [vmem:[#allocation3 + $0xac8] sm:$0xff]  ;;  %v2362_v55 = vld [vmem:[#allocation3 + $0xad8] sm:$0xff] }
 0x623   :  { %2649 = vmatpush1.bf16.msra.mxu0 %v2263_v56  ;;  %2813 = vmatpush1.bf16.msra.mxu1 %v2265_v57  ;;  %v2359_v56 = vld [vmem:[#allocation3 + $0xac0] sm:$0xff]  ;;  %v2361_v57 = vld [vmem:[#allocation3 + $0xad0] sm:$0xff] }
 0x624   :  { %2659 = vmatprep.subr.bf16.mxu0 %v2272_v58  ;;  %2823 = vmatprep.subr.bf16.mxu1 %v2274_v59  ;;  %v2368_v58 = vld [vmem:[#allocation3 + $0xb08] sm:$0xff]  ;;  %v2370_v59 = vld [vmem:[#allocation3 + $0xb18] sm:$0xff] }
 0x626   :  { %2651 = vmatmul.mubr.bf16.vlgmr.msra.gmra.mrb[16].mxu0 %v4154_v10  ;;  %2815 = vmatmul.mubr.bf16.vlgmr.msra.gmra.mrb[16].mxu1 %v4154_v10 }
 0x627   :  { %2660 = vmatpush1.bf16.msra.mxu0 %v2271_v60  ;;  %2824 = vmatpush1.bf16.msra.mxu1 %v2273_v46  ;;  %v2367_v60 = vld [vmem:[#allocation3 + $0xb00] sm:$0xff]  ;;  %v2369_v46 = vld [vmem:[#allocation3 + $0xb10] sm:$0xff] }
 0x628   :  { %2661 = vmatprep.subr.bf16.mxu0 %v2280_v61  ;;  %2825 = vmatprep.subr.bf16.mxu1 %v2282_v30  ;;  %v2376_v61 = vld [vmem:[#allocation3 + $0xb48] sm:$0xff]  ;;  %v2378_v30 = vld [vmem:[#allocation3 + $0xb58] sm:$0xff] }
 0x629   :  { %2691 = vmatprep.mubr.bf16.mxu0 %v4158_v47  ;;  %2855 = vmatprep.mubr.bf16.mxu1 %v4158_v47 }
 0x62b   :  { %2662 = vmatpush1.bf16.msra.mxu0 %v2279_v4  ;;  %2826 = vmatpush1.bf16.msra.mxu1 %v2281_v49  ;;  %v2375_v4 = vld [vmem:[#allocation3 + $0xb40] sm:$0xff]  ;;  %v2377_v49 = vld [vmem:[#allocation3 + $0xb50] sm:$0xff] }
 0x62c   :  { %2663 = vmatprep.subr.bf16.mxu0 %v2288_v20  ;;  %2827 = vmatprep.subr.bf16.mxu1 %v2290_v21  ;;  %v2384_v20 = vld [vmem:[#allocation3 + $0xb88] sm:$0xff]  ;;  %v2386_v21 = vld [vmem:[#allocation3 + $0xb98] sm:$0xff] }
 0x62f   :  { %2664 = vmatpush1.bf16.msra.mxu0 %v2287_v12  ;;  %2828 = vmatpush1.bf16.msra.mxu1 %v2289_v48  ;;  %v2383_v12 = vld [vmem:[#allocation3 + $0xb80] sm:$0xff]  ;;  %v2385_v48 = vld [vmem:[#allocation3 + $0xb90] sm:$0xff] }
 0x630   :  { %2665 = vmatprep.subr.bf16.mxu0 %v2296_v22  ;;  %2829 = vmatprep.subr.bf16.mxu1 %v2298_v62  ;;  %v2392_v22 = vld [vmem:[#allocation3 + $0xbc8] sm:$0xff]  ;;  %v2394_v62 = vld [vmem:[#allocation3 + $0xbd8] sm:$0xff] }
 0x633   :  { %2666 = vmatpush1.bf16.msra.mxu0 %v2295_v1  ;;  %2830 = vmatpush1.bf16.msra.mxu1 %v2297_v3  ;;  %v2391_v1 = vld [vmem:[#allocation3 + $0xbc0] sm:$0xff]  ;;  %v2393_v3 = vld [vmem:[#allocation3 + $0xbd0] sm:$0xff] }
 0x634   :  { %2667 = vmatprep.subr.bf16.mxu0 %v2304_v43  ;;  %2831 = vmatprep.subr.bf16.mxu1 %v2306_v16  ;;  %v2400_v43 = vld [vmem:[#allocation3 + $0xc08] sm:$0xff]  ;;  %v2402_v16 = vld [vmem:[#allocation3 + $0xc18] sm:$0xff] }
 0x637   :  { %2668 = vmatpush1.bf16.msra.mxu0 %v2303_v19  ;;  %2832 = vmatpush1.bf16.msra.mxu1 %v2305_v23  ;;  %v4166_v19 = vpack.c.bf16 %v4125_v6, %v4125_v6  ;;  %v2399_v23 = vld [vmem:[#allocation3 + $0xc00] sm:$0xff] }
 0x638   :  { %2669 = vmatprep.subr.bf16.mxu0 %v2312_v24  ;;  %2833 = vmatprep.subr.bf16.mxu1 %v2314_v25  ;;  %v2401_v24 = vld [vmem:[#allocation3 + $0xc10] sm:$0xff]  ;;  %v2408_v25 = vld [vmem:[#allocation3 + $0xc48] sm:$0xff]  ;;  %v2407_v6 = vld [vmem:[#allocation3 + $0xc40] sm:$0xff] }
 0x63b   :  { %2670 = vmatpush1.bf16.msra.mxu0 %v2311_v33  ;;  %2834 = vmatpush1.bf16.msra.mxu1 %v2313_v34  ;;  %v2410_v33 = vld [vmem:[#allocation3 + $0xc58] sm:$0xff]  ;;  %v4170_v34 = vpack.c.bf16 %v4134_v14, %v4134_v14  ;;  %v2415_v14 = vld [vmem:[#allocation3 + $0xc80] sm:$0xff] }
 0x63c   :  { %2671 = vmatprep.subr.bf16.mxu0 %v2320_v35  ;;  %2835 = vmatprep.subr.bf16.mxu1 %v2322_v11  ;;  %v2409_v35 = vld [vmem:[#allocation3 + $0xc50] sm:$0xff]  ;;  %v2416_v11 = vld [vmem:[#allocation3 + $0xc88] sm:$0xff] }
 0x63f   :  { %2672 = vmatpush1.bf16.msra.mxu0 %v2319_v29  ;;  %2836 = vmatpush1.bf16.msra.mxu1 %v2321_v7  ;;  %v2418_v29 = vld [vmem:[#allocation3 + $0xc98] sm:$0xff]  ;;  %v2417_v7 = vld [vmem:[#allocation3 + $0xc90] sm:$0xff] }
 0x640   :  { %2673 = vmatprep.subr.bf16.mxu0 %v2328_v31  ;;  %2837 = vmatprep.subr.bf16.mxu1 %v2330_v32  ;;  %v2424_v31 = vld [vmem:[#allocation3 + $0xcc8] sm:$0xff]  ;;  %v2426_v32 = vld [vmem:[#allocation3 + $0xcd8] sm:$0xff] }
 0x643   :  { %2674 = vmatpush1.bf16.msra.mxu0 %v2327_v36  ;;  %2838 = vmatpush1.bf16.msra.mxu1 %v2329_v9  ;;  %v2423_v36 = vld [vmem:[#allocation3 + $0xcc0] sm:$0xff]  ;;  %v2425_v9 = vld [vmem:[#allocation3 + $0xcd0] sm:$0xff] }
 0x644   :  { %2675 = vmatprep.subr.bf16.mxu0 %v2336_v37  ;;  %2839 = vmatprep.subr.bf16.mxu1 %v2338_v38  ;;  %v2432_v37 = vld [vmem:[#allocation3 + $0xd08] sm:$0xff]  ;;  %v2434_v38 = vld [vmem:[#allocation3 + $0xd18] sm:$0xff] }
 0x647   :  { %2676 = vmatpush1.bf16.msra.mxu0 %v2335_v40  ;;  %2840 = vmatpush1.bf16.msra.mxu1 %v2337_v41  ;;  %v2431_v40 = vld [vmem:[#allocation3 + $0xd00] sm:$0xff]  ;;  %v2433_v41 = vld [vmem:[#allocation3 + $0xd10] sm:$0xff] }
 0x648   :  { %2677 = vmatprep.subr.bf16.mxu0 %v2344_v42  ;;  %2841 = vmatprep.subr.bf16.mxu1 %v2346_v44  ;;  %v2440_v42 = vld [vmem:[#allocation3 + $0xd48] sm:$0xff]  ;;  %v2442_v44 = vld [vmem:[#allocation3 + $0xd58] sm:$0xff] }
 0x64b   :  { %2678 = vmatpush1.bf16.msra.mxu0 %v2343_v2  ;;  %2842 = vmatpush1.bf16.msra.mxu1 %v2345_v50  ;;  %v2439_v2 = vld [vmem:[#allocation3 + $0xd40] sm:$0xff]  ;;  %v2441_v50 = vld [vmem:[#allocation3 + $0xd50] sm:$0xff] }
 0x64c   :  { %2679 = vmatprep.subr.bf16.mxu0 %v2352_v51  ;;  %2843 = vmatprep.subr.bf16.mxu1 %v2354_v8  ;;  %v2448_v51 = vld [vmem:[#allocation3 + $0xd88] sm:$0xff]  ;;  %v2450_v8 = vld [vmem:[#allocation3 + $0xd98] sm:$0xff] }
 0x64f   :  { %2680 = vmatpush1.bf16.msra.mxu0 %v2351_v5  ;;  %2844 = vmatpush1.bf16.msra.mxu1 %v2353_v52  ;;  %v2447_v5 = vld [vmem:[#allocation3 + $0xd80] sm:$0xff]  ;;  %v2449_v52 = vld [vmem:[#allocation3 + $0xd90] sm:$0xff] }
 0x650   :  { %2681 = vmatprep.subr.bf16.mxu0 %v2360_v54  ;;  %2845 = vmatprep.subr.bf16.mxu1 %v2362_v55  ;;  %v2456_v54 = vld [vmem:[#allocation3 + $0xdc8] sm:$0xff]  ;;  %v2458_v55 = vld [vmem:[#allocation3 + $0xdd8] sm:$0xff] }
 0x653   :  { %2682 = vmatpush1.bf16.msra.mxu0 %v2359_v56  ;;  %2846 = vmatpush1.bf16.msra.mxu1 %v2361_v57  ;;  %v2455_v56 = vld [vmem:[#allocation3 + $0xdc0] sm:$0xff]  ;;  %v2457_v57 = vld [vmem:[#allocation3 + $0xdd0] sm:$0xff] }
 0x654   :  { %2683 = vmatprep.subr.bf16.mxu0 %v2368_v58  ;;  %2847 = vmatprep.subr.bf16.mxu1 %v2370_v59  ;;  %v2464_v58 = vld [vmem:[#allocation3 + $0xe08] sm:$0xff]  ;;  %v2466_v59 = vld [vmem:[#allocation3 + $0xe18] sm:$0xff] }
 0x657   :  { %2684 = vmatpush1.bf16.msra.mxu0 %v2367_v60  ;;  %2848 = vmatpush1.bf16.msra.mxu1 %v2369_v46  ;;  %v2463_v60 = vld [vmem:[#allocation3 + $0xe00] sm:$0xff]  ;;  %v2465_v46 = vld [vmem:[#allocation3 + $0xe10] sm:$0xff] }
 0x658   :  { %2685 = vmatprep.subr.bf16.mxu0 %v2376_v61  ;;  %2849 = vmatprep.subr.bf16.mxu1 %v2378_v30  ;;  %v2472_v61 = vld [vmem:[#allocation3 + $0xe48] sm:$0xff]  ;;  %v2474_v30 = vld [vmem:[#allocation3 + $0xe58] sm:$0xff] }
 0x65b   :  { %2686 = vmatpush1.bf16.msra.mxu0 %v2375_v4  ;;  %2850 = vmatpush1.bf16.msra.mxu1 %v2377_v49  ;;  %v2471_v4 = vld [vmem:[#allocation3 + $0xe40] sm:$0xff]  ;;  %v2473_v49 = vld [vmem:[#allocation3 + $0xe50] sm:$0xff] }
 0x65c   :  { %2687 = vmatprep.subr.bf16.mxu0 %v2384_v20  ;;  %2851 = vmatprep.subr.bf16.mxu1 %v2386_v21  ;;  %v2480_v20 = vld [vmem:[#allocation3 + $0xe88] sm:$0xff]  ;;  %v2482_v21 = vld [vmem:[#allocation3 + $0xe98] sm:$0xff] }
 0x65f   :  { %2688 = vmatpush1.bf16.msra.mxu0 %v2383_v12  ;;  %2852 = vmatpush1.bf16.msra.mxu1 %v2385_v48  ;;  %v2479_v12 = vld [vmem:[#allocation3 + $0xe80] sm:$0xff]  ;;  %v2481_v48 = vld [vmem:[#allocation3 + $0xe90] sm:$0xff] }
 0x660   :  { %2689 = vmatprep.subr.bf16.mxu0 %v2392_v22  ;;  %2853 = vmatprep.subr.bf16.mxu1 %v2394_v62  ;;  %v2488_v22 = vld [vmem:[#allocation3 + $0xec8] sm:$0xff]  ;;  %v2490_v62 = vld [vmem:[#allocation3 + $0xed8] sm:$0xff] }
 0x663   :  { %2690 = vmatpush1.bf16.msra.mxu0 %v2391_v1  ;;  %2854 = vmatpush1.bf16.msra.mxu1 %v2393_v3  ;;  %v2487_v1 = vld [vmem:[#allocation3 + $0xec0] sm:$0xff]  ;;  %v2489_v3 = vld [vmem:[#allocation3 + $0xed0] sm:$0xff] }
 0x664   :  { %2700 = vmatprep.subr.bf16.mxu0 %v2400_v43  ;;  %2864 = vmatprep.subr.bf16.mxu1 %v2402_v16  ;;  %v2496_v43 = vld [vmem:[#allocation3 + $0xf08] sm:$0xff]  ;;  %v2498_v16 = vld [vmem:[#allocation3 + $0xf18] sm:$0xff] }
 0x666   :  { %2692 = vmatmul.mubr.bf16.vlgmr.msra.gmra.mrb[16].mxu0 %v4166_v19  ;;  %2856 = vmatmul.mubr.bf16.vlgmr.msra.gmra.mrb[16].mxu1 %v4166_v19 }
 0x667   :  { %2701 = vmatpush1.bf16.msra.mxu0 %v2399_v23  ;;  %2865 = vmatpush1.bf16.msra.mxu1 %v2401_v24  ;;  %v2495_v23 = vld [vmem:[#allocation3 + $0xf00] sm:$0xff]  ;;  %v2497_v24 = vld [vmem:[#allocation3 + $0xf10] sm:$0xff] }
 0x668   :  { %2702 = vmatprep.subr.bf16.mxu0 %v2408_v25  ;;  %2866 = vmatprep.subr.bf16.mxu1 %v2410_v33  ;;  %v2504_v25 = vld [vmem:[#allocation3 + $0xf48] sm:$0xff]  ;;  %v2506_v33 = vld [vmem:[#allocation3 + $0xf58] sm:$0xff] }
 0x669   :  { %2732 = vmatprep.mubr.bf16.mxu0 %v4170_v34  ;;  %2896 = vmatprep.mubr.bf16.mxu1 %v4170_v34 }
 0x66b   :  { %2703 = vmatpush1.bf16.msra.mxu0 %v2407_v6  ;;  %2867 = vmatpush1.bf16.msra.mxu1 %v2409_v35  ;;  %v2503_v6 = vld [vmem:[#allocation3 + $0xf40] sm:$0xff]  ;;  %v2505_v35 = vld [vmem:[#allocation3 + $0xf50] sm:$0xff] }
 0x66c   :  { %2704 = vmatprep.subr.bf16.mxu0 %v2416_v11  ;;  %2868 = vmatprep.subr.bf16.mxu1 %v2418_v29  ;;  %v2512_v11 = vld [vmem:[#allocation3 + $0xf88] sm:$0xff]  ;;  %v2514_v29 = vld [vmem:[#allocation3 + $0xf98] sm:$0xff] }
 0x66f   :  { %2705 = vmatpush1.bf16.msra.mxu0 %v2415_v14  ;;  %2869 = vmatpush1.bf16.msra.mxu1 %v2417_v7  ;;  %v2511_v14 = vld [vmem:[#allocation3 + $0xf80] sm:$0xff]  ;;  %v2513_v7 = vld [vmem:[#allocation3 + $0xf90] sm:$0xff] }
 0x670   :  { %2706 = vmatprep.subr.bf16.mxu0 %v2424_v31  ;;  %2870 = vmatprep.subr.bf16.mxu1 %v2426_v32  ;;  %v2520_v31 = vld [vmem:[#allocation3 + $0xfc8] sm:$0xff]  ;;  %v2522_v32 = vld [vmem:[#allocation3 + $0xfd8] sm:$0xff] }
 0x673   :  { %2707 = vmatpush1.bf16.msra.mxu0 %v2423_v36  ;;  %2871 = vmatpush1.bf16.msra.mxu1 %v2425_v9  ;;  %v2519_v36 = vld [vmem:[#allocation3 + $0xfc0] sm:$0xff]  ;;  %v2521_v9 = vld [vmem:[#allocation3 + $0xfd0] sm:$0xff] }
 0x674   :  { %2708 = vmatprep.subr.bf16.mxu0 %v2432_v37  ;;  %2872 = vmatprep.subr.bf16.mxu1 %v2434_v38  ;;  %v2020_v37 = vld [vmem:[#allocation3 + $0x28] sm:$0xff]  ;;  %v2022_v38 = vld [vmem:[#allocation3 + $0x38] sm:$0xff] }
 0x677   :  { %2709 = vmatpush1.bf16.msra.mxu0 %v2431_v40  ;;  %2873 = vmatpush1.bf16.msra.mxu1 %v2433_v41  ;;  %v4178_v40 = vpack.c.bf16 %v4131_v13, %v4131_v13  ;;  %v2019_v41 = vld [vmem:[#allocation3 + $0x20] sm:$0xff]  ;;  %v2036_v13 = vld [vmem:[#allocation3 + $0xa8] sm:$0xff] }
 0x678   :  { %2710 = vmatprep.subr.bf16.mxu0 %v2440_v42  ;;  %2874 = vmatprep.subr.bf16.mxu1 %v2442_v44  ;;  %v2021_v42 = vld [vmem:[#allocation3 + $0x30] sm:$0xff]  ;;  %v2028_v44 = vld [vmem:[#allocation3 + $0x68] sm:$0xff] }
 0x67b   :  { %2711 = vmatpush1.bf16.msra.mxu0 %v2439_v2  ;;  %2875 = vmatpush1.bf16.msra.mxu1 %v2441_v50  ;;  %v2030_v2 = vld [vmem:[#allocation3 + $0x78] sm:$0xff]  ;;  %v2027_v50 = vld [vmem:[#allocation3 + $0x60] sm:$0xff] }
 0x67c   :  { %2712 = vmatprep.subr.bf16.mxu0 %v2448_v51  ;;  %2876 = vmatprep.subr.bf16.mxu1 %v2450_v8  ;;  %v2029_v51 = vld [vmem:[#allocation3 + $0x70] sm:$0xff]  ;;  %v2038_v8 = vld [vmem:[#allocation3 + $0xb8] sm:$0xff] }
 0x67f   :  { %2713 = vmatpush1.bf16.msra.mxu0 %v2447_v5  ;;  %2877 = vmatpush1.bf16.msra.mxu1 %v2449_v52  ;;  %v2035_v5 = vld [vmem:[#allocation3 + $0xa0] sm:$0xff]  ;;  %v2037_v52 = vld [vmem:[#allocation3 + $0xb0] sm:$0xff] }
 0x680   :  { %2714 = vmatprep.subr.bf16.mxu0 %v2456_v54  ;;  %2878 = vmatprep.subr.bf16.mxu1 %v2458_v55  ;;  %v2044_v54 = vld [vmem:[#allocation3 + $0xe8] sm:$0xff]  ;;  %v2046_v55 = vld [vmem:[#allocation3 + $0xf8] sm:$0xff] }
 0x683   :  { %2715 = vmatpush1.bf16.msra.mxu0 %v2455_v56  ;;  %2879 = vmatpush1.bf16.msra.mxu1 %v2457_v57  ;;  %v2043_v56 = vld [vmem:[#allocation3 + $0xe0] sm:$0xff]  ;;  %v2045_v57 = vld [vmem:[#allocation3 + $0xf0] sm:$0xff] }
 0x684   :  { %2716 = vmatprep.subr.bf16.mxu0 %v2464_v58  ;;  %2880 = vmatprep.subr.bf16.mxu1 %v2466_v59  ;;  %v2052_v58 = vld [vmem:[#allocation3 + $0x128] sm:$0xff]  ;;  %v2054_v59 = vld [vmem:[#allocation3 + $0x138] sm:$0xff] }
 0x687   :  { %2717 = vmatpush1.bf16.msra.mxu0 %v2463_v60  ;;  %2881 = vmatpush1.bf16.msra.mxu1 %v2465_v46  ;;  %v2053_v60 = vld [vmem:[#allocation3 + $0x130] sm:$0xff]  ;;  %v2060_v46 = vld [vmem:[#allocation3 + $0x168] sm:$0xff] }
 0x688   :  { %2718 = vmatprep.subr.bf16.mxu0 %v2472_v61  ;;  %2882 = vmatprep.subr.bf16.mxu1 %v2474_v30  ;;  %v2062_v61 = vld [vmem:[#allocation3 + $0x178] sm:$0xff]  ;;  %v2059_v30 = vld [vmem:[#allocation3 + $0x160] sm:$0xff] }
 0x68b   :  { %2719 = vmatpush1.bf16.msra.mxu0 %v2471_v4  ;;  %2883 = vmatpush1.bf16.msra.mxu1 %v2473_v49  ;;  %v2061_v4 = vld [vmem:[#allocation3 + $0x170] sm:$0xff]  ;;  %v2068_v49 = vld [vmem:[#allocation3 + $0x1a8] sm:$0xff] }
 0x68c   :  { %2720 = vmatprep.subr.bf16.mxu0 %v2480_v20  ;;  %2884 = vmatprep.subr.bf16.mxu1 %v2482_v21  ;;  %v2070_v20 = vld [vmem:[#allocation3 + $0x1b8] sm:$0xff]  ;;  %v2067_v21 = vld [vmem:[#allocation3 + $0x1a0] sm:$0xff] }
 0x68f   :  { %2721 = vmatpush1.bf16.msra.mxu0 %v2479_v12  ;;  %2885 = vmatpush1.bf16.msra.mxu1 %v2481_v48  ;;  %v2069_v12 = vld [vmem:[#allocation3 + $0x1b0] sm:$0xff]  ;;  %v2076_v48 = vld [vmem:[#allocation3 + $0x1e8] sm:$0xff] }
 0x690   :  { %2722 = vmatprep.subr.bf16.mxu0 %v2488_v22  ;;  %2886 = vmatprep.subr.bf16.mxu1 %v2490_v62  ;;  %v2078_v22 = vld [vmem:[#allocation3 + $0x1f8] sm:$0xff]  ;;  %v2075_v62 = vld [vmem:[#allocation3 + $0x1e0] sm:$0xff] }
 0x693   :  { %2723 = vmatpush1.bf16.msra.mxu0 %v2487_v1  ;;  %2887 = vmatpush1.bf16.msra.mxu1 %v2489_v3  ;;  %v2077_v1 = vld [vmem:[#allocation3 + $0x1f0] sm:$0xff]  ;;  %v2084_v3 = vld [vmem:[#allocation3 + $0x228] sm:$0xff] }
 0x694   :  { %2724 = vmatprep.subr.bf16.mxu0 %v2496_v43  ;;  %2888 = vmatprep.subr.bf16.mxu1 %v2498_v16  ;;  %v2086_v43 = vld [vmem:[#allocation3 + $0x238] sm:$0xff]  ;;  %v2083_v16 = vld [vmem:[#allocation3 + $0x220] sm:$0xff] }
 0x697   :  { %2725 = vmatpush1.bf16.msra.mxu0 %v2495_v23  ;;  %2889 = vmatpush1.bf16.msra.mxu1 %v2497_v24  ;;  %v2085_v23 = vld [vmem:[#allocation3 + $0x230] sm:$0xff]  ;;  %v2092_v24 = vld [vmem:[#allocation3 + $0x268] sm:$0xff] }
 0x698   :  { %2726 = vmatprep.subr.bf16.mxu0 %v2504_v25  ;;  %2890 = vmatprep.subr.bf16.mxu1 %v2506_v33  ;;  %v2094_v25 = vld [vmem:[#allocation3 + $0x278] sm:$0xff]  ;;  %v2091_v33 = vld [vmem:[#allocation3 + $0x260] sm:$0xff] }
 0x69b   :  { %2727 = vmatpush1.bf16.msra.mxu0 %v2503_v6  ;;  %2891 = vmatpush1.bf16.msra.mxu1 %v2505_v35  ;;  %v2093_v6 = vld [vmem:[#allocation3 + $0x270] sm:$0xff]  ;;  %v2100_v35 = vld [vmem:[#allocation3 + $0x2a8] sm:$0xff] }
 0x69c   :  { %2728 = vmatprep.subr.bf16.mxu0 %v2512_v11  ;;  %2892 = vmatprep.subr.bf16.mxu1 %v2514_v29  ;;  %v2102_v11 = vld [vmem:[#allocation3 + $0x2b8] sm:$0xff]  ;;  %v2099_v29 = vld [vmem:[#allocation3 + $0x2a0] sm:$0xff] }
 0x69f   :  { %2729 = vmatpush1.bf16.msra.mxu0 %v2511_v14  ;;  %2893 = vmatpush1.bf16.msra.mxu1 %v2513_v7  ;;  %v2101_v14 = vld [vmem:[#allocation3 + $0x2b0] sm:$0xff]  ;;  %v2108_v7 = vld [vmem:[#allocation3 + $0x2e8] sm:$0xff] }
 0x6a0   :  { %2730 = vmatprep.subr.bf16.mxu0 %v2520_v31  ;;  %2894 = vmatprep.subr.bf16.mxu1 %v2522_v32  ;;  %v2110_v31 = vld [vmem:[#allocation3 + $0x2f8] sm:$0xff]  ;;  %v2107_v32 = vld [vmem:[#allocation3 + $0x2e0] sm:$0xff] }
 0x6a3   :  { %2731 = vmatpush1.bf16.msra.mxu0 %v2519_v36  ;;  %2895 = vmatpush1.bf16.msra.mxu1 %v2521_v9  ;;  %v2109_v36 = vld [vmem:[#allocation3 + $0x2f0] sm:$0xff]  ;;  %v2116_v9 = vld [vmem:[#allocation3 + $0x328] sm:$0xff] }
 0x6a4   :  { %2905 = vmatprep.subr.bf16.mxu0 %v2020_v37  ;;  %3069 = vmatprep.subr.bf16.mxu1 %v2022_v38  ;;  %v2118_v37 = vld [vmem:[#allocation3 + $0x338] sm:$0xff]  ;;  %v2115_v38 = vld [vmem:[#allocation3 + $0x320] sm:$0xff] }
 0x6a6   :  { %2733 = vmatmul.mubr.bf16.vlgmr.msra.gmra.mrb[16].mxu0 %v4178_v40  ;;  %2897 = vmatmul.mubr.bf16.vlgmr.msra.gmra.mrb[16].mxu1 %v4178_v40 }
 0x6a7   :  { %2906 = vmatpush1.bf16.msra.mxu0 %v2019_v41  ;;  %3070 = vmatpush1.bf16.msra.mxu1 %v2021_v42  ;;  %v2117_v41 = vld [vmem:[#allocation3 + $0x330] sm:$0xff]  ;;  %v2124_v42 = vld [vmem:[#allocation3 + $0x368] sm:$0xff] }
 0x6a8   :  { %2907 = vmatprep.subr.bf16.mxu0 %v2028_v44  ;;  %3071 = vmatprep.subr.bf16.mxu1 %v2030_v2  ;;  %v2126_v44 = vld [vmem:[#allocation3 + $0x378] sm:$0xff]  ;;  %v2123_v2 = vld [vmem:[#allocation3 + $0x360] sm:$0xff] }
 0x6a9   :  { %2937 = vmatprep.mubr.bf16.mxu0 %v4136_v15  ;;  %3101 = vmatprep.mubr.bf16.mxu1 %v4136_v15  ;;  %v2051_v15 = vld [vmem:[#allocation3 + $0x120] sm:$0xff] }
 0x6ab   :  { %2908 = vmatpush1.bf16.msra.mxu0 %v2027_v50  ;;  %3072 = vmatpush1.bf16.msra.mxu1 %v2029_v51  ;;  %v2125_v50 = vld [vmem:[#allocation3 + $0x370] sm:$0xff]  ;;  %v2132_v51 = vld [vmem:[#allocation3 + $0x3a8] sm:$0xff] }
 0x6ac   :  { %2909 = vmatprep.subr.bf16.mxu0 %v2036_v13  ;;  %3073 = vmatprep.subr.bf16.mxu1 %v2038_v8  ;;  %v2134_v13 = vld [vmem:[#allocation3 + $0x3b8] sm:$0xff]  ;;  %v2131_v8 = vld [vmem:[#allocation3 + $0x3a0] sm:$0xff] }
 0x6af   :  { %2910 = vmatpush1.bf16.msra.mxu0 %v2035_v5  ;;  %3074 = vmatpush1.bf16.msra.mxu1 %v2037_v52  ;;  %v2133_v5 = vld [vmem:[#allocation3 + $0x3b0] sm:$0xff]  ;;  %v2140_v52 = vld [vmem:[#allocation3 + $0x3e8] sm:$0xff] }
 0x6b0   :  { %2911 = vmatprep.subr.bf16.mxu0 %v2044_v54  ;;  %3075 = vmatprep.subr.bf16.mxu1 %v2046_v55  ;;  %v2142_v54 = vld [vmem:[#allocation3 + $0x3f8] sm:$0xff]  ;;  %v2139_v55 = vld [vmem:[#allocation3 + $0x3e0] sm:$0xff] }
 0x6b3   :  { %2912 = vmatpush1.bf16.msra.mxu0 %v2043_v56  ;;  %3076 = vmatpush1.bf16.msra.mxu1 %v2045_v57  ;;  %v2141_v56 = vld [vmem:[#allocation3 + $0x3f0] sm:$0xff]  ;;  %v2148_v57 = vld [vmem:[#allocation3 + $0x428] sm:$0xff] }
 0x6b4   :  { %2913 = vmatprep.subr.bf16.mxu0 %v2052_v58  ;;  %3077 = vmatprep.subr.bf16.mxu1 %v2054_v59  ;;  %v2150_v58 = vld [vmem:[#allocation3 + $0x438] sm:$0xff]  ;;  %v2147_v59 = vld [vmem:[#allocation3 + $0x420] sm:$0xff] }
 0x6b7   :  { %2914 = vmatpush1.bf16.msra.mxu0 %v2051_v15  ;;  %3078 = vmatpush1.bf16.msra.mxu1 %v2053_v60  ;;  %v2149_v15 = vld [vmem:[#allocation3 + $0x430] sm:$0xff]  ;;  %v2156_v60 = vld [vmem:[#allocation3 + $0x468] sm:$0xff] }
 0x6b8   :  { %2915 = vmatprep.subr.bf16.mxu0 %v2060_v46  ;;  %3079 = vmatprep.subr.bf16.mxu1 %v2062_v61  ;;  %v2158_v46 = vld [vmem:[#allocation3 + $0x478] sm:$0xff]  ;;  %v2155_v61 = vld [vmem:[#allocation3 + $0x460] sm:$0xff] }
 0x6bb   :  { %2916 = vmatpush1.bf16.msra.mxu0 %v2059_v30  ;;  %3080 = vmatpush1.bf16.msra.mxu1 %v2061_v4  ;;  %v2157_v30 = vld [vmem:[#allocation3 + $0x470] sm:$0xff]  ;;  %v2164_v4 = vld [vmem:[#allocation3 + $0x4a8] sm:$0xff] }
 0x6bc   :  { %2917 = vmatprep.subr.bf16.mxu0 %v2068_v49  ;;  %3081 = vmatprep.subr.bf16.mxu1 %v2070_v20  ;;  %v2166_v49 = vld [vmem:[#allocation3 + $0x4b8] sm:$0xff]  ;;  %v2163_v20 = vld [vmem:[#allocation3 + $0x4a0] sm:$0xff] }
 0x6bf   :  { %2918 = vmatpush1.bf16.msra.mxu0 %v2067_v21  ;;  %3082 = vmatpush1.bf16.msra.mxu1 %v2069_v12  ;;  %v2165_v21 = vld [vmem:[#allocation3 + $0x4b0] sm:$0xff]  ;;  %v2172_v12 = vld [vmem:[#allocation3 + $0x4e8] sm:$0xff] }
 0x6c0   :  { %2919 = vmatprep.subr.bf16.mxu0 %v2076_v48  ;;  %3083 = vmatprep.subr.bf16.mxu1 %v2078_v22  ;;  %v2171_v48 = vld [vmem:[#allocation3 + $0x4e0] sm:$0xff]  ;;  %v2173_v22 = vld [vmem:[#allocation3 + $0x4f0] sm:$0xff] }
 0x6c3   :  { %2920 = vmatpush1.bf16.msra.mxu0 %v2075_v62  ;;  %3084 = vmatpush1.bf16.msra.mxu1 %v2077_v1  ;;  %v2180_v62 = vld [vmem:[#allocation3 + $0x528] sm:$0xff]  ;;  %v2182_v1 = vld [vmem:[#allocation3 + $0x538] sm:$0xff] }
 0x6c4   :  { %2921 = vmatprep.subr.bf16.mxu0 %v2084_v3  ;;  %3085 = vmatprep.subr.bf16.mxu1 %v2086_v43  ;;  %v2181_v3 = vld [vmem:[#allocation3 + $0x530] sm:$0xff]  ;;  %v2188_v43 = vld [vmem:[#allocation3 + $0x568] sm:$0xff] }
 0x6c7   :  { %2922 = vmatpush1.bf16.msra.mxu0 %v2083_v16  ;;  %3086 = vmatpush1.bf16.msra.mxu1 %v2085_v23  ;;  %v2190_v16 = vld [vmem:[#allocation3 + $0x578] sm:$0xff]  ;;  %v2187_v23 = vld [vmem:[#allocation3 + $0x560] sm:$0xff] }
 0x6c8   :  { %2923 = vmatprep.subr.bf16.mxu0 %v2092_v24  ;;  %3087 = vmatprep.subr.bf16.mxu1 %v2094_v25  ;;  %v2189_v24 = vld [vmem:[#allocation3 + $0x570] sm:$0xff]  ;;  %v2196_v25 = vld [vmem:[#allocation3 + $0x5a8] sm:$0xff] }
 0x6cb   :  { %2924 = vmatpush1.bf16.msra.mxu0 %v2091_v33  ;;  %3088 = vmatpush1.bf16.msra.mxu1 %v2093_v6  ;;  %v2198_v33 = vld [vmem:[#allocation3 + $0x5b8] sm:$0xff]  ;;  %v2195_v6 = vld [vmem:[#allocation3 + $0x5a0] sm:$0xff] }
 0x6cc   :  { %2925 = vmatprep.subr.bf16.mxu0 %v2100_v35  ;;  %3089 = vmatprep.subr.bf16.mxu1 %v2102_v11  ;;  %v2197_v35 = vld [vmem:[#allocation3 + $0x5b0] sm:$0xff]  ;;  %v2204_v11 = vld [vmem:[#allocation3 + $0x5e8] sm:$0xff] }
 0x6cf   :  { %2926 = vmatpush1.bf16.msra.mxu0 %v2099_v29  ;;  %3090 = vmatpush1.bf16.msra.mxu1 %v2101_v14  ;;  %v2206_v29 = vld [vmem:[#allocation3 + $0x5f8] sm:$0xff]  ;;  %v2203_v14 = vld [vmem:[#allocation3 + $0x5e0] sm:$0xff] }
 0x6d0   :  { %2927 = vmatprep.subr.bf16.mxu0 %v2108_v7  ;;  %3091 = vmatprep.subr.bf16.mxu1 %v2110_v31  ;;  %v2205_v7 = vld [vmem:[#allocation3 + $0x5f0] sm:$0xff]  ;;  %v2212_v31 = vld [vmem:[#allocation3 + $0x628] sm:$0xff] }
 0x6d3   :  { %2928 = vmatpush1.bf16.msra.mxu0 %v2107_v32  ;;  %3092 = vmatpush1.bf16.msra.mxu1 %v2109_v36  ;;  %v2214_v32 = vld [vmem:[#allocation3 + $0x638] sm:$0xff]  ;;  %v2211_v36 = vld [vmem:[#allocation3 + $0x620] sm:$0xff] }
 0x6d4   :  { %2929 = vmatprep.subr.bf16.mxu0 %v2116_v9  ;;  %3093 = vmatprep.subr.bf16.mxu1 %v2118_v37  ;;  %v2213_v9 = vld [vmem:[#allocation3 + $0x630] sm:$0xff]  ;;  %v2220_v37 = vld [vmem:[#allocation3 + $0x668] sm:$0xff] }
 0x6d7   :  { %2930 = vmatpush1.bf16.msra.mxu0 %v2115_v38  ;;  %3094 = vmatpush1.bf16.msra.mxu1 %v2117_v41  ;;  %v2222_v38 = vld [vmem:[#allocation3 + $0x678] sm:$0xff]  ;;  %v2219_v41 = vld [vmem:[#allocation3 + $0x660] sm:$0xff] }
 0x6d8   :  { %2931 = vmatprep.subr.bf16.mxu0 %v2124_v42  ;;  %3095 = vmatprep.subr.bf16.mxu1 %v2126_v44  ;;  %v2221_v42 = vld [vmem:[#allocation3 + $0x670] sm:$0xff]  ;;  %v2228_v44 = vld [vmem:[#allocation3 + $0x6a8] sm:$0xff] }
 0x6db   :  { %2932 = vmatpush1.bf16.msra.mxu0 %v2123_v2  ;;  %3096 = vmatpush1.bf16.msra.mxu1 %v2125_v50  ;;  %v2230_v2 = vld [vmem:[#allocation3 + $0x6b8] sm:$0xff]  ;;  %v2227_v50 = vld [vmem:[#allocation3 + $0x6a0] sm:$0xff] }
 0x6dc   :  { %2933 = vmatprep.subr.bf16.mxu0 %v2132_v51  ;;  %3097 = vmatprep.subr.bf16.mxu1 %v2134_v13  ;;  %v2229_v51 = vld [vmem:[#allocation3 + $0x6b0] sm:$0xff]  ;;  %v2236_v13 = vld [vmem:[#allocation3 + $0x6e8] sm:$0xff] }
 0x6df   :  { %2934 = vmatpush1.bf16.msra.mxu0 %v2131_v8  ;;  %3098 = vmatpush1.bf16.msra.mxu1 %v2133_v5  ;;  %v2238_v8 = vld [vmem:[#allocation3 + $0x6f8] sm:$0xff]  ;;  %v2235_v5 = vld [vmem:[#allocation3 + $0x6e0] sm:$0xff] }
 0x6e0   :  { %2935 = vmatprep.subr.bf16.mxu0 %v2140_v52  ;;  %3099 = vmatprep.subr.bf16.mxu1 %v2142_v54  ;;  %v2237_v52 = vld [vmem:[#allocation3 + $0x6f0] sm:$0xff]  ;;  %v2244_v54 = vld [vmem:[#allocation3 + $0x728] sm:$0xff] }
 0x6e3   :  { %2936 = vmatpush1.bf16.msra.mxu0 %v2139_v55  ;;  %3100 = vmatpush1.bf16.msra.mxu1 %v2141_v56  ;;  %v2246_v55 = vld [vmem:[#allocation3 + $0x738] sm:$0xff]  ;;  %v2243_v56 = vld [vmem:[#allocation3 + $0x720] sm:$0xff] }
 0x6e4   :  { %2946 = vmatprep.subr.bf16.mxu0 %v2148_v57  ;;  %3110 = vmatprep.subr.bf16.mxu1 %v2150_v58  ;;  %v2245_v57 = vld [vmem:[#allocation3 + $0x730] sm:$0xff]  ;;  %v2252_v58 = vld [vmem:[#allocation3 + $0x768] sm:$0xff] }
 0x6e6   :  { %2938 = vmatmul.mubr.bf16.vlgmr.msra.gmra.mrb[20].mxu0 %v4142_v39  ;;  %3102 = vmatmul.mubr.bf16.vlgmr.msra.gmra.mrb[20].mxu1 %v4142_v39  ;;  %v2174_v39 = vld [vmem:[#allocation3 + $0x4f8] sm:$0xff] }
 0x6e7   :  { %2947 = vmatpush1.bf16.msra.mxu0 %v2147_v59  ;;  %3111 = vmatpush1.bf16.msra.mxu1 %v2149_v15  ;;  %v2254_v59 = vld [vmem:[#allocation3 + $0x778] sm:$0xff]  ;;  %v2251_v15 = vld [vmem:[#allocation3 + $0x760] sm:$0xff] }
 0x6e8   :  { %2948 = vmatprep.subr.bf16.mxu0 %v2156_v60  ;;  %3112 = vmatprep.subr.bf16.mxu1 %v2158_v46  ;;  %v2253_v60 = vld [vmem:[#allocation3 + $0x770] sm:$0xff]  ;;  %v2260_v46 = vld [vmem:[#allocation3 + $0x7a8] sm:$0xff] }
 0x6e9   :  { %2978 = vmatprep.mubr.bf16.mxu0 %v4146_v45  ;;  %3142 = vmatprep.mubr.bf16.mxu1 %v4146_v45  ;;  %v2179_v45 = vld [vmem:[#allocation3 + $0x520] sm:$0xff] }
 0x6eb   :  { %2949 = vmatpush1.bf16.msra.mxu0 %v2155_v61  ;;  %3113 = vmatpush1.bf16.msra.mxu1 %v2157_v30  ;;  %v2262_v61 = vld [vmem:[#allocation3 + $0x7b8] sm:$0xff]  ;;  %v2259_v30 = vld [vmem:[#allocation3 + $0x7a0] sm:$0xff] }
 0x6ec   :  { %2950 = vmatprep.subr.bf16.mxu0 %v2164_v4  ;;  %3114 = vmatprep.subr.bf16.mxu1 %v2166_v49  ;;  %v2261_v4 = vld [vmem:[#allocation3 + $0x7b0] sm:$0xff]  ;;  %v2268_v49 = vld [vmem:[#allocation3 + $0x7e8] sm:$0xff] }
 0x6ef   :  { %2951 = vmatpush1.bf16.msra.mxu0 %v2163_v20  ;;  %3115 = vmatpush1.bf16.msra.mxu1 %v2165_v21  ;;  %v2270_v20 = vld [vmem:[#allocation3 + $0x7f8] sm:$0xff]  ;;  %v2267_v21 = vld [vmem:[#allocation3 + $0x7e0] sm:$0xff] }
 0x6f0   :  { %2952 = vmatprep.subr.bf16.mxu0 %v2172_v12  ;;  %3116 = vmatprep.subr.bf16.mxu1 %v2174_v39  ;;  %v2269_v12 = vld [vmem:[#allocation3 + $0x7f0] sm:$0xff]  ;;  %v2276_v39 = vld [vmem:[#allocation3 + $0x828] sm:$0xff] }
 0x6f3   :  { %2953 = vmatpush1.bf16.msra.mxu0 %v2171_v48  ;;  %3117 = vmatpush1.bf16.msra.mxu1 %v2173_v22  ;;  %v2278_v48 = vld [vmem:[#allocation3 + $0x838] sm:$0xff]  ;;  %v2275_v22 = vld [vmem:[#allocation3 + $0x820] sm:$0xff] }
 0x6f4   :  { %2954 = vmatprep.subr.bf16.mxu0 %v2180_v62  ;;  %3118 = vmatprep.subr.bf16.mxu1 %v2182_v1  ;;  %v2277_v62 = vld [vmem:[#allocation3 + $0x830] sm:$0xff]  ;;  %v2284_v1 = vld [vmem:[#allocation3 + $0x868] sm:$0xff] }
 0x6f7   :  { %2955 = vmatpush1.bf16.msra.mxu0 %v2179_v45  ;;  %3119 = vmatpush1.bf16.msra.mxu1 %v2181_v3  ;;  %v2286_v45 = vld [vmem:[#allocation3 + $0x878] sm:$0xff]  ;;  %v2283_v3 = vld [vmem:[#allocation3 + $0x860] sm:$0xff] }
 0x6f8   :  { %2956 = vmatprep.subr.bf16.mxu0 %v2188_v43  ;;  %3120 = vmatprep.subr.bf16.mxu1 %v2190_v16  ;;  %v2285_v43 = vld [vmem:[#allocation3 + $0x870] sm:$0xff]  ;;  %v2292_v16 = vld [vmem:[#allocation3 + $0x8a8] sm:$0xff] }
 0x6fb   :  { %2957 = vmatpush1.bf16.msra.mxu0 %v2187_v23  ;;  %3121 = vmatpush1.bf16.msra.mxu1 %v2189_v24  ;;  %v2294_v23 = vld [vmem:[#allocation3 + $0x8b8] sm:$0xff]  ;;  %v2291_v24 = vld [vmem:[#allocation3 + $0x8a0] sm:$0xff] }
 0x6fc   :  { %2958 = vmatprep.subr.bf16.mxu0 %v2196_v25  ;;  %3122 = vmatprep.subr.bf16.mxu1 %v2198_v33  ;;  %v2293_v25 = vld [vmem:[#allocation3 + $0x8b0] sm:$0xff]  ;;  %v2300_v33 = vld [vmem:[#allocation3 + $0x8e8] sm:$0xff] }
 0x6ff   :  { %2959 = vmatpush1.bf16.msra.mxu0 %v2195_v6  ;;  %3123 = vmatpush1.bf16.msra.mxu1 %v2197_v35  ;;  %v2299_v6 = vld [vmem:[#allocation3 + $0x8e0] sm:$0xff]  ;;  %v2301_v35 = vld [vmem:[#allocation3 + $0x8f0] sm:$0xff] }
 0x700   :  { %2960 = vmatprep.subr.bf16.mxu0 %v2204_v11  ;;  %3124 = vmatprep.subr.bf16.mxu1 %v2206_v29  ;;  %v2308_v11 = vld [vmem:[#allocation3 + $0x928] sm:$0xff]  ;;  %v2310_v29 = vld [vmem:[#allocation3 + $0x938] sm:$0xff] }
 0x703   :  { %2961 = vmatpush1.bf16.msra.mxu0 %v2203_v14  ;;  %3125 = vmatpush1.bf16.msra.mxu1 %v2205_v7  ;;  %v2309_v14 = vld [vmem:[#allocation3 + $0x930] sm:$0xff]  ;;  %v2316_v7 = vld [vmem:[#allocation3 + $0x968] sm:$0xff] }
 0x704   :  { %2962 = vmatprep.subr.bf16.mxu0 %v2212_v31  ;;  %3126 = vmatprep.subr.bf16.mxu1 %v2214_v32  ;;  %v2318_v31 = vld [vmem:[#allocation3 + $0x978] sm:$0xff]  ;;  %v2315_v32 = vld [vmem:[#allocation3 + $0x960] sm:$0xff] }
 0x707   :  { %2963 = vmatpush1.bf16.msra.mxu0 %v2211_v36  ;;  %3127 = vmatpush1.bf16.msra.mxu1 %v2213_v9  ;;  %v2317_v36 = vld [vmem:[#allocation3 + $0x970] sm:$0xff]  ;;  %v2324_v9 = vld [vmem:[#allocation3 + $0x9a8] sm:$0xff] }
 0x708   :  { %2964 = vmatprep.subr.bf16.mxu0 %v2220_v37  ;;  %3128 = vmatprep.subr.bf16.mxu1 %v2222_v38  ;;  %v2326_v37 = vld [vmem:[#allocation3 + $0x9b8] sm:$0xff]  ;;  %v2323_v38 = vld [vmem:[#allocation3 + $0x9a0] sm:$0xff] }
 0x70b   :  { %2965 = vmatpush1.bf16.msra.mxu0 %v2219_v41  ;;  %3129 = vmatpush1.bf16.msra.mxu1 %v2221_v42  ;;  %v2325_v41 = vld [vmem:[#allocation3 + $0x9b0] sm:$0xff]  ;;  %v2332_v42 = vld [vmem:[#allocation3 + $0x9e8] sm:$0xff] }
 0x70c   :  { %2966 = vmatprep.subr.bf16.mxu0 %v2228_v44  ;;  %3130 = vmatprep.subr.bf16.mxu1 %v2230_v2  ;;  %v2334_v44 = vld [vmem:[#allocation3 + $0x9f8] sm:$0xff]  ;;  %v2331_v2 = vld [vmem:[#allocation3 + $0x9e0] sm:$0xff] }
 0x70f   :  { %2967 = vmatpush1.bf16.msra.mxu0 %v2227_v50  ;;  %3131 = vmatpush1.bf16.msra.mxu1 %v2229_v51  ;;  %v2333_v50 = vld [vmem:[#allocation3 + $0x9f0] sm:$0xff]  ;;  %v2340_v51 = vld [vmem:[#allocation3 + $0xa28] sm:$0xff] }
 0x710   :  { %2968 = vmatprep.subr.bf16.mxu0 %v2236_v13  ;;  %3132 = vmatprep.subr.bf16.mxu1 %v2238_v8  ;;  %v2342_v13 = vld [vmem:[#allocation3 + $0xa38] sm:$0xff]  ;;  %v2339_v8 = vld [vmem:[#allocation3 + $0xa20] sm:$0xff] }
 0x713   :  { %2969 = vmatpush1.bf16.msra.mxu0 %v2235_v5  ;;  %3133 = vmatpush1.bf16.msra.mxu1 %v2237_v52  ;;  %v2341_v5 = vld [vmem:[#allocation3 + $0xa30] sm:$0xff]  ;;  %v2348_v52 = vld [vmem:[#allocation3 + $0xa68] sm:$0xff] }
 0x714   :  { %2970 = vmatprep.subr.bf16.mxu0 %v2244_v54  ;;  %3134 = vmatprep.subr.bf16.mxu1 %v2246_v55  ;;  %v2350_v54 = vld [vmem:[#allocation3 + $0xa78] sm:$0xff]  ;;  %v2347_v55 = vld [vmem:[#allocation3 + $0xa60] sm:$0xff] }
 0x717   :  { %2971 = vmatpush1.bf16.msra.mxu0 %v2243_v56  ;;  %3135 = vmatpush1.bf16.msra.mxu1 %v2245_v57  ;;  %v2349_v56 = vld [vmem:[#allocation3 + $0xa70] sm:$0xff]  ;;  %v2356_v57 = vld [vmem:[#allocation3 + $0xaa8] sm:$0xff] }
 0x718   :  { %2972 = vmatprep.subr.bf16.mxu0 %v2252_v58  ;;  %3136 = vmatprep.subr.bf16.mxu1 %v2254_v59  ;;  %v2358_v58 = vld [vmem:[#allocation3 + $0xab8] sm:$0xff]  ;;  %v2355_v59 = vld [vmem:[#allocation3 + $0xaa0] sm:$0xff] }
 0x71b   :  { %2973 = vmatpush1.bf16.msra.mxu0 %v2251_v15  ;;  %3137 = vmatpush1.bf16.msra.mxu1 %v2253_v60  ;;  %v2357_v15 = vld [vmem:[#allocation3 + $0xab0] sm:$0xff]  ;;  %v2364_v60 = vld [vmem:[#allocation3 + $0xae8] sm:$0xff] }
 0x71c   :  { %2974 = vmatprep.subr.bf16.mxu0 %v2260_v46  ;;  %3138 = vmatprep.subr.bf16.mxu1 %v2262_v61  ;;  %v2366_v46 = vld [vmem:[#allocation3 + $0xaf8] sm:$0xff]  ;;  %v2363_v61 = vld [vmem:[#allocation3 + $0xae0] sm:$0xff] }
 0x71f   :  { %2975 = vmatpush1.bf16.msra.mxu0 %v2259_v30  ;;  %3139 = vmatpush1.bf16.msra.mxu1 %v2261_v4  ;;  %v2365_v30 = vld [vmem:[#allocation3 + $0xaf0] sm:$0xff]  ;;  %v2372_v4 = vld [vmem:[#allocation3 + $0xb28] sm:$0xff] }
 0x720   :  { %2976 = vmatprep.subr.bf16.mxu0 %v2268_v49  ;;  %3140 = vmatprep.subr.bf16.mxu1 %v2270_v20  ;;  %v2374_v49 = vld [vmem:[#allocation3 + $0xb38] sm:$0xff]  ;;  %v2371_v20 = vld [vmem:[#allocation3 + $0xb20] sm:$0xff] }
 0x723   :  { %2977 = vmatpush1.bf16.msra.mxu0 %v2267_v21  ;;  %3141 = vmatpush1.bf16.msra.mxu1 %v2269_v12  ;;  %v2373_v21 = vld [vmem:[#allocation3 + $0xb30] sm:$0xff]  ;;  %v2380_v12 = vld [vmem:[#allocation3 + $0xb68] sm:$0xff] }
 0x724   :  { %2987 = vmatprep.subr.bf16.mxu0 %v2276_v39  ;;  %3151 = vmatprep.subr.bf16.mxu1 %v2278_v48  ;;  %v2382_v39 = vld [vmem:[#allocation3 + $0xb78] sm:$0xff]  ;;  %v2379_v48 = vld [vmem:[#allocation3 + $0xb60] sm:$0xff] }
 0x726   :  { %2979 = vmatmul.mubr.bf16.vlgmr.msra.gmra.mrb[20].mxu0 %v4154_v10  ;;  %3143 = vmatmul.mubr.bf16.vlgmr.msra.gmra.mrb[20].mxu1 %v4154_v10  ;;  %v2302_v10 = vld [vmem:[#allocation3 + $0x8f8] sm:$0xff] }
 0x727   :  { %2988 = vmatpush1.bf16.msra.mxu0 %v2275_v22  ;;  %3152 = vmatpush1.bf16.msra.mxu1 %v2277_v62  ;;  %v2381_v22 = vld [vmem:[#allocation3 + $0xb70] sm:$0xff]  ;;  %v2388_v62 = vld [vmem:[#allocation3 + $0xba8] sm:$0xff] }
 0x728   :  { %2989 = vmatprep.subr.bf16.mxu0 %v2284_v1  ;;  %3153 = vmatprep.subr.bf16.mxu1 %v2286_v45  ;;  %v2390_v1 = vld [vmem:[#allocation3 + $0xbb8] sm:$0xff]  ;;  %v2387_v45 = vld [vmem:[#allocation3 + $0xba0] sm:$0xff] }
 0x729   :  { %3019 = vmatprep.mubr.bf16.mxu0 %v4158_v47  ;;  %3183 = vmatprep.mubr.bf16.mxu1 %v4158_v47  ;;  %v2307_v47 = vld [vmem:[#allocation3 + $0x920] sm:$0xff] }
 0x72b   :  { %2990 = vmatpush1.bf16.msra.mxu0 %v2283_v3  ;;  %3154 = vmatpush1.bf16.msra.mxu1 %v2285_v43  ;;  %v2389_v3 = vld [vmem:[#allocation3 + $0xbb0] sm:$0xff]  ;;  %v2396_v43 = vld [vmem:[#allocation3 + $0xbe8] sm:$0xff] }
 0x72c   :  { %2991 = vmatprep.subr.bf16.mxu0 %v2292_v16  ;;  %3155 = vmatprep.subr.bf16.mxu1 %v2294_v23  ;;  %v2398_v16 = vld [vmem:[#allocation3 + $0xbf8] sm:$0xff]  ;;  %v2395_v23 = vld [vmem:[#allocation3 + $0xbe0] sm:$0xff] }
 0x72f   :  { %2992 = vmatpush1.bf16.msra.mxu0 %v2291_v24  ;;  %3156 = vmatpush1.bf16.msra.mxu1 %v2293_v25  ;;  %v2397_v24 = vld [vmem:[#allocation3 + $0xbf0] sm:$0xff]  ;;  %v2404_v25 = vld [vmem:[#allocation3 + $0xc28] sm:$0xff] }
 0x730   :  { %2993 = vmatprep.subr.bf16.mxu0 %v2300_v33  ;;  %3157 = vmatprep.subr.bf16.mxu1 %v2302_v10  ;;  %v2406_v33 = vld [vmem:[#allocation3 + $0xc38] sm:$0xff]  ;;  %v2403_v10 = vld [vmem:[#allocation3 + $0xc20] sm:$0xff] }
 0x733   :  { %2994 = vmatpush1.bf16.msra.mxu0 %v2299_v6  ;;  %3158 = vmatpush1.bf16.msra.mxu1 %v2301_v35  ;;  %v2405_v6 = vld [vmem:[#allocation3 + $0xc30] sm:$0xff]  ;;  %v2412_v35 = vld [vmem:[#allocation3 + $0xc68] sm:$0xff] }
 0x734   :  { %2995 = vmatprep.subr.bf16.mxu0 %v2308_v11  ;;  %3159 = vmatprep.subr.bf16.mxu1 %v2310_v29  ;;  %v2414_v11 = vld [vmem:[#allocation3 + $0xc78] sm:$0xff]  ;;  %v2411_v29 = vld [vmem:[#allocation3 + $0xc60] sm:$0xff] }
 0x737   :  { %2996 = vmatpush1.bf16.msra.mxu0 %v2307_v47  ;;  %3160 = vmatpush1.bf16.msra.mxu1 %v2309_v14  ;;  %v2413_v47 = vld [vmem:[#allocation3 + $0xc70] sm:$0xff]  ;;  %v2420_v14 = vld [vmem:[#allocation3 + $0xca8] sm:$0xff] }
 0x738   :  { %2997 = vmatprep.subr.bf16.mxu0 %v2316_v7  ;;  %3161 = vmatprep.subr.bf16.mxu1 %v2318_v31  ;;  %v2422_v7 = vld [vmem:[#allocation3 + $0xcb8] sm:$0xff]  ;;  %v2419_v31 = vld [vmem:[#allocation3 + $0xca0] sm:$0xff] }
 0x73b   :  { %2998 = vmatpush1.bf16.msra.mxu0 %v2315_v32  ;;  %3162 = vmatpush1.bf16.msra.mxu1 %v2317_v36  ;;  %v2421_v32 = vld [vmem:[#allocation3 + $0xcb0] sm:$0xff]  ;;  %v2428_v36 = vld [vmem:[#allocation3 + $0xce8] sm:$0xff] }
 0x73c   :  { %2999 = vmatprep.subr.bf16.mxu0 %v2324_v9  ;;  %3163 = vmatprep.subr.bf16.mxu1 %v2326_v37  ;;  %v2427_v9 = vld [vmem:[#allocation3 + $0xce0] sm:$0xff]  ;;  %v2429_v37 = vld [vmem:[#allocation3 + $0xcf0] sm:$0xff] }
 0x73f   :  { %3000 = vmatpush1.bf16.msra.mxu0 %v2323_v38  ;;  %3164 = vmatpush1.bf16.msra.mxu1 %v2325_v41  ;;  %v2436_v38 = vld [vmem:[#allocation3 + $0xd28] sm:$0xff]  ;;  %v2438_v41 = vld [vmem:[#allocation3 + $0xd38] sm:$0xff] }
 0x740   :  { %3001 = vmatprep.subr.bf16.mxu0 %v2332_v42  ;;  %3165 = vmatprep.subr.bf16.mxu1 %v2334_v44  ;;  %v4196_v42 = vld [vmem:[#allocation13 + $0x1d] sm:$0xff] }
 0x741   :  { %v2437_v44 = vld [vmem:[#allocation3 + $0xd30] sm:$0xff] }
 0x743   :  { %3002 = vmatpush1.bf16.msra.mxu0 %v2331_v2  ;;  %3166 = vmatpush1.bf16.msra.mxu1 %v2333_v50  ;;  %v2444_v2 = vld [vmem:[#allocation3 + $0xd68] sm:$0xff]  ;;  %v2446_v50 = vld [vmem:[#allocation3 + $0xd78] sm:$0xff] }
 0x744   :  { %3003 = vmatprep.subr.bf16.mxu0 %v2340_v51  ;;  %3167 = vmatprep.subr.bf16.mxu1 %v2342_v13  ;;  %v2540_v51 = vrot.slane %v4196_v42, %v3949_v17  ;;  %v2548_v13 = vrot.slane %v4196_v42, %v3978_v63 }
 0x747   :  { %3004 = vmatpush1.bf16.msra.mxu0 %v2339_v8  ;;  %3168 = vmatpush1.bf16.msra.mxu1 %v2341_v5  ;;  %v2544_v8 = vrot.slane %v4196_v42, %v3952_v18  ;;  %v2552_v5 = vrot.slane %v4196_v42, %v3981_v0 }
 0x748   :  { %3005 = vmatprep.subr.bf16.mxu0 %v2348_v52  ;;  %3169 = vmatprep.subr.bf16.mxu1 %v2350_v54  ;;  %v2443_v52 = vld [vmem:[#allocation3 + $0xd60] sm:$0xff]  ;;  %v2445_v54 = vld [vmem:[#allocation3 + $0xd70] sm:$0xff] }
 0x74b   :  { %3006 = vmatpush1.bf16.msra.mxu0 %v2347_v55  ;;  %3170 = vmatpush1.bf16.msra.mxu1 %v2349_v56 }
 0x74c   :  { %3007 = vmatprep.subr.bf16.mxu0 %v2356_v57  ;;  %3171 = vmatprep.subr.bf16.mxu1 %v2358_v58  ;;  %v2452_v57 = vld [vmem:[#allocation3 + $0xda8] sm:$0xff]  ;;  %v2454_v58 = vld [vmem:[#allocation3 + $0xdb8] sm:$0xff] }
 0x74f   :  { %3008 = vmatpush1.bf16.msra.mxu0 %v2355_v59  ;;  %3172 = vmatpush1.bf16.msra.mxu1 %v2357_v15 }
 0x750   :  { %3009 = vmatprep.subr.bf16.mxu0 %v2364_v60  ;;  %3173 = vmatprep.subr.bf16.mxu1 %v2366_v46 }
 0x753   :  { %3010 = vmatpush1.bf16.msra.mxu0 %v2363_v61  ;;  %3174 = vmatpush1.bf16.msra.mxu1 %v2365_v30 }
 0x754   :  { %3011 = vmatprep.subr.bf16.mxu0 %v2372_v4  ;;  %3175 = vmatprep.subr.bf16.mxu1 %v2374_v49  ;;  %v2451_v4 = vld [vmem:[#allocation3 + $0xda0] sm:$0xff]  ;;  %v2453_v49 = vld [vmem:[#allocation3 + $0xdb0] sm:$0xff] }
 0x757   :  { %3012 = vmatpush1.bf16.msra.mxu0 %v2371_v20  ;;  %3176 = vmatpush1.bf16.msra.mxu1 %v2373_v21  ;;  %v2460_v20 = vld [vmem:[#allocation3 + $0xde8] sm:$0xff]  ;;  %v2462_v21 = vld [vmem:[#allocation3 + $0xdf8] sm:$0xff] }
 0x758   :  { %3013 = vmatprep.subr.bf16.mxu0 %v2380_v12  ;;  %3177 = vmatprep.subr.bf16.mxu1 %v2382_v39  ;;  %v2459_v12 = vld [vmem:[#allocation3 + $0xde0] sm:$0xff]  ;;  %v2461_v39 = vld [vmem:[#allocation3 + $0xdf0] sm:$0xff] }
 0x75b   :  { %3014 = vmatpush1.bf16.msra.mxu0 %v2379_v48  ;;  %3178 = vmatpush1.bf16.msra.mxu1 %v2381_v22  ;;  %v2468_v48 = vld [vmem:[#allocation3 + $0xe28] sm:$0xff]  ;;  %v2470_v22 = vld [vmem:[#allocation3 + $0xe38] sm:$0xff] }
 0x75c   :  { %3015 = vmatprep.subr.bf16.mxu0 %v2388_v62  ;;  %3179 = vmatprep.subr.bf16.mxu1 %v2390_v1  ;;  %v2467_v62 = vld [vmem:[#allocation3 + $0xe20] sm:$0xff]  ;;  %v2469_v1 = vld [vmem:[#allocation3 + $0xe30] sm:$0xff] }
 0x75f   :  { %3016 = vmatpush1.bf16.msra.mxu0 %v2387_v45  ;;  %3180 = vmatpush1.bf16.msra.mxu1 %v2389_v3  ;;  %v2476_v45 = vld [vmem:[#allocation3 + $0xe68] sm:$0xff]  ;;  %v2478_v3 = vld [vmem:[#allocation3 + $0xe78] sm:$0xff] }
 0x760   :  { %3017 = vmatprep.subr.bf16.mxu0 %v2396_v43  ;;  %3181 = vmatprep.subr.bf16.mxu1 %v2398_v16 }
 0x763   :  { %3018 = vmatpush1.bf16.msra.mxu0 %v2395_v23  ;;  %3182 = vmatpush1.bf16.msra.mxu1 %v2397_v24  ;;  %v2475_v24 = vld [vmem:[#allocation3 + $0xe60] sm:$0xff] }
 0x764   :  { %3028 = vmatprep.subr.bf16.mxu0 %v2404_v25  ;;  %3192 = vmatprep.subr.bf16.mxu1 %v2406_v33  ;;  %v2477_v25 = vld [vmem:[#allocation3 + $0xe70] sm:$0xff] }
 0x766   :  { %3020 = vmatmul.mubr.bf16.vlgmr.msra.gmra.mrb[20].mxu0 %v4166_v19  ;;  %3184 = vmatmul.mubr.bf16.vlgmr.msra.gmra.mrb[20].mxu1 %v4166_v19  ;;  %v2430_v19 = vld [vmem:[#allocation3 + $0xcf8] sm:$0xff] }
 0x767   :  { %3029 = vmatpush1.bf16.msra.mxu0 %v2403_v10  ;;  %3193 = vmatpush1.bf16.msra.mxu1 %v2405_v6  ;;  %v2484_v10 = vld [vmem:[#allocation3 + $0xea8] sm:$0xff]  ;;  %v2486_v6 = vld [vmem:[#allocation3 + $0xeb8] sm:$0xff] }
 0x768   :  { %3030 = vmatprep.subr.bf16.mxu0 %v2412_v35  ;;  %3194 = vmatprep.subr.bf16.mxu1 %v2414_v11  ;;  %v2483_v35 = vld [vmem:[#allocation3 + $0xea0] sm:$0xff]  ;;  %v2485_v11 = vld [vmem:[#allocation3 + $0xeb0] sm:$0xff] }
 0x769   :  { %3060 = vmatprep.mubr.bf16.mxu0 %v4170_v34  ;;  %3224 = vmatprep.mubr.bf16.mxu1 %v4170_v34  ;;  %v2435_v34 = vld [vmem:[#allocation3 + $0xd20] sm:$0xff] }
 0x76b   :  { %3031 = vmatpush1.bf16.msra.mxu0 %v2411_v29  ;;  %3195 = vmatpush1.bf16.msra.mxu1 %v2413_v47  ;;  %v2492_v29 = vld [vmem:[#allocation3 + $0xee8] sm:$0xff]  ;;  %v2494_v47 = vld [vmem:[#allocation3 + $0xef8] sm:$0xff] }
 0x76c   :  { %3032 = vmatprep.subr.bf16.mxu0 %v2420_v14  ;;  %3196 = vmatprep.subr.bf16.mxu1 %v2422_v7  ;;  %v2491_v14 = vld [vmem:[#allocation3 + $0xee0] sm:$0xff]  ;;  %v2493_v7 = vld [vmem:[#allocation3 + $0xef0] sm:$0xff] }
 0x76f   :  { %3033 = vmatpush1.bf16.msra.mxu0 %v2419_v31  ;;  %3197 = vmatpush1.bf16.msra.mxu1 %v2421_v32  ;;  %v2500_v31 = vld [vmem:[#allocation3 + $0xf28] sm:$0xff]  ;;  %v2502_v32 = vld [vmem:[#allocation3 + $0xf38] sm:$0xff] }
 0x770   :  { %3034 = vmatprep.subr.bf16.mxu0 %v2428_v36  ;;  %3198 = vmatprep.subr.bf16.mxu1 %v2430_v19  ;;  %v2499_v36 = vld [vmem:[#allocation3 + $0xf20] sm:$0xff]  ;;  %v2501_v19 = vld [vmem:[#allocation3 + $0xf30] sm:$0xff] }
 0x773   :  { %3035 = vmatpush1.bf16.msra.mxu0 %v2427_v9  ;;  %3199 = vmatpush1.bf16.msra.mxu1 %v2429_v37  ;;  %v2508_v9 = vld [vmem:[#allocation3 + $0xf68] sm:$0xff]  ;;  %v2510_v37 = vld [vmem:[#allocation3 + $0xf78] sm:$0xff] }
 0x774   :  { %3036 = vmatprep.subr.bf16.mxu0 %v2436_v38  ;;  %3200 = vmatprep.subr.bf16.mxu1 %v2438_v41  ;;  %v2507_v38 = vld [vmem:[#allocation3 + $0xf60] sm:$0xff]  ;;  %v2509_v41 = vld [vmem:[#allocation3 + $0xf70] sm:$0xff] }
 0x777   :  { %3037 = vmatpush1.bf16.msra.mxu0 %v2435_v34  ;;  %3201 = vmatpush1.bf16.msra.mxu1 %v2437_v44  ;;  %v2516_v34 = vld [vmem:[#allocation3 + $0xfa8] sm:$0xff]  ;;  %v2518_v44 = vld [vmem:[#allocation3 + $0xfb8] sm:$0xff] }
 0x778   :  { %3038 = vmatprep.subr.bf16.mxu0 %v2444_v2  ;;  %3202 = vmatprep.subr.bf16.mxu1 %v2446_v50  ;;  %v2515_v2 = vld [vmem:[#allocation3 + $0xfa0] sm:$0xff]  ;;  %v2517_v50 = vld [vmem:[#allocation3 + $0xfb0] sm:$0xff] }
 0x779   :  { %v2734_v55 = vpop.f32.mrb[16].mxu0  ;;  %v2898_v56 = vpop.f32.mrb[16].mxu1 }
 0x77a   :  { %v3380_v17 = vadd.f32 %v2734_v55, %v2540_v51  ;;  %v3382_v59 = vadd.f32 %v2898_v56, %v2548_v13  ;;  %v2736_v15 = vpop.f32.mrb[17].mxu0  ;;  %v2900_v63 = vpop.f32.mrb[17].mxu1  ;;  %v2524_v51 = vld [vmem:[#allocation3 + $0xfe8] sm:$0xff]  ;;  %v2526_v13 = vld [vmem:[#allocation3 + $0xff8] sm:$0xff]  ;;  %v2560_v55 = vrot.slane %v4196_v42, %v4082_v27  ;;  %v2568_v56 = vrot.slane %v4196_v42, %v4088_v53 }
 0x77b   :  { %v3381_v60 = vadd.f32 %v2736_v15, %v2544_v8  ;;  %v3383_v46 = vadd.f32 %v2900_v63, %v2552_v5  ;;  %v2738_v61 = vpop.f32.mrb[18].mxu0  ;;  %v2902_v30 = vpop.f32.mrb[18].mxu1  ;;  %3039 = vmatpush1.bf16.msra.mxu0 %v2443_v52  ;;  %3203 = vmatpush1.bf16.msra.mxu1 %v2445_v54  ;;  %v2523_v8 = vld [vmem:[#allocation3 + $0xfe0] sm:$0xff]  ;;  %v2525_v5 = vld [vmem:[#allocation3 + $0xff0] sm:$0xff]  ;;  %v2556_v52 = vrot.slane %v4196_v42, %v4079_v26 }
 0x77c   :  { %3627 = vtanh.f32 %v3380_v17  ;;  %v2739_v18 = vpop.f32.mrb[19].mxu0  ;;  %v2903_v0 = vpop.f32.mrb[19].mxu1  ;;  %3040 = vmatprep.subr.bf16.mxu0 %v2452_v57  ;;  %3204 = vmatprep.subr.bf16.mxu1 %v2454_v58  ;;  %v2564_v54 = vrot.slane %v4196_v42, %v4085_v28 }
 0x77d   :  { %3629 = vtanh.f32 %v3382_v59 }
 0x77e   :  { %3631 = vtanh.f32 %v3381_v60 }
 0x77f   :  { %3633 = vtanh.f32 %v3383_v46  ;;  %3041 = vmatpush1.bf16.msra.mxu0 %v2451_v4  ;;  %3205 = vmatpush1.bf16.msra.mxu1 %v2453_v49 }
 0x780   :  { %3042 = vmatprep.subr.bf16.mxu0 %v2460_v20  ;;  %3206 = vmatprep.subr.bf16.mxu1 %v2462_v21 }
 0x783   :  { %3043 = vmatpush1.bf16.msra.mxu0 %v2459_v12  ;;  %3207 = vmatpush1.bf16.msra.mxu1 %v2461_v39 }
 0x784   :  { %3044 = vmatprep.subr.bf16.mxu0 %v2468_v48  ;;  %3208 = vmatprep.subr.bf16.mxu1 %v2470_v22 }
 0x786   :  { %v3628_v43 = vpop.eup %3627 }
 0x787   :  { %v3630_v16 = vpop.eup %3629  ;;  %3241 = vst [vmem:[#allocation14] sm:$0xff] %v3628_v43  ;;  %3045 = vmatpush1.bf16.msra.mxu0 %v2467_v62  ;;  %3209 = vmatpush1.bf16.msra.mxu1 %v2469_v1 }
 0x788   :  { %v3632_v23 = vpop.eup %3631  ;;  %3243 = vst [vmem:[#allocation14 + $0x10] sm:$0xff] %v3630_v16  ;;  %3046 = vmatprep.subr.bf16.mxu0 %v2476_v45  ;;  %3210 = vmatprep.subr.bf16.mxu1 %v2478_v3 }
 0x789   :  { %v3634_v33 = vpop.eup %3633  ;;  %3242 = vst [vmem:[#allocation14 + $0x8] sm:$0xff] %v3632_v23 }
 0x78a   :  { %3244 = vst [vmem:[#allocation14 + $0x18] sm:$0xff] %v3634_v33 }
 0x78b   :  { %3047 = vmatpush1.bf16.msra.mxu0 %v2475_v24  ;;  %3211 = vmatpush1.bf16.msra.mxu1 %v2477_v25 }
 0x78c   :  { %3048 = vmatprep.subr.bf16.mxu0 %v2484_v10  ;;  %3212 = vmatprep.subr.bf16.mxu1 %v2486_v6 }
 0x78f   :  { %3049 = vmatpush1.bf16.msra.mxu0 %v2483_v35  ;;  %3213 = vmatpush1.bf16.msra.mxu1 %v2485_v11 }
 0x790   :  { %3050 = vmatprep.subr.bf16.mxu0 %v2492_v29  ;;  %3214 = vmatprep.subr.bf16.mxu1 %v2494_v47 }
 0x793   :  { %3051 = vmatpush1.bf16.msra.mxu0 %v2491_v14  ;;  %3215 = vmatpush1.bf16.msra.mxu1 %v2493_v7 }
 0x794   :  { %3052 = vmatprep.subr.bf16.mxu0 %v2500_v31  ;;  %3216 = vmatprep.subr.bf16.mxu1 %v2502_v32 }
 0x797   :  { %3053 = vmatpush1.bf16.msra.mxu0 %v2499_v36  ;;  %3217 = vmatpush1.bf16.msra.mxu1 %v2501_v19 }
 0x798   :  { %3054 = vmatprep.subr.bf16.mxu0 %v2508_v9  ;;  %3218 = vmatprep.subr.bf16.mxu1 %v2510_v37 }
 0x79b   :  { %3055 = vmatpush1.bf16.msra.mxu0 %v2507_v38  ;;  %3219 = vmatpush1.bf16.msra.mxu1 %v2509_v41 }
 0x79c   :  { %3056 = vmatprep.subr.bf16.mxu0 %v2516_v34  ;;  %3220 = vmatprep.subr.bf16.mxu1 %v2518_v44 }
 0x79f   :  { %3057 = vmatpush1.bf16.msra.mxu0 %v2515_v2  ;;  %3221 = vmatpush1.bf16.msra.mxu1 %v2517_v50 }
 0x7a0   :  { %3058 = vmatprep.subr.bf16.mxu0 %v2524_v51  ;;  %3222 = vmatprep.subr.bf16.mxu1 %v2526_v13 }
 0x7a3   :  { %3059 = vmatpush1.bf16.msra.mxu0 %v2523_v8  ;;  %3223 = vmatpush1.bf16.msra.mxu1 %v2525_v5 }
 0x7a6   :  { %3061 = vmatmul.mubr.bf16.vlgmr.msra.gmra.mrb[20].mxu0 %v4178_v40  ;;  %3225 = vmatmul.mubr.bf16.vlgmr.msra.gmra.mrb[20].mxu1 %v4178_v40 }
 0x879   :  { %v3062_v57 = vpop.f32.mrb[20].mxu0  ;;  %v3226_v58 = vpop.f32.mrb[20].mxu1 }
 0x87a   :  { %v3384_v17 = vadd.f32 %v3062_v57, %v2556_v52  ;;  %v3386_v59 = vadd.f32 %v3226_v58, %v2564_v54  ;;  %v3064_v15 = vpop.f32.mrb[21].mxu0  ;;  %v3228_v63 = vpop.f32.mrb[21].mxu1 }
 0x87b   :  { %v3385_v60 = vadd.f32 %v3064_v15, %v2560_v55  ;;  %v3387_v40 = vadd.f32 %v3228_v63, %v2568_v56  ;;  %v3066_v46 = vpop.f32.mrb[22].mxu0  ;;  %v3230_v61 = vpop.f32.mrb[22].mxu1 }
 0x87c   :  { %3635 = vtanh.f32 %v3384_v17  ;;  %v3067_v26 = vpop.f32.mrb[23].mxu0  ;;  %v3231_v30 = vpop.f32.mrb[23].mxu1 }
 0x87d   :  { %3637 = vtanh.f32 %v3386_v59 }
 0x87e   :  { %3639 = vtanh.f32 %v3385_v60 }
 0x87f   :  { %3641 = vtanh.f32 %v3387_v40 }
 0x886   :  { %v3636_v27 = vpop.eup %3635 }
 0x887   :  { %v3638_v28 = vpop.eup %3637  ;;  %3245 = vst [vmem:[#allocation14 + $0x20] sm:$0xff] %v3636_v27 }
 0x888   :  { %v3640_v53 = vpop.eup %3639  ;;  %3247 = vst [vmem:[#allocation14 + $0x30] sm:$0xff] %v3638_v28 }
 0x889   :  { %v3642_v42 = vpop.eup %3641  ;;  %3246 = vst [vmem:[#allocation14 + $0x28] sm:$0xff] %v3640_v53 }
 0x88a   :  { %3248 = vst [vmem:[#allocation14 + $0x38] sm:$0xff] %v3642_v42 }
 0x88b   :  { %3764 = shalt.err (!%p3761_p2)
}
 0x88c   :  { %s3765_s17 = scalar_lea.hbm %s4235_s7, 1024 }
 0x88d   :  { %p3766_p3 = scmp.ne.s32.totalorder %s4235_s7, %s3765_s17  ;;  %p3769_p4 = scmp.lt.u32.totalorder %s3765_s17, %s4235_s7 }
 0x88f   :  { %p3771_p5 = pnand %p3769_p4, %p3766_p3 }
 0x891   :  { %3774 = shalt.err (!%p3771_p5)
}
 0x892   :  { %3258 = dma.vmem_to_hbm [thread:$0]  %s3256_s11, 1024, %s4235_s7, [#allocation7]  }
 0x893   :  { %3785 = dma.done.wait [#allocation7], 1024  }
 0x894   :  { %3786 = vsyncadd [#allocation7], 4294966272 }
 0x895   :  { %3262 = vsyncpa [#allocation6], 1 }
 0x896   :  { %3263 = vsyncpa [#allocation9], 1 }
 0x897   :  { %3264 = vsyncpa [#allocation12], 1 }
 0x898   :  { %3265 = vsyncpa [#allocation7], 1 }
 0x899   :  { %3266 = vsyncmov [#allocation4] }
 0x89c   :  { %s3267_s20 = vpop.sfrf %3266 }
 0x89d   :  { %p3367_p6 = scmp.ne.s32.totalorder %s3267_s20, 0 }
 0x89f   :  { %3271 = shalt.err (%p3367_p6)  }
 0x8a0   :  { %3273 = vsyncmov [#allocation4 + $0x1] }
 0x8a3   :  { %s3274_s21 = vpop.sfrf %3273 }
 0x8a4   :  { %p3368_p7 = scmp.ne.s32.totalorder %s3274_s21, 0 }
 0x8a6   :  { %3278 = shalt.err (%p3368_p7)  }

</bundles_post_ra>
